<compile_context>
chip_gen: v7x
topology: tpu7x:2x2x1
jax: 0.10.0
libtpu: 0.0.40
codegen_flags: <defaults>
</compile_context>

<pallas_src>
import functools

import jax
import jax.numpy as jnp
from jax.experimental import pallas as pl
from jax.experimental.pallas import tpu as pltpu

F32 = jnp.float32
BF16 = jnp.bfloat16

VMEM_LIMIT = 40 * 1024 * 1024      # explicit scoped-VMEM limit (safe on v5e/v6e/v7x)
VMEM_BUDGET = 12 * 1024 * 1024     # per-call working-set target used for tile sizing


# ----------------------------------------------------------------------------
# small helpers
# ----------------------------------------------------------------------------
def _round_up(x, m):
    return (x + m - 1) // m * m


class KeyGen:
    def __init__(self, key):
        self.key = key

    def __call__(self):
        self.key, sub = jax.random.split(self.key)
        return sub


# ----------------------------------------------------------------------------
# Pallas kernel 1: fused (LayerNorm?) -> bf16 matmul -> scale/shift -> act
#   used for every conv (1x1 / im2col'd 3x3) and Linear in the model.
# ----------------------------------------------------------------------------
def _make_mm_kernel(act, with_ln):
    def kernel(*refs):
        if with_ln:
            x_ref, w_ref, s_ref, t_ref, g_ref, b_ref, o_ref = refs
            x = x_ref[...].astype(jnp.float32)
            mu = jnp.mean(x, axis=-1, keepdims=True)
            xc = x - mu
            var = jnp.mean(xc * xc, axis=-1, keepdims=True)
            x = xc * jax.lax.rsqrt(var + 1e-5) * g_ref[...] + b_ref[...]
            x = x.astype(jnp.bfloat16)
        else:
            x_ref, w_ref, s_ref, t_ref, o_ref = refs
            x = x_ref[...].astype(jnp.bfloat16)
        y = jnp.dot(x, w_ref[...], preferred_element_type=jnp.float32)
        y = y * s_ref[...] + t_ref[...]
        if act == 'relu':
            y = jnp.maximum(y, 0.0)
        elif act == 'sigmoid':
            y = jax.nn.sigmoid(y)
        o_ref[...] = y
    return kernel


def _pick_tm(M, K, N, x_bytes):
    # double-buffered A tile + double-buffered f32 output tile must fit budget
    per_row = 2 * K * x_bytes + 2 * N * 4
    cap = max(256, VMEM_BUDGET // per_row)
    tm = 256
    while tm * 2 <= min(cap, 4096):
        tm *= 2
    if M <= tm:
        return _round_up(M, 8)
    while tm > 256 and M % tm:
        tm //= 2
    return tm


@functools.partial(jax.jit, static_argnames=('act', 'with_ln'))
def _fused_matmul(x2, w, scale, shift, gamma=None, beta=None, *,
                  act='none', with_ln=False):
    M, K = x2.shape
    N = w.shape[1]
    # pad very narrow outputs (N=1 prediction heads) up to 128 lanes for the MXU
    Nq = N if N >= 96 else 128
    if Nq != N:
        w = jnp.pad(w, ((0, 0), (0, Nq - N)))
        scale = jnp.pad(scale, (0, Nq - N))
        shift = jnp.pad(shift, (0, Nq - N))
    tm = _pick_tm(M, K, Nq, x2.dtype.itemsize)
    Mp = _round_up(M, tm)
    if Mp != M:
        x2 = jnp.pad(x2, ((0, Mp - M), (0, 0)))
    args = [x2, w,
            scale.reshape(1, Nq).astype(F32),
            shift.reshape(1, Nq).astype(F32)]
    in_specs = [pl.BlockSpec((tm, K), lambda i: (i, 0)),
                pl.BlockSpec((K, Nq), lambda i: (0, 0)),     # weight: resident
                pl.BlockSpec((1, Nq), lambda i: (0, 0)),
                pl.BlockSpec((1, Nq), lambda i: (0, 0))]
    if with_ln:
        args += [gamma.reshape(1, K).astype(F32), beta.reshape(1, K).astype(F32)]
        in_specs += [pl.BlockSpec((1, K), lambda i: (0, 0)),
                     pl.BlockSpec((1, K), lambda i: (0, 0))]
    out = pl.pallas_call(
        _make_mm_kernel(act, with_ln),
        out_shape=jax.ShapeDtypeStruct((Mp, Nq), F32),
        grid_spec=pltpu.PrefetchScalarGridSpec(
            num_scalar_prefetch=0, grid=(Mp // tm,),
            in_specs=in_specs,
            out_specs=pl.BlockSpec((tm, Nq), lambda i: (i, 0))),
        compiler_params=pltpu.CompilerParams(
            dimension_semantics=("parallel",),
            vmem_limit_bytes=VMEM_LIMIT),
    )(*args)
    if Mp != M or Nq != N:
        out = out[:M, :N]
    return out


# ----------------------------------------------------------------------------
# Pallas kernel 2: lane-dense 9-tap local attention (LTA and SP_upSampling).
#   grid = (cell blocks, 9 taps); tap axis is a reduction into a resident
#   output block.  Last dim is the 96-wide channel axis (lane dense).
# ----------------------------------------------------------------------------
def _tap_heads_kernel(q_ref, v_ref, o_ref):
    # q: (1, nb, 16, 96) per-channel tap weights, v: (1, nb, 1, 96)
    @pl.when(pl.program_id(1) == 0)
    def _():
        o_ref[...] = jnp.zeros_like(o_ref)
    o_ref[...] += q_ref[0].astype(jnp.float32) * v_ref[0]


def _tap_scalar_kernel(a_ref, v_ref, o_ref):
    # a: (1, nb, 16, 1) scalar tap weights, v: (1, nb, 1, 96)
    @pl.when(pl.program_id(1) == 0)
    def _():
        o_ref[...] = jnp.zeros_like(o_ref)
    o_ref[...] += a_ref[0] * v_ref[0]


def _tap_call(kernel, q, v):
    _, N, P, Cq = q.shape
    C = v.shape[-1]
    nb = 576
    return pl.pallas_call(
        kernel,
        out_shape=jax.ShapeDtypeStruct((N, P, C), F32),
        grid_spec=pltpu.PrefetchScalarGridSpec(
            num_scalar_prefetch=0, grid=(N // nb, 9),
            in_specs=[pl.BlockSpec((1, nb, P, Cq), lambda i, k: (k, i, 0, 0)),
                      pl.BlockSpec((1, nb, 1, C), lambda i, k: (k, i, 0, 0))],
            out_specs=pl.BlockSpec((nb, P, C), lambda i, k: (i, 0, 0))),
        compiler_params=pltpu.CompilerParams(
            dimension_semantics=("parallel", "arbitrary"),
            vmem_limit_bytes=VMEM_LIMIT),
    )(q, v)


# ----------------------------------------------------------------------------
# Pallas kernel 3: standalone sigmoid (only where it follows a bilinear
#   upsample and cannot be fused into a matmul epilogue).  Lane-dense 2-D.
# ----------------------------------------------------------------------------
def _sigmoid_kernel(x_ref, o_ref):
    o_ref[...] = jax.nn.sigmoid(x_ref[...])


@jax.jit
def _sigmoid2d(x2):
    R, C = x2.shape
    tr = min(2048, _round_up(R, 8))
    while tr > 8 and R % tr:
        tr //= 2
    Rp = _round_up(R, tr)
    xp = jnp.pad(x2, ((0, Rp - R), (0, 0))) if Rp != R else x2
    out = pl.pallas_call(
        _sigmoid_kernel,
        out_shape=jax.ShapeDtypeStruct((Rp, C), F32),
        grid_spec=pltpu.PrefetchScalarGridSpec(
            num_scalar_prefetch=0, grid=(Rp // tr,),
            in_specs=[pl.BlockSpec((tr, C), lambda i: (i, 0))],
            out_specs=pl.BlockSpec((tr, C), lambda i: (i, 0))),
        compiler_params=pltpu.CompilerParams(
            dimension_semantics=("parallel",),
            vmem_limit_bytes=VMEM_LIMIT),
    )(xp)
    return out[:R] if Rp != R else out


def sigmoid_map(x):  # x: (B, H, W, 1)
    B, H, W, C = x.shape
    return _sigmoid2d(x.reshape(B * H, W * C)).reshape(B, H, W, C)


# ----------------------------------------------------------------------------
# glue ops built on the kernels (XLA-side data movement only)
# ----------------------------------------------------------------------------
@jax.jit
def _im2col3(x):
    # x: (B,H,W,C) -> (B*H*W, 9*C) bf16 patches, zero padded, tap order (di,dj)
    B, H, W, C = x.shape
    xb = x.astype(BF16)
    xp = jnp.pad(xb, ((0, 0), (1, 1), (1, 1), (0, 0)))
    pat = jnp.concatenate(
        [xp[:, i:i + H, j:j + W, :] for i in range(3) for j in range(3)], axis=-1)
    return pat.reshape(B * H * W, 9 * C)


def conv2d(x, op, act='none'):
    # op: {'w': (k*k*cin, cout) bf16, 'k', 'scale', 'shift'}; BN/bias fused in epilogue
    B, H, W, C = x.shape
    if op['k'] == 3:
        x2 = _im2col3(x)
    else:
        x2 = x.reshape(B * H * W, C)
    y = _fused_matmul(x2, op['w'], op['scale'], op['shift'], act=act, with_ln=False)
    return y.reshape(B, H, W, op['w'].shape[1])


def ln_linear(tokens, op):
    # LayerNorm fused into the matmul prologue (full feature dim in one block)
    B, N, D = tokens.shape
    y = _fused_matmul(tokens.reshape(B * N, D), op['w'], op['scale'], op['shift'],
                      op['g'], op['b'], act='none', with_ln=True)
    return y.reshape(B, N, -1)


@functools.partial(jax.jit, static_argnames=('scale',))
def upsample_bilinear(x, scale):
    # PyTorch UpsamplingBilinear2d => align_corners=True
    B, H, W, C = x.shape
    Ho, Wo = H * scale, W * scale

    def coords(n_in, n_out):
        pos = jnp.arange(n_out, dtype=F32) * (n_in - 1) / (n_out - 1)
        lo = jnp.clip(jnp.floor(pos).astype(jnp.int32), 0, n_in - 2)
        frac = pos - lo.astype(F32)
        return lo, frac

    hl, hf = coords(H, Ho)
    wl, wf = coords(W, Wo)
    xh = (jnp.take(x, hl, axis=1) * (1.0 - hf)[None, :, None, None]
          + jnp.take(x, hl + 1, axis=1) * hf[None, :, None, None])
    y = (jnp.take(xh, wl, axis=2) * (1.0 - wf)[None, None, :, None]
         + jnp.take(xh, wl + 1, axis=2) * wf[None, None, :, None])
    return y


@jax.jit
def pixel_shuffle2(x):
    # NHWC equivalent of NCHW PixelShuffle(2); channel index = c*4 + i*2 + j
    B, H, W, C4 = x.shape
    C = C4 // 4
    x = x.reshape(B, H, W, C, 2, 2)
    x = x.transpose(0, 1, 4, 2, 5, 3)
    return x.reshape(B, 2 * H, 2 * W, C)


def _nine_shifts(fea):
    # replicate-pad + 9 shifted views, same order as v1..v9 / kv1..kv9
    B, G, _, C = fea.shape
    xp = jnp.pad(fea, ((0, 0), (1, 1), (1, 1), (0, 0)), mode='edge')
    return jnp.stack(
        [xp[:, i:i + G, j:j + G, :] for i in range(3) for j in range(3)],
        axis=1)  # (B, 9, G, G, C)


@jax.jit
def lta_attention(q_img, val):
    # q_img: (B,96,96,108) NHWC, channel = tap*12 + head
    # val:   (B,24,24,96)  NHWC, channel = head*8 + e
    # out:   (B,96,96,96)  NHWC, channel = head*8 + e  (fixed permutation of the
    #        PyTorch e*12+head order; absorbed by the following random conv weight)
    B = q_img.shape[0]
    G, P, H, HD, C = 24, 4, 12, 8, 96
    q = q_img.reshape(B, G, P, G, P, 9, H)
    q = q.transpose(5, 0, 1, 3, 2, 4, 6).reshape(9, B * G * G, P * P, H)
    q = jnp.repeat(q, HD, axis=-1).astype(BF16)                  # (9, N, 16, 96)
    v = _nine_shifts(val).transpose(1, 0, 2, 3, 4)               # (9, B, G, G, C)
    v = v.reshape(9, B * G * G, 1, C)
    out = _tap_call(_tap_heads_kernel, q, v)                     # (N, 16, 96)
    out = out.reshape(B, G, G, P, P, C).transpose(0, 1, 3, 2, 4, 5)
    return out.reshape(B, G * P, G * P, C)


@jax.jit
def sp_upsampling(fea, prob_sub):
    # fea: (B,24,24,96), prob_sub: (B,96,96,9) -> (B,96,96,96)
    B, G, _, C = fea.shape
    P = 4
    a = prob_sub.reshape(B, G, P, G, P, 9)
    a = a.transpose(5, 0, 1, 3, 2, 4).reshape(9, B * G * G, P * P, 1).astype(F32)
    v = _nine_shifts(fea).transpose(1, 0, 2, 3, 4).reshape(9, B * G * G, 1, C)
    out = _tap_call(_tap_scalar_kernel, a, v)                    # (N, 16, C)
    out = out.reshape(B, G, G, P, P, C).transpose(0, 1, 3, 2, 4, 5)
    return out.reshape(B, G * P, G * P, C)


# ----------------------------------------------------------------------------
# parameter construction (deterministic, synthetic; eval-mode BN pre-folded)
# ----------------------------------------------------------------------------
def _bn_fold(bias, c):
    # eval BatchNorm2d (running_mean=0, running_var=1, affine identity) folded
    # into per-channel scale/shift applied after the conv bias
    s = jnp.full((c,), 1.0 / (1.0 + 1e-5) ** 0.5, F32)
    t = jnp.zeros((c,), F32)
    return s, bias * s + t


def conv_op(kg, cin, cout, k, bn=True):
    w = (jax.random.normal(kg(), (k * k * cin, cout), F32) * 0.02).astype(BF16)
    b = jnp.zeros((cout,), F32)
    if bn:
        scale, shift = _bn_fold(b, cout)
    else:
        scale, shift = jnp.ones((cout,), F32), b
    return {'w': w, 'k': k, 'scale': scale, 'shift': shift}


def bn_conv_op(kg, cin, cout):
    # eval BatchNorm followed by a 1x1 conv: fold the BN into the conv weights
    s = jnp.full((cin,), 1.0 / (1.0 + 1e-5) ** 0.5, F32)
    t = jnp.zeros((cin,), F32)
    w_raw = jax.random.normal(kg(), (cin, cout), F32) * 0.02
    b = jnp.zeros((cout,), F32)
    w = (s[:, None] * w_raw).astype(BF16)
    shift = b + t @ w_raw
    return {'w': w, 'k': 1, 'scale': jnp.ones((cout,), F32), 'shift': shift}


def ln_lin_op(kg, din, dout):
    w = (jax.random.normal(kg(), (din, dout), F32) * 0.02).astype(BF16)
    return {'w': w, 'scale': jnp.ones((dout,), F32), 'shift': jnp.zeros((dout,), F32),
            'g': jnp.ones((din,), F32), 'b': jnp.zeros((din,), F32)}


def init_params(key, depth):
    kg = KeyGen(key)
    E = 96
    p = {}
    p['proj_sp'] = [ln_lin_op(kg, 384, E) for _ in range(depth)]
    p['proj_sp1'] = [conv_op(kg, E, E, 3) for _ in range(depth)]
    p['up_patch'] = [{'lin': ln_lin_op(kg, 384, 4 * E),
                      'c1': conv_op(kg, E, E, 3),
                      'c2': conv_op(kg, E, E, 3)} for _ in range(depth)]

    def attn_dec():
        return {'proj_temp1': conv_op(kg, E, 108, 1, bn=False),
                'proj_temp2': conv_op(kg, E, 108, 1, bn=False),
                'lin_patch': ln_lin_op(kg, 384, E),
                'lin_sp': ln_lin_op(kg, 384, E),
                'fpatch': bn_conv_op(kg, E, E),
                'fsp': bn_conv_op(kg, E, E),
                'mf_patch': {'c1': conv_op(kg, 2 * E, E, 1), 'c2': conv_op(kg, E, E, 3)},
                'mf_sp': {'c1': conv_op(kg, 2 * E, E, 1), 'c2': conv_op(kg, E, E, 3)},
                'ffn_c1': conv_op(kg, E, E, 3),
                'ffn_c2': conv_op(kg, E, E, 3)}

    p['attn_decoder'] = [attn_dec() for _ in range(depth)]
    p['fea_decoder'] = {
        'mf_fea': [{'c1': conv_op(kg, E, E, 3), 'c2': conv_op(kg, E, E, 3)}
                   for _ in range(depth)],
        'proj_patch': [{'c1': conv_op(kg, 2 * E, E, 1), 'c2': conv_op(kg, E, E, 3)}
                       for _ in range(depth)],
        'proj_sp': [{'c1': conv_op(kg, 2 * E, E, 1), 'c2': conv_op(kg, E, E, 3)}
                    for _ in range(depth)]}
    p['up_patch1'] = [conv_op(kg, E, E, 3) for _ in range(depth)]
    p['up_sp1'] = [conv_op(kg, E, E, 3) for _ in range(depth)]
    p['proj_fea96'] = conv_op(kg, 256, E, 1)
    p['proj_fea192'] = conv_op(kg, 64, E, 1)
    p['seg_pred'] = {'c1': conv_op(kg, depth * E, E, 1),
                     'c2': conv_op(kg, E, E, 3),
                     'c3': conv_op(kg, E, 1, 3, bn=False)}
    p['pred_logits'] = [conv_op(kg, E, E, 3) for _ in range(depth)]
    for name in ('sp_pred', 'patch_pred', 'sp_pred1', 'patch_pred1'):
        p[name] = [conv_op(kg, E, 1, 1, bn=False) for _ in range(depth)]
    return p


# ----------------------------------------------------------------------------
# module forwards
# ----------------------------------------------------------------------------
def attn_decoder_forward(p, temp_fea, temp_sp, temp_patch, prev_patch, prev_sp):
    B = temp_fea.shape[0]
    G, E = 24, 96

    def branch(proj_temp, lin_tok, fconv, mf, tokens, prev):
        q_img = conv2d(temp_fea, proj_temp)                    # (B,96,96,108)
        val = ln_linear(tokens, lin_tok).reshape(B, G, G, E)   # (B,24,24,96)
        fea = lta_attention(q_img, val)                        # (B,96,96,96)
        fea = conv2d(fea, fconv) + prev
        x = jnp.concatenate([fea, temp_fea], axis=-1)
        x = conv2d(x, mf['c1'], act='relu')
        return conv2d(x, mf['c2'])

    fea_patch = branch(p['proj_temp1'], p['lin_patch'], p['fpatch'],
                       p['mf_patch'], temp_patch, prev_patch)
    fea_sp = branch(p['proj_temp2'], p['lin_sp'], p['fsp'],
                    p['mf_sp'], temp_sp, prev_sp)
    x = conv2d(fea_patch + fea_sp, p['ffn_c1'], act='relu')
    x = conv2d(x, p['ffn_c2'], act='relu')
    return x, fea_patch, fea_sp


def fea_decoder_forward(p, temp_fea, fea_patch_list, fea_sp_list, depth):
    mf_fea, patch_logits, sp_logits = [], [], []
    for i in range(depth):
        pp = p['proj_patch'][i]
        t1 = conv2d(jnp.concatenate([temp_fea, fea_patch_list[i]], axis=-1),
                    pp['c1'], act='relu')
        t1 = conv2d(t1, pp['c2'])
        ps = p['proj_sp'][i]
        t2 = conv2d(jnp.concatenate([temp_fea, fea_sp_list[i]], axis=-1),
                    ps['c1'], act='relu')
        t2 = conv2d(t2, ps['c2'])
        pm = p['mf_fea'][i]
        x = conv2d(t1 + t2, pm['c1'], act='relu')
        x = conv2d(x, pm['c2'], act='relu')
        temp_fea = x
        mf_fea.append(x)
        patch_logits.append(t1)
        sp_logits.append(t2)
    return mf_fea, patch_logits, sp_logits


def mdn_forward(params, img_fea192, img_fea96, patch_feas, spc_feas, prob, depth):
    B = img_fea96.shape[0]
    G, E = 24, 96
    prob_sub = prob[:, 0::4, 0::4, :]                          # (B,96,96,9)

    proj_sp = [ln_linear(spc_feas[i], params['proj_sp'][i]).reshape(B, G, G, E)
               for i in range(depth)]

    up_sp = [conv2d(sp_upsampling(proj_sp[i], prob_sub), params['proj_sp1'][i])
             for i in range(depth)]

    up_patch = []
    for i in range(depth):
        pu = params['up_patch'][i]
        t = ln_linear(patch_feas[i], pu['lin']).reshape(B, G, G, 4 * E)
        t = pixel_shuffle2(t)                                  # (B,48,48,96)
        t = conv2d(t, pu['c1'], act='relu')
        t = upsample_bilinear(t, 2)                            # (B,96,96,96)
        up_patch.append(conv2d(t, pu['c2']))

    temp = conv2d(img_fea96, params['proj_fea96'], act='relu')

    fea_dec, pt_logits, sp_logits = [], [], []
    for i in range(1, depth + 1):
        temp, tpt, tsp = attn_decoder_forward(
            params['attn_decoder'][i - 1], temp,
            spc_feas[depth - i], patch_feas[depth - i],
            up_patch[depth - i], up_sp[depth - i])
        fea_dec.append(temp)
        pt_logits.append(tpt)
        sp_logits.append(tsp)

    up_patch1 = [upsample_bilinear(
        conv2d(pt_logits[i], params['up_patch1'][i], act='relu'), 2)
        for i in range(depth)]
    up_sp1 = [upsample_bilinear(
        conv2d(sp_logits[i], params['up_sp1'][i], act='relu'), 2)
        for i in range(depth)]

    temp_fea = conv2d(img_fea192, params['proj_fea192'], act='relu')
    fea_dec1, pt_logits1, sp_logits1 = fea_decoder_forward(
        params['fea_decoder'], temp_fea, up_patch1, up_sp1, depth)

    pred_logits = [conv2d(upsample_bilinear(fea_dec[i], 2),
                          params['pred_logits'][i]) + fea_dec1[i]
                   for i in range(depth)]

    patch_pred = [sigmoid_map(upsample_bilinear(
        conv2d(pt_logits[i], params['patch_pred'][i]), 4)) for i in range(depth)]
    sp_pred = [sigmoid_map(upsample_bilinear(
        conv2d(sp_logits[i], params['sp_pred'][i]), 4)) for i in range(depth)]
    patch_pred1 = [sigmoid_map(upsample_bilinear(
        conv2d(pt_logits1[i], params['patch_pred1'][i]), 2)) for i in range(depth)]
    sp_pred1 = [sigmoid_map(upsample_bilinear(
        conv2d(sp_logits1[i], params['sp_pred1'][i]), 2)) for i in range(depth)]

    sg = params['seg_pred']
    x = jnp.concatenate(pred_logits, axis=-1)
    x = conv2d(x, sg['c1'], act='relu')
    x = conv2d(x, sg['c2'], act='relu')
    x = upsample_bilinear(x, 2)
    seg_pred = conv2d(x, sg['c3'], act='sigmoid')              # sigmoid fused in epilogue

    return seg_pred, patch_pred, sp_pred, patch_pred1, sp_pred1


# ----------------------------------------------------------------------------
# main
# ----------------------------------------------------------------------------
if __name__ == "__main__":
    B = 1
    DEPTH = 1   # depth/batch are free constructor params; grid=24, patch=4, 384-d
                # tokens, 96/192/384 spatial sizes are fixed by the module structure.
    root = jax.random.PRNGKey(0)
    pkey, dkey = jax.random.split(root)
    params = init_params(pkey, DEPTH)

    ks = jax.random.split(dkey, 3 + 2 * DEPTH)
    img_fea192 = jax.random.normal(ks[0], (B, 192, 192, 64), F32)
    img_fea96 = jax.random.normal(ks[1], (B, 96, 96, 256), F32)
    prob = jax.nn.softmax(
        jax.random.normal(ks[2], (B, 384, 384, 9), F32), axis=-1)
    patch_feas = [jax.random.normal(ks[3 + i], (B, 576, 384), F32)
                  for i in range(DEPTH)]
    spc_feas = [jax.random.normal(ks[3 + DEPTH + i], (B, 576, 384), F32)
                for i in range(DEPTH)]

    outs = mdn_forward(params, img_fea192, img_fea96, patch_feas, spc_feas,
                       prob, DEPTH)
    jax.block_until_ready(outs)
    print("KERNEL_OK")
</pallas_src>

<mosaic_0001>
module attributes {stable_mosaic.version = 11 : i64} {
  func.func @kernel(%arg0: i32, %arg1: memref<576x384xf32, #tpu.memory_space<vmem>>, %arg2: memref<384x96xbf16, #tpu.memory_space<vmem>>, %arg3: memref<1x96xf32, #tpu.memory_space<vmem>>, %arg4: memref<1x96xf32, #tpu.memory_space<vmem>>, %arg5: memref<1x384xf32, #tpu.memory_space<vmem>>, %arg6: memref<1x384xf32, #tpu.memory_space<vmem>>, %arg7: memref<576x96xf32, #tpu.memory_space<vmem>>) attributes {dimension_semantics = [#tpu.dimension_semantics<parallel>], iteration_bounds = array<i64: 1>, scalar_prefetch = 0 : i64, scratch_operands = 0 : i64, tpu.core_type = #tpu.core_type<tc>, window_params = [{transform_indices = @transform_0, window_bounds = array<i64: 576, 384>}, {pipeline_mode = #tpu.pipeline_mode<synchronous>, transform_indices = @transform_1, window_bounds = array<i64: 384, 96>}, {pipeline_mode = #tpu.pipeline_mode<synchronous>, transform_indices = @transform_2, window_bounds = array<i64: 1, 96>}, {pipeline_mode = #tpu.pipeline_mode<synchronous>, transform_indices = @transform_3, window_bounds = array<i64: 1, 96>}, {pipeline_mode = #tpu.pipeline_mode<synchronous>, transform_indices = @transform_4, window_bounds = array<i64: 1, 384>}, {pipeline_mode = #tpu.pipeline_mode<synchronous>, transform_indices = @transform_5, window_bounds = array<i64: 1, 384>}, {transform_indices = @transform_6, window_bounds = array<i64: 576, 96>}]} {
    %c0 = arith.constant 0 : index
    %c0_0 = arith.constant 0 : index
    %0 = vector.load %arg1[%c0, %c0_0] : memref<576x384xf32, #tpu.memory_space<vmem>>, vector<576x384xf32>
    %cst = arith.constant dense<0.000000e+00> : vector<576xf32>
    %1 = vector.multi_reduction <add>, %0, %cst [1] : vector<576x384xf32> to vector<576xf32>
    %2 = vector.shape_cast %1 : vector<576xf32> to vector<576x1xf32>
    %cst_1 = arith.constant 3.840000e+02 : f32
    %3 = vector.broadcast %cst_1 : f32 to vector<576x1xf32>
    %4 = arith.divf %2, %3 : vector<576x1xf32>
    %5 = vector.broadcast %4 : vector<576x1xf32> to vector<576x384xf32>
    %6 = arith.subf %0, %5 : vector<576x384xf32>
    %7 = arith.mulf %6, %6 : vector<576x384xf32>
    %cst_2 = arith.constant dense<0.000000e+00> : vector<576xf32>
    %8 = vector.multi_reduction <add>, %7, %cst_2 [1] : vector<576x384xf32> to vector<576xf32>
    %9 = vector.shape_cast %8 : vector<576xf32> to vector<576x1xf32>
    %cst_3 = arith.constant 3.840000e+02 : f32
    %10 = vector.broadcast %cst_3 : f32 to vector<576x1xf32>
    %11 = arith.divf %9, %10 : vector<576x1xf32>
    %cst_4 = arith.constant 9.99999974E-6 : f32
    %12 = vector.broadcast %cst_4 : f32 to vector<576x1xf32>
    %13 = arith.addf %11, %12 : vector<576x1xf32>
    %14 = math.rsqrt %13 : vector<576x1xf32>
    %15 = vector.broadcast %14 : vector<576x1xf32> to vector<576x384xf32>
    %16 = arith.mulf %6, %15 : vector<576x384xf32>
    %c0_5 = arith.constant 0 : index
    %c0_6 = arith.constant 0 : index
    %17 = vector.load %arg5[%c0_5, %c0_6] : memref<1x384xf32, #tpu.memory_space<vmem>>, vector<1x384xf32>
    %18 = vector.broadcast %17 : vector<1x384xf32> to vector<576x384xf32>
    %19 = arith.mulf %16, %18 : vector<576x384xf32>
    %c0_7 = arith.constant 0 : index
    %c0_8 = arith.constant 0 : index
    %20 = vector.load %arg6[%c0_7, %c0_8] : memref<1x384xf32, #tpu.memory_space<vmem>>, vector<1x384xf32>
    %21 = vector.broadcast %20 : vector<1x384xf32> to vector<576x384xf32>
    %22 = arith.addf %19, %21 : vector<576x384xf32>
    %23 = arith.truncf %22 : vector<576x384xf32> to vector<576x384xbf16>
    %c0_9 = arith.constant 0 : index
    %c0_10 = arith.constant 0 : index
    %24 = vector.load %arg2[%c0_9, %c0_10] : memref<384x96xbf16, #tpu.memory_space<vmem>>, vector<384x96xbf16>
    %cst_11 = arith.constant dense<0.000000e+00> : vector<576x96xf32>
    %25 = tpu.matmul %23, %24, %cst_11 {dimension_numbers = #tpu.dot_dimension_numbers<[1], [0], [0], [1], [0, 0, 1, 1], [], []>} : vector<576x384xbf16>, vector<384x96xbf16>, vector<576x96xf32> -> vector<576x96xf32>
    %c0_12 = arith.constant 0 : index
    %c0_13 = arith.constant 0 : index
    %26 = vector.load %arg3[%c0_12, %c0_13] : memref<1x96xf32, #tpu.memory_space<vmem>>, vector<1x96xf32>
    %27 = vector.broadcast %26 : vector<1x96xf32> to vector<576x96xf32>
    %28 = arith.mulf %25, %27 : vector<576x96xf32>
    %c0_14 = arith.constant 0 : index
    %c0_15 = arith.constant 0 : index
    %29 = vector.load %arg4[%c0_14, %c0_15] : memref<1x96xf32, #tpu.memory_space<vmem>>, vector<1x96xf32>
    %30 = vector.broadcast %29 : vector<1x96xf32> to vector<576x96xf32>
    %31 = arith.addf %28, %30 : vector<576x96xf32>
    %c0_16 = arith.constant 0 : index
    %c0_17 = arith.constant 0 : index
    %32 = vector.load %arg7[%c0_16, %c0_17] : memref<576x96xf32, #tpu.memory_space<vmem>>, vector<576x96xf32>
    tpu.vector_store %arg7[%c0_16, %c0_17], %31 {strides = array<i32>} : memref<576x96xf32, #tpu.memory_space<vmem>>, vector<576x96xf32>,
    return
  }
  func.func @transform_0(%arg0: i32) -> (i32, i32) {
    %c0_i32 = arith.constant 0 : i32
    %c0_i32_0 = arith.constant 0 : i32
    return %arg0, %c0_i32 : i32, i32
  }
  func.func @transform_1(%arg0: i32) -> (i32, i32) {
    %c0_i32 = arith.constant 0 : i32
    %c0_i32_0 = arith.constant 0 : i32
    %c0_i32_1 = arith.constant 0 : i32
    return %c0_i32, %c0_i32_0 : i32, i32
  }
  func.func @transform_2(%arg0: i32) -> (i32, i32) {
    %c0_i32 = arith.constant 0 : i32
    %c0_i32_0 = arith.constant 0 : i32
    %c0_i32_1 = arith.constant 0 : i32
    return %c0_i32, %c0_i32_0 : i32, i32
  }
  func.func @transform_3(%arg0: i32) -> (i32, i32) {
    %c0_i32 = arith.constant 0 : i32
    %c0_i32_0 = arith.constant 0 : i32
    %c0_i32_1 = arith.constant 0 : i32
    return %c0_i32, %c0_i32_0 : i32, i32
  }
  func.func @transform_4(%arg0: i32) -> (i32, i32) {
    %c0_i32 = arith.constant 0 : i32
    %c0_i32_0 = arith.constant 0 : i32
    %c0_i32_1 = arith.constant 0 : i32
    return %c0_i32, %c0_i32_0 : i32, i32
  }
  func.func @transform_5(%arg0: i32) -> (i32, i32) {
    %c0_i32 = arith.constant 0 : i32
    %c0_i32_0 = arith.constant 0 : i32
    %c0_i32_1 = arith.constant 0 : i32
    return %c0_i32, %c0_i32_0 : i32, i32
  }
  func.func @transform_6(%arg0: i32) -> (i32, i32) {
    %c0_i32 = arith.constant 0 : i32
    %c0_i32_0 = arith.constant 0 : i32
    return %arg0, %c0_i32 : i32, i32
  }
}

</mosaic_0001>

<bundles_post_ra>
// kernel: _fused_matmul.1
= control target key start
LH: loop header
LB: loop body
LE: loop exit
PB: predicated region body
PF: predicated region fallthrough
CT: control target
= control target key end

     0   :  { %11 = vsyncpa [#allocation3], 0  ;;  %s3958_s21 = smov [#allocation2]   ;;  %s6850_s0 = inlined_call_operand.hbm [shape: f32[576,384], index: 0, kind: input, shape index: {}]   ;;  %s6851_s1 = inlined_call_operand.vmem [shape: bf16[384,96], index: 1, kind: input, shape index: {}]   ;;  %s6852_s2 = inlined_call_operand.vmem [shape: f32[1,96], index: 2, kind: input, shape index: {}]   ;;  %s6853_s3 = inlined_call_operand.vmem [shape: f32[1,96], index: 3, kind: input, shape index: {}]   ;;  %s6854_s4 = inlined_call_operand.vmem [shape: f32[1,384], index: 4, kind: input, shape index: {}]   ;;  %s6855_s5 = inlined_call_operand.vmem [shape: f32[1,384], index: 5, kind: input, shape index: {}]   ;;  %s6856_s6 = inlined_call_operand.vmem [shape: f32[576,96], index: 6, kind: output, shape index: {}]  }
   0x1   :  { %s17_s22 = sshll.u32 %s3958_s21, 4  ;;  %s3934_s25 = scalar_lea.hbm %s6850_s0, 27648  ;;  %s18_s22 = int_to_ptr.vmem [resolvable:$true] %s17_s22 }
   0x2   :  { %p3935_p0 = scmp.ne.s32.totalorder %s6850_s0, %s3934_s25  ;;  %p3938_p1 = scmp.lt.u32.totalorder %s3934_s25, %s6850_s0 }
   0x4   :  { %p3940_p2 = pnand %p3938_p1, %p3935_p0 }
   0x6   :  { %3943 = shalt.err (!%p3940_p2)
}
   0x7   :  { %s3944_s30 = scalar_lea.vmem %s18_s22, 27648  ;;  %p3949_p4 = scmp.lt.s32.totalorder %s18_s22, %s18_s22 }
   0x8   :  { %p3945_p3 = scmp.ne.s32.totalorder %s18_s22, %s3944_s30  ;;  %p3950_p5 = scmp.lt.s32.totalorder %s3944_s30, %s3944_s30 }
   0xa   :  { %p3951_p6 = por %p3950_p5, %p3949_p4 }
   0xc   :  { %p3952_p7 = pnand %p3951_p6, %p3945_p3 }
   0xe   :  { %3955 = shalt.err (!%p3952_p7)
}
   0xf   :  { %s3959_s7 = smov 384   ;;  %s3960_s8 = smov 24  }
  0x10   :  { %23 = dma.hbm_to_vmem [thread:$0]  %s6850_s0, 27648, %s18_s22, [#allocation3], %s3959_s7, %s3959_s7, %s3960_s8  }
  0x11   :  { %3956 = dma.done.wait [#allocation3], 27648  }
  0x12   :  { %3957 = vsyncadd [#allocation3], 4294939648  ;;  %v4009_v0 = vld [vmem:[#allocation2 + $0x510] sm:$0xff]  ;;  %v4011_v1 = vld [vmem:[#allocation2 + $0x518] sm:$0xff]  ;;  %vm3333_vm0 = vcmask 785408  }
  0x13   :  { %v4013_v2 = vld [vmem:[#allocation2 + $0x520] sm:$0xff]  ;;  %v470_v3 = vadd.f32 %v4011_v1, %v4009_v0  ;;  %v4019_v5 = vld [vmem:[#allocation2 + $0x8] sm:$0xff]  ;;  %v4021_v6 = vld [vmem:[#allocation2 + $0x10] sm:$0xff] }
  0x14   :  { %v4017_v4 = vld [vmem:[#allocation2] sm:$0xff]  ;;  %v4025_v8 = vld [vmem:[#allocation2 + $0x528] sm:$0xff]  ;;  %v4027_v9 = vld [vmem:[#allocation2 + $0x530] sm:$0xff] }
  0x15   :  { %v254_v7 = vadd.f32 %v4019_v5, %v4017_v4  ;;  %v4029_v10 = vld [vmem:[#allocation2 + $0x538] sm:$0xff]  ;;  %v471_v11 = vadd.f32 %v470_v3, %v4013_v2  ;;  %v474_v12 = vadd.f32 %v4027_v9, %v4025_v8  ;;  %v4036_v14 = vld [vmem:[#allocation2 + $0x20] sm:$0xff]  ;;  %v4038_v15 = vld [vmem:[#allocation2 + $0x28] sm:$0xff] }
  0x16   :  { %v4034_v13 = vld [vmem:[#allocation2 + $0x18] sm:$0xff]  ;;  %v4043_v18 = vld [vmem:[#allocation2 + $0x540] sm:$0xff]  ;;  %v4045_v19 = vld [vmem:[#allocation2 + $0x548] sm:$0xff] }
  0x17   :  { %v255_v16 = vadd.f32 %v254_v7, %v4021_v6  ;;  %v258_v17 = vadd.f32 %v4036_v14, %v4034_v13  ;;  %472 = vadd.xlane.f32.xlu0 %v471_v11  ;;  %v475_v20 = vadd.f32 %v474_v12, %v4029_v10  ;;  %v478_v21 = vadd.f32 %v4045_v19, %v4043_v18  ;;  %v4050_v22 = vld [vmem:[#allocation2 + $0x558] sm:$0xff]  ;;  %v4052_v23 = vld [vmem:[#allocation2 + $0x560] sm:$0xff]  ;;  %v4055_v25 = vld [vmem:[#allocation2 + $0x550] sm:$0xff] }
  0x18   :  { %v482_v26 = vadd.f32 %v4052_v23, %v4050_v22  ;;  %v4059_v27 = vld [vmem:[#allocation2 + $0x30] sm:$0xff]  ;;  %v4061_v28 = vld [vmem:[#allocation2 + $0x38] sm:$0xff]  ;;  %v4063_v29 = vld [vmem:[#allocation2 + $0x568] sm:$0xff] }
  0x19   :  { %256 = vadd.xlane.f32.xlu1 %v255_v16  ;;  %v259_v24 = vadd.f32 %v258_v17, %v4038_v15  ;;  %v4065_v30 = vld [vmem:[#allocation2 + $0x48] sm:$0xff]  ;;  %v4067_v31 = vld [vmem:[#allocation2 + $0x50] sm:$0xff]  ;;  %v479_v32 = vadd.f32 %v478_v21, %v4055_v25  ;;  %v262_v33 = vadd.f32 %v4061_v28, %v4059_v27  ;;  %v4073_v35 = vld [vmem:[#allocation2 + $0x40] sm:$0xff] }
  0x1a   :  { %v483_v34 = vadd.f32 %v482_v26, %v4063_v29  ;;  %v266_v36 = vadd.f32 %v4067_v31, %v4065_v30  ;;  %v4077_v37 = vld [vmem:[#allocation2 + $0x570] sm:$0xff]  ;;  %v4079_v38 = vld [vmem:[#allocation2 + $0x578] sm:$0xff]  ;;  %v4083_v40 = vld [vmem:[#allocation2 + $0x588] sm:$0xff] }
  0x1b   :  { %476 = vadd.xlane.f32.xlu0 %v475_v20  ;;  %v4081_v39 = vld [vmem:[#allocation2 + $0x58] sm:$0xff]  ;;  %v4085_v41 = vld [vmem:[#allocation2 + $0x590] sm:$0xff]  ;;  %v263_v42 = vadd.f32 %v262_v33, %v4073_v35  ;;  %v486_v43 = vadd.f32 %v4079_v38, %v4077_v37  ;;  %v4091_v45 = vld [vmem:[#allocation2 + $0x580] sm:$0xff] }
  0x1c   :  { %v267_v44 = vadd.f32 %v266_v36, %v4081_v39  ;;  %v490_v46 = vadd.f32 %v4085_v41, %v4083_v40  ;;  %v4095_v47 = vld [vmem:[#allocation2 + $0x60] sm:$0xff]  ;;  %v4097_v48 = vld [vmem:[#allocation2 + $0x68] sm:$0xff]  ;;  %v4099_v49 = vld [vmem:[#allocation2 + $0x598] sm:$0xff] }
  0x1d   :  { %260 = vadd.xlane.f32.xlu1 %v259_v24  ;;  %7075 = vst [vmem:[#allocation5_spill] sm:$0xff] %v4099_v49  ;;  %v4101_v50 = vld [vmem:[#allocation2 + $0x78] sm:$0xff]  ;;  %v4103_v51 = vld [vmem:[#allocation2 + $0x80] sm:$0xff]  ;;  %v487_v52 = vadd.f32 %v486_v43, %v4091_v45  ;;  %v270_v53 = vadd.f32 %v4097_v48, %v4095_v47  ;;  %v4109_v55 = vld [vmem:[#allocation2 + $0x70] sm:$0xff] }
  0x1e   :  { %v491_v54 = vadd.f32 %v490_v46, %v4099_v49  ;;  %v274_v56 = vadd.f32 %v4103_v51, %v4101_v50  ;;  %v4113_v57 = vld [vmem:[#allocation2 + $0x5a0] sm:$0xff]  ;;  %v4115_v58 = vld [vmem:[#allocation2 + $0x5a8] sm:$0xff]  ;;  %v4119_v60 = vld [vmem:[#allocation2 + $0x5b8] sm:$0xff] }
  0x1f   :  { %480 = vadd.xlane.f32.xlu0 %v479_v32  ;;  %7076 = vst [vmem:[#allocation6_spill] sm:$0xff] %v4115_v58  ;;  %v4117_v59 = vld [vmem:[#allocation2 + $0x88] sm:$0xff]  ;;  %7078 = vst [vmem:[#allocation8_spill] sm:$0xff] %v4119_v60  ;;  %v4121_v61 = vld [vmem:[#allocation2 + $0x5c0] sm:$0xff]  ;;  %v271_v62 = vadd.f32 %v270_v53, %v4109_v55  ;;  %v494_v63 = vadd.f32 %v4115_v58, %v4113_v57 }
  0x20   :  { %7077 = vst [vmem:[#allocation7_spill] sm:$0xff] %v4117_v59  ;;  %7079 = vst [vmem:[#allocation9_spill] sm:$0xff] %v4121_v61  ;;  %v275_v3 = vadd.f32 %v274_v56, %v4117_v59  ;;  %v4127_v7 = vld [vmem:[#allocation2 + $0x5b0] sm:$0xff]  ;;  %v498_v11 = vadd.f32 %v4121_v61, %v4119_v60  ;;  %v4133_v16 = vld [vmem:[#allocation2 + $0x98] sm:$0xff] }
  0x21   :  { %484 = vadd.xlane.f32.xlu1 %v483_v34  ;;  %7080 = vst [vmem:[#allocation10_spill] sm:$0xff] %v4127_v7  ;;  %v4131_v12 = vld [vmem:[#allocation2 + $0x90] sm:$0xff]  ;;  %7082 = vst [vmem:[#allocation12_spill] sm:$0xff] %v4133_v16  ;;  %v223_v17 = vld [vmem:[#allocation2 + $0x5c8] sm:$0xff]  ;;  %v495_v24 = vadd.f32 %v494_v63, %v4127_v7 }
  0x22   :  { %7081 = vst [vmem:[#allocation11_spill] sm:$0xff] %v4131_v12  ;;  %v4135_v20 = vld [vmem:[#allocation2 + $0xa8] sm:$0xff]  ;;  %v4137_v21 = vld [vmem:[#allocation2 + $0xb0] sm:$0xff]  ;;  %v278_v26 = vadd.f32 %v4133_v16, %v4131_v12  ;;  %v499_v32 = vadd.f32 %v498_v11, %v223_v17  ;;  %v4142_v33 = vld [vmem:[#allocation2 + $0xa0] sm:$0xff] }
  0x23   :  { %264 = vadd.xlane.f32.xlu0 %v263_v42  ;;  %7083 = vst [vmem:[#allocation13_spill] sm:$0xff] %v4135_v20  ;;  %7084 = vst [vmem:[#allocation14_spill] sm:$0xff] %v4137_v21  ;;  %v282_v34 = vadd.f32 %v4137_v21, %v4135_v20  ;;  %v4146_v36 = vld [vmem:[#allocation2 + $0x5d0] sm:$0xff]  ;;  %v4148_v42 = vld [vmem:[#allocation2 + $0x5d8] sm:$0xff] }
  0x24   :  { %7085 = vst [vmem:[#allocation15_spill] sm:$0xff] %v4142_v33  ;;  %7086 = vst [vmem:[#allocation16_spill] sm:$0xff] %v4146_v36  ;;  %v61_v43 = vld [vmem:[#allocation2 + $0xb8] sm:$0xff]  ;;  %v4152_v46 = vld [vmem:[#allocation2 + $0x5f0] sm:$0xff]  ;;  %v502_v53 = vadd.f32 %v4148_v42, %v4146_v36 }
  0x25   :  { %268 = vadd.xlane.f32.xlu1 %v267_v44  ;;  %7087 = vst [vmem:[#allocation17_spill] sm:$0xff] %v4148_v42  ;;  %v4150_v44 = vld [vmem:[#allocation2 + $0x5e8] sm:$0xff]  ;;  %7089 = vst [vmem:[#allocation19_spill] sm:$0xff] %v4152_v46  ;;  %v4157_v56 = vld [vmem:[#allocation2 + $0x5e0] sm:$0xff] }
  0x26   :  { %7088 = vst [vmem:[#allocation18_spill] sm:$0xff] %v4150_v44  ;;  %7090 = vst [vmem:[#allocation20_spill] sm:$0xff] %v4157_v56  ;;  %v4161_v63 = vld [vmem:[#allocation2 + $0xc0] sm:$0xff]  ;;  %v229_v11 = vld [vmem:[#allocation2 + $0x5f8] sm:$0xff] }
  0x27   :  { %488 = vadd.xlane.f32.xlu0 %v487_v52  ;;  %v279_v52 = vadd.f32 %v278_v26, %v4142_v33  ;;  %7091 = vst [vmem:[#allocation21_spill] sm:$0xff] %v4161_v63  ;;  %v4165_v17 = vld [vmem:[#allocation2 + $0xd8] sm:$0xff]  ;;  %v503_v26 = vadd.f32 %v502_v53, %v4157_v56  ;;  %v231_v42 = vld [vmem:[#allocation2 + $0x608] sm:$0xff]  ;;  %v234_v59 = vld [vmem:[#allocation2 + $0x620] sm:$0xff] }
  0x28   :  { %7093 = vst [vmem:[#allocation23_spill] sm:$0xff] %v4165_v17  ;;  %v67_v36 = vld [vmem:[#allocation2 + $0xe8] sm:$0xff]  ;;  %v233_v33 = vld [vmem:[#allocation2 + $0x618] sm:$0xff]  ;;  %v232_v53 = vld [vmem:[#allocation2 + $0x610] sm:$0xff] }
  0x29   :  { %492 = vadd.xlane.f32.xlu1 %v491_v54  ;;  %v283_v54 = vadd.f32 %v282_v34, %v61_v43  ;;  %v64_v43 = vld [vmem:[#allocation2 + $0xd0] sm:$0xff]  ;;  %v514_v56 = vadd.f32 %v234_v59, %v233_v33  ;;  %v70_v12 = vld [vmem:[#allocation2 + $0x100] sm:$0xff]  ;;  %v83_v60 = vld [vmem:[#allocation2 + $0x168] sm:$0xff] }
  0x2a   :  { %v68_v16 = vld [vmem:[#allocation2 + $0xf0] sm:$0xff] }
  0x2b   :  { %272 = vadd.xlane.f32.xlu0 %v271_v62  ;;  %v506_v62 = vadd.f32 %v4152_v46, %v4150_v44  ;;  %v230_v44 = vld [vmem:[#allocation2 + $0x600] sm:$0xff]  ;;  %v236_v61 = vld [vmem:[#allocation2 + $0x630] sm:$0xff] }
  0x2c   :  { %v510_v20 = vadd.f32 %v231_v42, %v230_v44  ;;  %v239_v42 = vld [vmem:[#allocation2 + $0x648] sm:$0xff]  ;;  %v240_v44 = vld [vmem:[#allocation2 + $0x650] sm:$0xff] }
  0x2d   :  { %276 = vadd.xlane.f32.xlu1 %v275_v3  ;;  %v4163_v3 = vld [vmem:[#allocation2 + $0xc8] sm:$0xff]  ;;  %v507_v34 = vadd.f32 %v506_v62, %v229_v11  ;;  %v72_v11 = vld [vmem:[#allocation2 + $0x110] sm:$0xff] }
  0x2e   :  { %7092 = vst [vmem:[#allocation22_spill] sm:$0xff] %v4163_v3  ;;  %v71_v62 = vld [vmem:[#allocation2 + $0x108] sm:$0xff]  ;;  %v252_v49 = vld [vmem:[#allocation2 + $0x6b0] sm:$0xff] }
  0x2f   :  { %496 = vadd.xlane.f32.xlu0 %v495_v24  ;;  %v4167_v24 = vld [vmem:[#allocation2 + $0xe0] sm:$0xff]  ;;  %v298_v7 = vadd.f32 %v72_v11, %v71_v62 }
  0x30   :  { %7094 = vst [vmem:[#allocation24_spill] sm:$0xff] %v4167_v24  ;;  %v290_v46 = vadd.f32 %v4167_v24, %v4165_v17  ;;  %v242_v11 = vld [vmem:[#allocation2 + $0x660] sm:$0xff] }
  0x31   :  { %500 = vadd.xlane.f32.xlu1 %v499_v32  ;;  %v286_v32 = vadd.f32 %v4163_v3, %v4161_v63  ;;  %v69_v3 = vld [vmem:[#allocation2 + $0xf8] sm:$0xff]  ;;  %v511_v63 = vadd.f32 %v510_v20, %v232_v53 }
  0x32   :  { %v294_v24 = vadd.f32 %v69_v3, %v68_v16  ;;  %v241_v20 = vld [vmem:[#allocation2 + $0x658] sm:$0xff]  ;;  %v78_v3 = vld [vmem:[#allocation2 + $0x140] sm:$0xff] }
  0x33   :  { %280 = vadd.xlane.f32.xlu0 %v279_v52  ;;  %v287_v21 = vadd.f32 %v286_v32, %v64_v43  ;;  %v291_v52 = vadd.f32 %v290_v46, %v67_v36  ;;  %v73_v32 = vld [vmem:[#allocation2 + $0x118] sm:$0xff]  ;;  %v238_v46 = vld [vmem:[#allocation2 + $0x640] sm:$0xff] }
  0x34   :  { %v295_v36 = vadd.f32 %v294_v24, %v70_v12  ;;  %v299_v33 = vadd.f32 %v298_v7, %v73_v32  ;;  %v74_v43 = vld [vmem:[#allocation2 + $0x120] sm:$0xff]  ;;  %v77_v16 = vld [vmem:[#allocation2 + $0x138] sm:$0xff]  ;;  %v79_v12 = vld [vmem:[#allocation2 + $0x148] sm:$0xff] }
  0x35   :  { %284 = vadd.xlane.f32.xlu1 %v283_v54  ;;  %v235_v54 = vld [vmem:[#allocation2 + $0x628] sm:$0xff]  ;;  %v306_v62 = vadd.f32 %v78_v3, %v77_v16  ;;  %v244_v7 = vld [vmem:[#allocation2 + $0x670] sm:$0xff]  ;;  %v85_v16 = vld [vmem:[#allocation2 + $0x178] sm:$0xff] }
  0x36   :  { %v515_v17 = vadd.f32 %v514_v56, %v235_v54  ;;  %v76_v54 = vld [vmem:[#allocation2 + $0x130] sm:$0xff]  ;;  %v251_v3 = vld [vmem:[#allocation2 + $0x6a8] sm:$0xff] }
  0x37   :  { %504 = vadd.xlane.f32.xlu0 %v503_v26  ;;  %v237_v26 = vld [vmem:[#allocation2 + $0x638] sm:$0xff]  ;;  %v80_v24 = vld [vmem:[#allocation2 + $0x150] sm:$0xff] }
  0x38   :  { %v518_v59 = vadd.f32 %v237_v26, %v236_v61  ;;  %v245_v61 = vld [vmem:[#allocation2 + $0x678] sm:$0xff] }
  0x39   :  { %508 = vadd.xlane.f32.xlu1 %v507_v34  ;;  %v522_v34 = vadd.f32 %v240_v44, %v239_v42  ;;  %v247_v42 = vld [vmem:[#allocation2 + $0x688] sm:$0xff]  ;;  %v81_v44 = vld [vmem:[#allocation2 + $0x158] sm:$0xff] }
  0x3a   :  { %v519_v56 = vadd.f32 %v518_v59, %v238_v46  ;;  %v307_v59 = vadd.f32 %v306_v62, %v79_v12  ;;  %v82_v46 = vld [vmem:[#allocation2 + $0x160] sm:$0xff]  ;;  %v253_v62 = vld [vmem:[#allocation2 + $0x6b8] sm:$0xff] }
  0x3b   :  { %288 = vadd.xlane.f32.xlu0 %v287_v21  ;;  %v75_v21 = vld [vmem:[#allocation2 + $0x128] sm:$0xff]  ;;  %v523_v53 = vadd.f32 %v522_v34, %v241_v20  ;;  %v248_v34 = vld [vmem:[#allocation2 + $0x690] sm:$0xff]  ;;  %v310_v20 = vadd.f32 %v81_v44, %v80_v24  ;;  %v89_v12 = vld [vmem:[#allocation2 + $0x198] sm:$0xff] }
  0x3c   :  { %v92_v24 = vld [vmem:[#allocation2 + $0x1b0] sm:$0xff] }
  0x3d   :  { %292 = vadd.xlane.f32.xlu1 %v291_v52  ;;  %v302_v52 = vadd.f32 %v75_v21, %v74_v43  ;;  %v249_v43 = vld [vmem:[#allocation2 + $0x698] sm:$0xff]  ;;  %v311_v58 = vadd.f32 %v310_v20, %v82_v46  ;;  %v94_v20 = vld [vmem:[#allocation2 + $0x1c0] sm:$0xff] }
  0x3f   :  { %512 = vadd.xlane.f32.xlu0 %v511_v63  ;;  %v243_v63 = vld [vmem:[#allocation2 + $0x668] sm:$0xff]  ;;  %v303_v26 = vadd.f32 %v302_v52, %v76_v54  ;;  %v250_v54 = vld [vmem:[#allocation2 + $0x6a0] sm:$0xff] }
  0x40   :  { %v526_v32 = vadd.f32 %v243_v63, %v242_v11  ;;  %v86_v11 = vld [vmem:[#allocation2 + $0x180] sm:$0xff]  ;;  %v87_v63 = vld [vmem:[#allocation2 + $0x188] sm:$0xff] }
  0x41   :  { %516 = vadd.xlane.f32.xlu1 %v515_v17  ;;  %v246_v17 = vld [vmem:[#allocation2 + $0x680] sm:$0xff] }
  0x42   :  { %v527_v21 = vadd.f32 %v526_v32, %v244_v7  ;;  %v88_v7 = vld [vmem:[#allocation2 + $0x190] sm:$0xff]  ;;  %v93_v32 = vld [vmem:[#allocation2 + $0x1b8] sm:$0xff] }
  0x43   :  { %296 = vadd.xlane.f32.xlu0 %v295_v36  ;;  %v84_v36 = vld [vmem:[#allocation2 + $0x170] sm:$0xff] }
  0x44   :  { %v314_v52 = vadd.f32 %v84_v36, %v83_v60  ;;  %v95_v60 = vld [vmem:[#allocation2 + $0x1c8] sm:$0xff]  ;;  %v96_v36 = vld [vmem:[#allocation2 + $0x1d0] sm:$0xff] }
  0x45   :  { %300 = vadd.xlane.f32.xlu1 %v299_v33  ;;  %v530_v33 = vadd.f32 %v246_v17, %v245_v61  ;;  %v90_v61 = vld [vmem:[#allocation2 + $0x1a0] sm:$0xff] }
  0x46   :  { %v315_v17 = vadd.f32 %v314_v52, %v85_v16  ;;  %v330_v16 = vadd.f32 %v96_v36, %v95_v60  ;;  %v101_v52 = vld [vmem:[#allocation2 + $0x1f8] sm:$0xff]  ;;  %v110_v60 = vld [vmem:[#allocation2 + $0x240] sm:$0xff]  ;;  %v111_v36 = vld [vmem:[#allocation2 + $0x248] sm:$0xff] }
  0x47   :  { %520 = vadd.xlane.f32.xlu0 %v519_v56  ;;  %v531_v56 = vadd.f32 %v530_v33, %v247_v42  ;;  %v91_v42 = vld [vmem:[#allocation2 + $0x1a8] sm:$0xff] }
  0x49   :  { %524 = vadd.xlane.f32.xlu1 %v523_v53  ;;  %v534_v53 = vadd.f32 %v249_v43, %v248_v34  ;;  %v326_v34 = vadd.f32 %v93_v32, %v92_v24 }
  0x4b   :  { %304 = vadd.xlane.f32.xlu0 %v303_v26  ;;  %v538_v26 = vadd.f32 %v252_v49, %v251_v3  ;;  %v535_v44 = vadd.f32 %v534_v53, %v250_v54  ;;  %v98_v49 = vld [vmem:[#allocation2 + $0x1e0] sm:$0xff]  ;;  %v99_v3 = vld [vmem:[#allocation2 + $0x1e8] sm:$0xff]  ;;  %v327_v54 = vadd.f32 %v326_v34, %v94_v20  ;;  %v100_v53 = vld [vmem:[#allocation2 + $0x1f0] sm:$0xff] }
  0x4d   :  { %308 = vadd.xlane.f32.xlu1 %v307_v59  ;;  %v318_v59 = vadd.f32 %v87_v63, %v86_v11  ;;  %v539_v33 = vadd.f32 %v538_v26, %v253_v62  ;;  %v334_v11 = vadd.f32 %v99_v3, %v98_v49  ;;  %v107_v26 = vld [vmem:[#allocation2 + $0x228] sm:$0xff]  ;;  %v116_v49 = vld [vmem:[#allocation2 + $0x270] sm:$0xff]  ;;  %v117_v3 = vld [vmem:[#allocation2 + $0x278] sm:$0xff] }
  0x4f   :  { %528 = vadd.xlane.f32.xlu0 %v527_v21  ;;  %v322_v21 = vadd.f32 %v90_v61, %v89_v12  ;;  %v319_v46 = vadd.f32 %v318_v59, %v88_v7  ;;  %v104_v12 = vld [vmem:[#allocation2 + $0x210] sm:$0xff]  ;;  %v105_v61 = vld [vmem:[#allocation2 + $0x218] sm:$0xff]  ;;  %v335_v24 = vadd.f32 %v334_v11, %v100_v53  ;;  %v106_v59 = vld [vmem:[#allocation2 + $0x220] sm:$0xff] }
  0x50   :  { %v108_v7 = vld [vmem:[#allocation2 + $0x230] sm:$0xff]  ;;  %v342_v32 = vadd.f32 %v105_v61, %v104_v12  ;;  %v118_v53 = vld [vmem:[#allocation2 + $0x280] sm:$0xff]  ;;  %v123_v61 = vld [vmem:[#allocation2 + $0x2a8] sm:$0xff] }
  0x51   :  { %532 = vadd.xlane.f32.xlu1 %v531_v56  ;;  %v323_v43 = vadd.f32 %v322_v21, %v91_v42  ;;  %v97_v56 = vld [vmem:[#allocation2 + $0x1d8] sm:$0xff]  ;;  %v346_v42 = vadd.f32 %v108_v7, %v107_v26  ;;  %v122_v12 = vld [vmem:[#allocation2 + $0x2a0] sm:$0xff] }
  0x52   :  { %v331_v63 = vadd.f32 %v330_v16, %v97_v56  ;;  %v113_v21 = vld [vmem:[#allocation2 + $0x258] sm:$0xff]  ;;  %v343_v34 = vadd.f32 %v342_v32, %v106_v59  ;;  %v112_v16 = vld [vmem:[#allocation2 + $0x250] sm:$0xff] }
  0x53   :  { %312 = vadd.xlane.f32.xlu0 %v311_v58  ;;  %v102_v58 = vld [vmem:[#allocation2 + $0x200] sm:$0xff]  ;;  %v121_v26 = vld [vmem:[#allocation2 + $0x298] sm:$0xff]  ;;  %v124_v59 = vld [vmem:[#allocation2 + $0x2b0] sm:$0xff] }
  0x54   :  { %v338_v62 = vadd.f32 %v102_v58, %v101_v52  ;;  %v115_v52 = vld [vmem:[#allocation2 + $0x268] sm:$0xff]  ;;  %v125_v7 = vld [vmem:[#allocation2 + $0x2b8] sm:$0xff] }
  0x55   :  { %316 = vadd.xlane.f32.xlu1 %v315_v17  ;;  %v103_v17 = vld [vmem:[#allocation2 + $0x208] sm:$0xff] }
  0x56   :  { %v119_v58 = vld [vmem:[#allocation2 + $0x288] sm:$0xff] }
  0x57   :  { %536 = vadd.xlane.f32.xlu0 %v535_v44  ;;  %v339_v44 = vadd.f32 %v338_v62, %v103_v17 }
  0x59   :  { %540 = vadd.xlane.f32.xlu1 %v539_v33  ;;  %v109_v33 = vld [vmem:[#allocation2 + $0x238] sm:$0xff] }
  0x5a   :  { %v347_v20 = vadd.f32 %v346_v42, %v109_v33 }
  0x5b   :  { %320 = vadd.xlane.f32.xlu0 %v319_v46  ;;  %v114_v46 = vld [vmem:[#allocation2 + $0x260] sm:$0xff] }
  0x5c   :  { %v354_v56 = vadd.f32 %v114_v46, %v113_v21  ;;  %v127_v21 = vld [vmem:[#allocation2 + $0x2c8] sm:$0xff] }
  0x5d   :  { %324 = vadd.xlane.f32.xlu1 %v323_v43  ;;  %v350_v43 = vadd.f32 %v111_v36, %v110_v60  ;;  %v128_v60 = vld [vmem:[#allocation2 + $0x2d0] sm:$0xff]  ;;  %v129_v36 = vld [vmem:[#allocation2 + $0x2d8] sm:$0xff]  ;;  %v131_v46 = vld [vmem:[#allocation2 + $0x2e8] sm:$0xff] }
  0x5e   :  { %v355_v62 = vadd.f32 %v354_v56, %v115_v52  ;;  %v135_v56 = vld [vmem:[#allocation2 + $0x308] sm:$0xff] }
  0x5f   :  { %328 = vadd.xlane.f32.xlu0 %v327_v54  ;;  %v120_v54 = vld [vmem:[#allocation2 + $0x290] sm:$0xff]  ;;  %v351_v11 = vadd.f32 %v350_v43, %v112_v16  ;;  %v130_v16 = vld [vmem:[#allocation2 + $0x2e0] sm:$0xff] }
  0x60   :  { %v362_v17 = vadd.f32 %v120_v54, %v119_v58  ;;  %v133_v58 = vld [vmem:[#allocation2 + $0x2f8] sm:$0xff] }
  0x61   :  { %332 = vadd.xlane.f32.xlu1 %v331_v63  ;;  %v358_v63 = vadd.f32 %v117_v3, %v116_v49  ;;  %v134_v3 = vld [vmem:[#allocation2 + $0x300] sm:$0xff]  ;;  %v137_v54 = vld [vmem:[#allocation2 + $0x318] sm:$0xff] }
  0x62   :  { %v363_v42 = vadd.f32 %v362_v17, %v121_v26  ;;  %v141_v17 = vld [vmem:[#allocation2 + $0x338] sm:$0xff] }
  0x63   :  { %336 = vadd.xlane.f32.xlu0 %v335_v24  ;;  %v126_v24 = vld [vmem:[#allocation2 + $0x2c0] sm:$0xff]  ;;  %v359_v32 = vadd.f32 %v358_v63, %v118_v53  ;;  %v382_v53 = vadd.f32 %v135_v56, %v134_v3 }
  0x64   :  { %v370_v33 = vadd.f32 %v126_v24, %v125_v7  ;;  %v139_v7 = vld [vmem:[#allocation2 + $0x328] sm:$0xff] }
  0x65   :  { %340 = vadd.xlane.f32.xlu1 %v339_v44  ;;  %v366_v44 = vadd.f32 %v123_v61, %v122_v12  ;;  %v140_v61 = vld [vmem:[#allocation2 + $0x330] sm:$0xff]  ;;  %v143_v24 = vld [vmem:[#allocation2 + $0x348] sm:$0xff] }
  0x66   :  { %v371_v49 = vadd.f32 %v370_v33, %v127_v21  ;;  %v145_v33 = vld [vmem:[#allocation2 + $0x358] sm:$0xff] }
  0x67   :  { %344 = vadd.xlane.f32.xlu0 %v343_v34  ;;  %v132_v34 = vld [vmem:[#allocation2 + $0x2f0] sm:$0xff]  ;;  %v367_v43 = vadd.f32 %v366_v44, %v124_v59  ;;  %v390_v59 = vadd.f32 %v141_v17, %v140_v61 }
  0x68   :  { %v378_v52 = vadd.f32 %v132_v34, %v131_v46  ;;  %v3605_v34 = vld [vmem:[%s6851_s1] sm:$0xff]  }
  0x69   :  { %348 = vadd.xlane.f32.xlu1 %v347_v20  ;;  %v374_v20 = vadd.f32 %v129_v36, %v128_v60 }
  0x6a   :  { %v379_v12 = vadd.f32 %v378_v52, %v133_v58 }
  0x6b   :  { %352 = vadd.xlane.f32.xlu0 %v351_v11  ;;  %v138_v11 = vld [vmem:[#allocation2 + $0x320] sm:$0xff]  ;;  %v375_v63 = vadd.f32 %v374_v20, %v130_v16  ;;  %v3606_v16 = vld [vmem:[%s6851_s1 + $0x8] sm:$0xff]  }
  0x6c   :  { %v386_v26 = vadd.f32 %v138_v11, %v137_v54 }
  0x6d   :  { %356 = vadd.xlane.f32.xlu1 %v355_v62  ;;  %v136_v62 = vld [vmem:[#allocation2 + $0x310] sm:$0xff] }
  0x6e   :  { %v383_v44 = vadd.f32 %v382_v53, %v136_v62  ;;  %v387_v60 = vadd.f32 %v386_v26, %v139_v7 }
  0x6f   :  { %360 = vadd.xlane.f32.xlu0 %v359_v32  ;;  %v144_v32 = vld [vmem:[#allocation2 + $0x350] sm:$0xff] }
  0x70   :  { %v394_v36 = vadd.f32 %v144_v32, %v143_v24 }
  0x71   :  { %364 = vadd.xlane.f32.xlu1 %v363_v42  ;;  %v142_v42 = vld [vmem:[#allocation2 + $0x340] sm:$0xff] }
  0x72   :  { %v391_v21 = vadd.f32 %v390_v59, %v142_v42  ;;  %v395_v46 = vadd.f32 %v394_v36, %v145_v33 }
  0x73   :  { %368 = vadd.xlane.f32.xlu0 %v367_v43  ;;  %v6877_v43 = vmov 0  }
  0x74   :  { %3569 = vmatprep.subr.bf16.mxu1 %v6877_v43  ;;  %2533 = vmatprep.subr.bf16.mxu0 %v6877_v43 }
  0x75   :  { %372 = vadd.xlane.f32.xlu1 %v371_v49  ;;  %3585 = vmatpush1.bf16.msra.mxu1 %v3605_v34 }
  0x76   :  { %2534 = vmatpush1.bf16.msra.mxu0 %v3605_v34  ;;  %3570 = vmatprep.subr.bf16.mxu1 %v6877_v43 }
  0x77   :  { %376 = vadd.xlane.f32.xlu0 %v375_v63  ;;  %2535 = vmatprep.subr.bf16.mxu0 %v6877_v43 }
  0x79   :  { %380 = vadd.xlane.f32.xlu1 %v379_v12  ;;  %3586 = vmatpush1.bf16.msra.mxu1 %v3606_v16 }
  0x7a   :  { %2536 = vmatpush1.bf16.msra.mxu0 %v3606_v16  ;;  %3571 = vmatprep.subr.bf16.mxu1 %v6877_v43 }
  0x7b   :  { %384 = vadd.xlane.f32.xlu0 %v383_v44  ;;  %2537 = vmatprep.subr.bf16.mxu0 %v6877_v43 }
  0x7d   :  { %388 = vadd.xlane.f32.xlu1 %v387_v60 }
  0x7f   :  { %392 = vadd.xlane.f32.xlu0 %v391_v21 }
  0x81   :  { %396 = vadd.xlane.f32.xlu1 %v395_v46 }
  0xa4   :  { %v473_v20 = vpop.xlane.xlu0 %472 }
  0xa5   :  { %v597_v49 = vmul.f32 0.0026041667, %v473_v20 }
  0xa6   :  { %v257_v3 = vpop.xlane.xlu1 %256 }
  0xa7   :  { %v543_v56 = vmul.f32 0.0026041667, %v257_v3  ;;  %v4185_v52 = vsub.f32 %v4009_v0, %v597_v49  ;;  %v4188_v58 = vsub.f32 %v4011_v1, %v597_v49  ;;  %v4191_v54 = vsub.f32 %v4013_v2, %v597_v49  ;;  %v3607_v1 = vld [vmem:[%s6851_s1 + $0x10] sm:$0xff]  }
  0xa8   :  { %v477_v53 = vpop.xlane.xlu0 %476  ;;  %3587 = vmatpush1.bf16.msra.mxu1 %v3607_v1  ;;  %2538 = vmatpush1.bf16.msra.mxu0 %v3607_v1 }
  0xa9   :  { %7095 = vst [vmem:[#allocation25_spill] sm:$0xff] %v4191_v54  ;;  %v4196_v11 = vsub.f32 %v4017_v4, %v543_v56  ;;  %v4199_v63 = vsub.f32 %v4019_v5, %v543_v56  ;;  %v4202_v0 = vsub.f32 %v4021_v6, %v543_v56  ;;  %v598_v2 = vmul.f32 0.0026041667, %v477_v53  ;;  %3572 = vmatprep.subr.bf16.mxu1 %v6877_v43 }
  0xaa   :  { %v261_v62 = vpop.xlane.xlu1 %260  ;;  %v993_v12 = vmul.f32 %v4185_v52, %v4185_v52  ;;  %v994_v4 = vmul.f32 %v4188_v58, %v4188_v58  ;;  %v995_v5 = vmul.f32 %v4191_v54, %v4191_v54  ;;  %2539 = vmatprep.subr.bf16.mxu0 %v6877_v43 }
  0xab   :  { %v544_v61 = vmul.f32 0.0026041667, %v261_v62  ;;  %v831_v6 = vmul.f32 %v4196_v11, %v4196_v11  ;;  %v832_v17 = vmul.f32 %v4199_v63, %v4199_v63  ;;  %v833_v26 = vmul.f32 %v4202_v0, %v4202_v0 }
  0xac   :  { %v4220_v7 = vsub.f32 %v4025_v8, %v598_v2  ;;  %v4223_v24 = vsub.f32 %v4027_v9, %v598_v2  ;;  %v1263_v32 = vadd.f32 %v994_v4, %v993_v12  ;;  %v4226_v44 = vsub.f32 %v4029_v10, %v598_v2  ;;  %v481_v60 = vpop.xlane.xlu0 %480  ;;  %v3608_v9 = vld [vmem:[%s6851_s1 + $0x18] sm:$0xff]  }
  0xad   :  { %v4230_v59 = vsub.f32 %v4034_v13, %v544_v61  ;;  %v4233_v42 = vsub.f32 %v4036_v14, %v544_v61  ;;  %v1047_v36 = vadd.f32 %v832_v17, %v831_v6  ;;  %v4236_v8 = vsub.f32 %v4038_v15, %v544_v61  ;;  %3588 = vmatpush1.bf16.msra.mxu1 %v3608_v9 }
  0xae   :  { %7096 = vst [vmem:[#allocation26_spill] sm:$0xff] %v4226_v44  ;;  %v599_v10 = vmul.f32 0.0026041667, %v481_v60  ;;  %v485_v33 = vpop.xlane.xlu1 %484  ;;  %v1264_v21 = vadd.f32 %v1263_v32, %v995_v5  ;;  %v996_v13 = vmul.f32 %v4220_v7, %v4220_v7  ;;  %v997_v14 = vmul.f32 %v4223_v24, %v4223_v24  ;;  %2540 = vmatpush1.bf16.msra.mxu0 %v3608_v9 }
  0xaf   :  { %7097 = vst [vmem:[#allocation27_spill] sm:$0xff] %v4236_v8  ;;  %v600_v46 = vmul.f32 0.0026041667, %v485_v33  ;;  %v998_v15 = vmul.f32 %v4226_v44, %v4226_v44  ;;  %v1048_v34 = vadd.f32 %v1047_v36, %v833_v26  ;;  %v834_v20 = vmul.f32 %v4230_v59, %v4230_v59  ;;  %3573 = vmatprep.subr.bf16.mxu1 %v6877_v43 }
  0xb0   :  { %v4251_v16 = vsub.f32 %v4043_v18, %v599_v10  ;;  %v4254_v49 = vsub.f32 %v4045_v19, %v599_v10  ;;  %1265 = vadd.xlane.f32.xlu0 %v1264_v21  ;;  %v1267_v3 = vadd.f32 %v997_v14, %v996_v13  ;;  %v4257_v56 = vsub.f32 %v4055_v25, %v599_v10  ;;  %v265_v2 = vpop.xlane.xlu0 %264  ;;  %v3609_v19 = vld [vmem:[%s6851_s1 + $0x20] sm:$0xff]  }
  0xb1   :  { %v4260_v53 = vsub.f32 %v4050_v22, %v600_v46  ;;  %v4263_v1 = vsub.f32 %v4052_v23, %v600_v46  ;;  %v835_v62 = vmul.f32 %v4233_v42, %v4233_v42  ;;  %v836_v18 = vmul.f32 %v4236_v8, %v4236_v8  ;;  %2541 = vmatprep.subr.bf16.mxu0 %v6877_v43 }
  0xb2   :  { %7098 = vst [vmem:[#allocation28_spill] sm:$0xff] %v4257_v56  ;;  %v545_v25 = vmul.f32 0.0026041667, %v265_v2  ;;  %v269_v12 = vpop.xlane.xlu1 %268  ;;  %v1268_v22 = vadd.f32 %v1267_v3, %v998_v15  ;;  %v999_v23 = vmul.f32 %v4251_v16, %v4251_v16  ;;  %v1000_v4 = vmul.f32 %v4254_v49, %v4254_v49  ;;  %3589 = vmatpush1.bf16.msra.mxu1 %v3609_v19 }
  0xb3   :  { %v546_v5 = vmul.f32 0.0026041667, %v269_v12  ;;  %v1001_v61 = vmul.f32 %v4257_v56, %v4257_v56  ;;  %v1051_v6 = vadd.f32 %v835_v62, %v834_v20  ;;  %v4281_v17 = vsub.f32 %v4063_v29, %v600_v46  ;;  %2542 = vmatpush1.bf16.msra.mxu0 %v3609_v19  ;;  %3574 = vmatprep.subr.bf16.mxu1 %v6877_v43 }
  0xb4   :  { %v4284_v26 = vsub.f32 %v4059_v27, %v545_v25  ;;  %v4287_v32 = vsub.f32 %v4061_v28, %v545_v25  ;;  %1269 = vadd.xlane.f32.xlu1 %v1268_v22  ;;  %1049 = vadd.xlane.f32.xlu0 %v1048_v34  ;;  %v1271_v60 = vadd.f32 %v1000_v4, %v999_v23  ;;  %v489_v10 = vpop.xlane.xlu0 %488  ;;  %v3610_v27 = vld [vmem:[%s6851_s1 + $0x28] sm:$0xff]  }
  0xb5   :  { %7099 = vst [vmem:[#allocation29_spill] sm:$0xff] %v4281_v17  ;;  %v4290_v36 = vsub.f32 %v4065_v30, %v546_v5  ;;  %v4293_v9 = vsub.f32 %v4067_v31, %v546_v5  ;;  %v1052_v29 = vadd.f32 %v1051_v6, %v836_v18  ;;  %v4296_v33 = vsub.f32 %v4073_v35, %v545_v25 }
  0xb6   :  { %v601_v28 = vmul.f32 0.0026041667, %v489_v10  ;;  %v493_v21 = vpop.xlane.xlu1 %492  ;;  %v1272_v13 = vadd.f32 %v1271_v60, %v1001_v61  ;;  %v837_v30 = vmul.f32 %v4284_v26, %v4284_v26  ;;  %v838_v31 = vmul.f32 %v4287_v32, %v4287_v32  ;;  %2543 = vmatprep.subr.bf16.mxu0 %v6877_v43  ;;  %3590 = vmatpush1.bf16.msra.mxu1 %v3610_v27 }
  0xb7   :  { %7100 = vst [vmem:[#allocation30_spill] sm:$0xff] %v4296_v33  ;;  %v602_v14 = vmul.f32 0.0026041667, %v493_v21  ;;  %v839_v35 = vmul.f32 %v4296_v33, %v4296_v33  ;;  %v1002_v46 = vmul.f32 %v4260_v53, %v4260_v53  ;;  %v1003_v15 = vmul.f32 %v4263_v1, %v4263_v1  ;;  %2544 = vmatpush1.bf16.msra.mxu0 %v3610_v27 }
  0xb8   :  { %v4314_v34 = vsub.f32 %v4077_v37, %v601_v28  ;;  %v4317_v20 = vsub.f32 %v4079_v38, %v601_v28  ;;  %1273 = vadd.xlane.f32.xlu0 %v1272_v13  ;;  %1053 = vadd.xlane.f32.xlu1 %v1052_v29  ;;  %v1055_v3 = vadd.f32 %v838_v31, %v837_v30  ;;  %v273_v18 = vpop.xlane.xlu0 %272  ;;  %v3611_v37 = vld [vmem:[%s6851_s1 + $0x30] sm:$0xff]  }
  0xb9   :  { %v4320_v2 = vsub.f32 %v4083_v40, %v602_v14  ;;  %v4323_v62 = vsub.f32 %v4085_v41, %v602_v14  ;;  %v1004_v19 = vmul.f32 %v4281_v17, %v4281_v17  ;;  %v1275_v25 = vadd.f32 %v1003_v15, %v1002_v46  ;;  %3575 = vmatprep.subr.bf16.mxu1 %v6877_v43  ;;  %v3773_v17 = vld [vmem:[#allocation2 + $0x5c8] sm:$0xff] }
  0xba   :  { %v547_v38 = vmul.f32 0.0026041667, %v273_v18  ;;  %v277_v12 = vpop.xlane.xlu1 %276  ;;  %v1056_v22 = vadd.f32 %v1055_v3, %v839_v35  ;;  %v4332_v40 = vsub.f32 %v4091_v45, %v601_v28  ;;  %v1005_v41 = vmul.f32 %v4314_v34, %v4314_v34  ;;  %2545 = vmatprep.subr.bf16.mxu0 %v6877_v43  ;;  %3591 = vmatpush1.bf16.msra.mxu1 %v3611_v37  ;;  %v3612_v28 = vld [vmem:[%s6851_s1 + $0x38] sm:$0xff]  }
  0xbb   :  { %v4337_v23 = vmul.f32 0.0026041667, %v277_v12  ;;  %v1276_v4 = vadd.f32 %v1275_v25, %v1004_v19  ;;  %v1006_v61 = vmul.f32 %v4317_v20, %v4317_v20  ;;  %v4342_v6 = vsub.f32 %v4081_v39, %v546_v5  ;;  %2546 = vmatpush1.bf16.msra.mxu0 %v3611_v37  ;;  %3576 = vmatprep.subr.bf16.mxu1 %v6877_v43  ;;  %v7108_v25 = vld [vmem:[#allocation5_spill] sm:$0xff] }
  0xbc   :  { %7101 = vst [vmem:[#allocation31_spill] sm:$0xff] %v4332_v40  ;;  %v4345_v60 = vsub.f32 %v4095_v47, %v547_v38  ;;  %v4348_v45 = vsub.f32 %v4097_v48, %v547_v38  ;;  %1057 = vadd.xlane.f32.xlu0 %v1056_v22  ;;  %v1007_v10 = vmul.f32 %v4332_v40, %v4332_v40  ;;  %v497_v47 = vpop.xlane.xlu0 %496  ;;  %v7112_v22 = vld [vmem:[#allocation9_spill] sm:$0xff] }
  0xbd   :  { %7102 = vst [vmem:[#allocation32_spill] sm:$0xff] %v4342_v6  ;;  %v840_v29 = vmul.f32 %v4290_v36, %v4290_v36  ;;  %v4356_v27 = vsub.f32 %v4101_v50, %v4337_v23  ;;  %v4360_v39 = vsub.f32 %v4103_v51, %v4337_v23  ;;  %1277 = vadd.xlane.f32.xlu1 %v1276_v4  ;;  %v603_v21 = vmul.f32 0.0026041667, %v497_v47 }
  0xbe   :  { %v1279_v5 = vadd.f32 %v1006_v61, %v1005_v41  ;;  %v841_v48 = vmul.f32 %v4293_v9, %v4293_v9  ;;  %v501_v13 = vpop.xlane.xlu1 %500  ;;  %v842_v50 = vmul.f32 %v4342_v6, %v4342_v6  ;;  %v4370_v30 = vsub.f32 %v4109_v55, %v547_v38  ;;  %2547 = vmatprep.subr.bf16.mxu0 %v6877_v43  ;;  %v7106_v55 = vld [vmem:[#allocation6_spill] sm:$0xff]  ;;  %v7110_v38 = vld [vmem:[#allocation8_spill] sm:$0xff] }
  0xbf   :  { %7103 = vst [vmem:[#allocation33_spill] sm:$0xff] %v4356_v27  ;;  %v843_v51 = vmul.f32 %v4345_v60, %v4345_v60  ;;  %v4376_v31 = vmul.f32 0.0026041667, %v501_v13  ;;  %v844_v15 = vmul.f32 %v4348_v45, %v4348_v45  ;;  %3592 = vmatpush1.bf16.msra.mxu1 %v3612_v28  ;;  %2548 = vmatpush1.bf16.msra.mxu0 %v3612_v28 }
  0xc0   :  { %7104 = vst [vmem:[#allocation34_spill] sm:$0xff] %v4370_v30  ;;  %v1280_v35 = vadd.f32 %v1279_v5, %v1007_v10  ;;  %v1059_v46 = vadd.f32 %v841_v48, %v840_v29  ;;  %v4381_v3 = vsub.f32 %v4113_v57, %v603_v21  ;;  %v4384_v18 = vsub.f32 %v7106_v55, %v603_v21  ;;  %v281_v4 = vpop.xlane.xlu0 %280  ;;  %v3613_v10 = vld [vmem:[%s6851_s1 + $0x40] sm:$0xff]   ;;  %v7118_v55 = vld [vmem:[#allocation12_spill] sm:$0xff] }
  0xc1   :  { %v845_v19 = vmul.f32 %v4370_v30, %v4370_v30  ;;  %v4389_v37 = vsub.f32 %v7108_v25, %v602_v14  ;;  %3577 = vmatprep.subr.bf16.mxu1 %v6877_v43  ;;  %v4394_v12 = vsub.f32 %v7110_v38, %v4376_v31  ;;  %v4398_v41 = vsub.f32 %v7112_v22, %v4376_v31 }
  0xc2   :  { %7105 = vst [vmem:[#allocation35_spill] sm:$0xff] %v4381_v3  ;;  %7107 = vst [vmem:[#allocation6_spill] sm:$0xff] %v4384_v18  ;;  %1281 = vadd.xlane.f32.xlu0 %v1280_v35  ;;  %v1060_v57 = vadd.f32 %v1059_v46, %v842_v50  ;;  %v1063_v61 = vadd.f32 %v844_v15, %v843_v51  ;;  %v549_v14 = vmul.f32 0.0026041667, %v281_v4  ;;  %v285_v29 = vpop.xlane.xlu1 %284  ;;  %2549 = vmatprep.subr.bf16.mxu0 %v6877_v43  ;;  %v7114_v50 = vld [vmem:[#allocation10_spill] sm:$0xff]  ;;  %v7116_v46 = vld [vmem:[#allocation11_spill] sm:$0xff] }
  0xc3   :  { %7109 = vst [vmem:[#allocation5_spill] sm:$0xff] %v4389_v37  ;;  %7111 = vst [vmem:[#allocation8_spill] sm:$0xff] %v4394_v12  ;;  %v1008_v47 = vmul.f32 %v4320_v2, %v4320_v2  ;;  %v1009_v5 = vmul.f32 %v4323_v62, %v4323_v62  ;;  %v1010_v48 = vmul.f32 %v4389_v37, %v4389_v37  ;;  %v4410_v28 = vmul.f32 0.0026041667, %v285_v29  ;;  %v7133_v37 = vld [vmem:[#allocation18_spill] sm:$0xff] }
  0xc4   :  { %7113 = vst [vmem:[#allocation9_spill] sm:$0xff] %v4398_v41  ;;  %1061 = vadd.xlane.f32.xlu1 %v1060_v57  ;;  %v1064_v13 = vadd.f32 %v1063_v61, %v845_v19  ;;  %v4413_v51 = vsub.f32 %v7114_v50, %v603_v21  ;;  %v1011_v35 = vmul.f32 %v4381_v3, %v4381_v3  ;;  %v7120_v19 = vld [vmem:[#allocation13_spill] sm:$0xff]  ;;  %v7122_v57 = vld [vmem:[#allocation14_spill] sm:$0xff]  ;;  %v505_v61 = vpop.xlane.xlu0 %504 }
  0xc5   :  { %3593 = vmatpush1.bf16.msra.mxu1 %v3613_v10  ;;  %v4418_v15 = vsub.f32 %v7116_v46, %v549_v14  ;;  %v4421_v25 = vsub.f32 %v7118_v55, %v549_v14  ;;  %v1283_v38 = vadd.f32 %v1009_v5, %v1008_v47  ;;  %v1012_v22 = vmul.f32 %v4384_v18, %v4384_v18  ;;  %v7124_v47 = vld [vmem:[#allocation7_spill] sm:$0xff]  ;;  %v3614_v50 = vld [vmem:[%s6851_s1 + $0x48] sm:$0xff]  }
  0xc6   :  { %7115 = vst [vmem:[#allocation10_spill] sm:$0xff] %v4413_v51  ;;  %3578 = vmatprep.subr.bf16.mxu1 %v6877_v43  ;;  %v4428_v21 = vsub.f32 %v7120_v19, %v4410_v28  ;;  %v4432_v4 = vsub.f32 %v7122_v57, %v4410_v28  ;;  %1065 = vadd.xlane.f32.xlu0 %v1064_v13  ;;  %v605_v55 = vmul.f32 0.0026041667, %v505_v61  ;;  %v509_v19 = vpop.xlane.xlu1 %508 }
  0xc7   :  { %7117 = vst [vmem:[#allocation11_spill] sm:$0xff] %v4418_v15  ;;  %7119 = vst [vmem:[#allocation12_spill] sm:$0xff] %v4421_v25  ;;  %v1013_v29 = vmul.f32 %v4413_v51, %v4413_v51  ;;  %v4438_v5 = vsub.f32 %v7124_v47, %v4337_v23  ;;  %v1284_v46 = vadd.f32 %v1283_v38, %v1010_v48  ;;  %2550 = vmatpush1.bf16.msra.mxu0 %v3613_v10  ;;  %v7126_v47 = vld [vmem:[#allocation15_spill] sm:$0xff]  ;;  %v7128_v48 = vmov 0  }
  0xc8   :  { %7121 = vst [vmem:[#allocation13_spill] sm:$0xff] %v4428_v21  ;;  %7123 = vst [vmem:[#allocation14_spill] sm:$0xff] %v4432_v4  ;;  %v1287_v43 = vadd.f32 %v1012_v22, %v1011_v35  ;;  %v846_v57 = vmul.f32 %v4356_v27, %v4356_v27  ;;  %v4445_v13 = vmul.f32 0.0026041667, %v509_v19  ;;  %v847_v51 = vmul.f32 %v4360_v39, %v4360_v39  ;;  %v7129_v35 = vld [vmem:[#allocation16_spill] sm:$0xff]  ;;  %v7131_v22 = vld [vmem:[#allocation17_spill] sm:$0xff] }
  0xc9   :  { %7125 = vst [vmem:[#allocation7_spill] sm:$0xff] %v4438_v5  ;;  %v848_v23 = vmul.f32 %v4438_v5, %v4438_v5  ;;  %v4452_v40 = vsub.f32 %v7126_v47, %v549_v14  ;;  %3594 = vmatpush1.bf16.msra.mxu1 %v3614_v50  ;;  %2551 = vmatprep.subr.bf16.mxu0 %v7128_v48  ;;  %v7135_v14 = vld [vmem:[#allocation19_spill] sm:$0xff] }
  0xca   :  { %1285 = vadd.xlane.f32.xlu1 %v1284_v46  ;;  %v4456_v38 = vsub.f32 %v7129_v35, %v605_v55  ;;  %v4459_v10 = vsub.f32 %v7131_v22, %v605_v55  ;;  %v1288_v61 = vadd.f32 %v1287_v43, %v1013_v29  ;;  %v849_v19 = vmul.f32 %v4418_v15, %v4418_v15  ;;  %v289_v46 = vpop.xlane.xlu0 %288  ;;  %v3615_v43 = vld [vmem:[%s6851_s1 + $0x50] sm:$0xff]   ;;  %v293_v22 = vpop.xlane.xlu1 %292 }
  0xcb   :  { %7127 = vst [vmem:[#allocation15_spill] sm:$0xff] %v4452_v40  ;;  %v4465_v56 = vsub.f32 %v7133_v37, %v4445_v13  ;;  %v4469_v47 = vsub.f32 %v7135_v14, %v4445_v13  ;;  %v1067_v54 = vadd.f32 %v847_v51, %v846_v57  ;;  %v850_v35 = vmul.f32 %v4421_v25, %v4421_v25 }
  0xcc   :  { %7130 = vst [vmem:[#allocation16_spill] sm:$0xff] %v4456_v38  ;;  %7132 = vst [vmem:[#allocation17_spill] sm:$0xff] %v4459_v10  ;;  %3579 = vmatprep.subr.bf16.mxu1 %v7128_v48  ;;  %1289 = vadd.xlane.f32.xlu0 %v1288_v61  ;;  %v551_v29 = vmul.f32 0.0026041667, %v289_v46  ;;  %v851_v37 = vmul.f32 %v4452_v40, %v4452_v40  ;;  %v4480_v14 = vsub.f32 %v3773_v17, %v4376_v31  ;;  %v3616_v46 = vld [vmem:[%s6851_s1 + $0x58] sm:$0xff]   ;;  %v7138_v17 = vld [vmem:[#allocation21_spill] sm:$0xff] }
  0xcd   :  { %7134 = vst [vmem:[#allocation18_spill] sm:$0xff] %v4465_v56  ;;  %7136 = vst [vmem:[#allocation19_spill] sm:$0xff] %v4469_v47  ;;  %v1014_v51 = vmul.f32 %v4394_v12, %v4394_v12  ;;  %2552 = vmatpush1.bf16.msra.mxu0 %v3614_v50  ;;  %v1068_v57 = vadd.f32 %v1067_v54, %v848_v23  ;;  %v4484_v44 = vmul.f32 0.0026041667, %v293_v22  ;;  %3595 = vmatpush1.bf16.msra.mxu1 %v3615_v43  ;;  %v7140_v40 = vld [vmem:[#allocation22_spill] sm:$0xff]  ;;  %v7142_v50 = vld [vmem:[#allocation20_spill] sm:$0xff] }
  0xce   :  { %7137 = vst [vmem:[#allocation36_spill] sm:$0xff] %v4480_v14  ;;  %v1071_v5 = vadd.f32 %v850_v35, %v849_v19  ;;  %v1015_v61 = vmul.f32 %v4398_v41, %v4398_v41  ;;  %2553 = vmatprep.subr.bf16.mxu0 %v7128_v48  ;;  %v4493_v31 = vsub.f32 %v7138_v17, %v551_v29  ;;  %v7144_v19 = vld [vmem:[#allocation23_spill] sm:$0xff]  ;;  %v7146_v22 = vld [vmem:[#allocation24_spill] sm:$0xff]  ;;  %v513_v33 = vpop.xlane.xlu0 %512 }
  0xcf   :  { %v4496_v30 = vsub.f32 %v7140_v40, %v551_v29  ;;  %v1016_v54 = vmul.f32 %v4480_v14, %v4480_v14  ;;  %v4501_v23 = vsub.f32 %v7142_v50, %v605_v55  ;;  %3580 = vmatprep.subr.bf16.mxu1 %v7128_v48  ;;  %1069 = vadd.xlane.f32.xlu1 %v1068_v57  ;;  %v4512_v8 = vmul.f32 0.0026041667, %v513_v33  ;;  %v517_v14 = vpop.xlane.xlu1 %516 }
  0xd0   :  { %7139 = vst [vmem:[#allocation21_spill] sm:$0xff] %v4493_v31  ;;  %v4506_v35 = vsub.f32 %v7144_v19, %v4484_v44  ;;  %v4510_v17 = vsub.f32 %v7146_v22, %v4484_v44  ;;  %v1072_v6 = vadd.f32 %v1071_v5, %v851_v37  ;;  %v1291_v40 = vadd.f32 %v1015_v61, %v1014_v51  ;;  %v3774_v5 = vld [vmem:[#allocation2 + $0xb8] sm:$0xff]  ;;  %v3617_v51 = vld [vmem:[%s6851_s1 + $0x60] sm:$0xff]  }
  0xd1   :  { %7141 = vst [vmem:[#allocation22_spill] sm:$0xff] %v4496_v30  ;;  %7143 = vst [vmem:[#allocation20_spill] sm:$0xff] %v4501_v23  ;;  %v1017_v55 = vmul.f32 %v4456_v38, %v4456_v38  ;;  %v1018_v57 = vmul.f32 %v4459_v10, %v4459_v10  ;;  %v1019_v50 = vmul.f32 %v4501_v23, %v4501_v23  ;;  %2554 = vmatpush1.bf16.msra.mxu0 %v3615_v43  ;;  %v3775_v61 = vld [vmem:[#allocation2 + $0x600] sm:$0xff]  ;;  %v3779_v10 = vld [vmem:[#allocation2 + $0xd0] sm:$0xff] }
  0xd2   :  { %7145 = vst [vmem:[#allocation23_spill] sm:$0xff] %v4506_v35  ;;  %7147 = vst [vmem:[#allocation24_spill] sm:$0xff] %v4510_v17  ;;  %1073 = vadd.xlane.f32.xlu0 %v1072_v6  ;;  %v1292_v19 = vadd.f32 %v1291_v40, %v1016_v54  ;;  %v4520_v22 = vmul.f32 0.0026041667, %v517_v14  ;;  %v4523_v37 = vsub.f32 %v3774_v5, %v4410_v28  ;;  %3596 = vmatpush1.bf16.msra.mxu1 %v3616_v46  ;;  %v3776_v6 = vld [vmem:[#allocation2 + $0x608] sm:$0xff]  ;;  %v3777_v54 = vld [vmem:[#allocation2 + $0x618] sm:$0xff] }
  0xd3   :  { %v852_v33 = vmul.f32 %v4428_v21, %v4428_v21  ;;  %v4531_v23 = vsub.f32 %v3775_v61, %v4512_v8  ;;  %v4534_v43 = vsub.f32 %v3776_v6, %v4512_v8  ;;  %v1295_v14 = vadd.f32 %v1018_v57, %v1017_v55  ;;  %2555 = vmatprep.subr.bf16.mxu0 %v7128_v48  ;;  %v3778_v5 = vld [vmem:[#allocation2 + $0x620] sm:$0xff]  ;;  %v297_v6 = vpop.xlane.xlu0 %296 }
  0xd4   :  { %7148 = vst [vmem:[#allocation37_spill] sm:$0xff] %v4523_v37  ;;  %v853_v28 = vmul.f32 %v4432_v4, %v4432_v4  ;;  %1293 = vadd.xlane.f32.xlu1 %v1292_v19  ;;  %v4540_v40 = vsub.f32 %v3777_v54, %v4520_v22  ;;  %v4543_v38 = vsub.f32 %v3778_v5, %v4520_v22  ;;  %v4549_v15 = vmul.f32 0.0026041667, %v297_v6  ;;  %v301_v19 = vpop.xlane.xlu1 %300 }
  0xd5   :  { %7149 = vst [vmem:[#allocation38_spill] sm:$0xff] %v4531_v23  ;;  %7150 = vst [vmem:[#allocation39_spill] sm:$0xff] %v4534_v43  ;;  %v854_v61 = vmul.f32 %v4523_v37, %v4523_v37  ;;  %v4547_v55 = vsub.f32 %v3779_v10, %v551_v29  ;;  %v1296_v57 = vadd.f32 %v1295_v14, %v1019_v50  ;;  %3581 = vmatprep.subr.bf16.mxu1 %v7128_v48  ;;  %v3780_v29 = vld [vmem:[#allocation2 + $0x5f8] sm:$0xff]  ;;  %v3781_v14 = vld [vmem:[#allocation2 + $0xf0] sm:$0xff] }
  0xd6   :  { %7151 = vst [vmem:[#allocation40_spill] sm:$0xff] %v4540_v40  ;;  %7152 = vst [vmem:[#allocation41_spill] sm:$0xff] %v4543_v38  ;;  %v1075_v21 = vadd.f32 %v853_v28, %v852_v33  ;;  %v855_v54 = vmul.f32 %v4493_v31, %v4493_v31  ;;  %2556 = vmatpush1.bf16.msra.mxu0 %v3616_v46  ;;  %v4554_v5 = vmul.f32 0.0026041667, %v301_v19  ;;  %3597 = vmatpush1.bf16.msra.mxu1 %v3617_v51  ;;  %v3782_v28 = vld [vmem:[#allocation2 + $0xf8] sm:$0xff] }
  0xd7   :  { %7153 = vst [vmem:[#allocation42_spill] sm:$0xff] %v4547_v55  ;;  %v856_v37 = vmul.f32 %v4496_v30, %v4496_v30  ;;  %v857_v10 = vmul.f32 %v4547_v55, %v4547_v55  ;;  %v4561_v50 = vsub.f32 %v3780_v29, %v4445_v13  ;;  %2557 = vmatprep.subr.bf16.mxu0 %v7128_v48  ;;  %v3783_v55 = vld [vmem:[#allocation2 + $0x108] sm:$0xff]  ;;  %v3784_v29 = vld [vmem:[#allocation2 + $0x110] sm:$0xff] }
  0xd8   :  { %1297 = vadd.xlane.f32.xlu0 %v1296_v57  ;;  %v1076_v33 = vadd.f32 %v1075_v21, %v854_v61  ;;  %v4565_v46 = vsub.f32 %v3781_v14, %v4549_v15  ;;  %v4568_v6 = vsub.f32 %v3782_v28, %v4549_v15  ;;  %v1020_v19 = vmul.f32 %v4465_v56, %v4465_v56  ;;  %v521_v57 = vpop.xlane.xlu0 %520  ;;  %v3618_v14 = vld [vmem:[%s6851_s1 + $0x68] sm:$0xff]   ;;  %v525_v30 = vpop.xlane.xlu1 %524 }
  0xd9   :  { %7154 = vst [vmem:[#allocation43_spill] sm:$0xff] %v4561_v50  ;;  %v4573_v13 = vsub.f32 %v3783_v55, %v4554_v5  ;;  %v4576_v31 = vsub.f32 %v3784_v29, %v4554_v5  ;;  %v1079_v21 = vadd.f32 %v856_v37, %v855_v54  ;;  %v1021_v61 = vmul.f32 %v4469_v47, %v4469_v47  ;;  %v3785_v29 = vld [vmem:[#allocation2 + $0x610] sm:$0xff] }
  0xda   :  { %7155 = vst [vmem:[#allocation44_spill] sm:$0xff] %v4565_v46  ;;  %7156 = vst [vmem:[#allocation45_spill] sm:$0xff] %v4568_v6  ;;  %3582 = vmatprep.subr.bf16.mxu1 %v7128_v48  ;;  %1077 = vadd.xlane.f32.xlu1 %v1076_v33  ;;  %v1022_v55 = vmul.f32 %v4561_v50, %v4561_v50  ;;  %v4586_v28 = vmul.f32 0.0026041667, %v521_v57  ;;  %v4589_v37 = vsub.f32 %v3785_v29, %v4512_v8  ;;  %v3786_v57 = vld [vmem:[#allocation2 + $0x630] sm:$0xff]  ;;  %v3787_v8 = vld [vmem:[#allocation2 + $0x638] sm:$0xff] }
  0xdb   :  { %7157 = vst [vmem:[#allocation46_spill] sm:$0xff] %v4573_v13  ;;  %7158 = vst [vmem:[#allocation47_spill] sm:$0xff] %v4576_v31  ;;  %v1023_v54 = vmul.f32 %v4531_v23, %v4531_v23  ;;  %2558 = vmatpush1.bf16.msra.mxu0 %v3617_v51  ;;  %v1080_v56 = vadd.f32 %v1079_v21, %v857_v10  ;;  %v1299_v47 = vadd.f32 %v1021_v61, %v1020_v19  ;;  %v3788_v10 = vld [vmem:[#allocation2 + $0xe8] sm:$0xff] }
  0xdc   :  { %7159 = vst [vmem:[#allocation48_spill] sm:$0xff] %v4589_v37  ;;  %v4593_v4 = vmul.f32 0.0026041667, %v525_v30  ;;  %v1024_v33 = vmul.f32 %v4534_v43, %v4534_v43  ;;  %3598 = vmatpush1.bf16.msra.mxu1 %v3618_v14  ;;  %2559 = vmatprep.subr.bf16.mxu0 %v7128_v48  ;;  %v4599_v50 = vsub.f32 %v3786_v57, %v4586_v28  ;;  %v3789_v21 = vld [vmem:[#allocation2 + $0x648] sm:$0xff]  ;;  %v3790_v57 = vld [vmem:[#allocation2 + $0x650] sm:$0xff]  ;;  %v305_v43 = vpop.xlane.xlu0 %304 }
  0xdd   :  { %v4602_v29 = vsub.f32 %v3787_v8, %v4586_v28  ;;  %v1025_v51 = vmul.f32 %v4589_v37, %v4589_v37  ;;  %v4607_v30 = vsub.f32 %v3788_v10, %v4484_v44  ;;  %3583 = vmatprep.subr.bf16.mxu1 %v7128_v48  ;;  %1081 = vadd.xlane.f32.xlu0 %v1080_v56  ;;  %v3619_v10 = vld [vmem:[%s6851_s1 + $0x70] sm:$0xff]  }
  0xde   :  { %7160 = vst [vmem:[#allocation49_spill] sm:$0xff] %v4599_v50  ;;  %v1300_v19 = vadd.f32 %v1299_v47, %v1022_v55  ;;  %v4611_v61 = vsub.f32 %v3789_v21, %v4593_v4  ;;  %v4614_v23 = vsub.f32 %v3790_v57, %v4593_v4  ;;  %v1303_v8 = vadd.f32 %v1024_v33, %v1023_v54  ;;  %v309_v55 = vpop.xlane.xlu1 %308  ;;  %v3791_v21 = vld [vmem:[#allocation2 + $0x100] sm:$0xff] }
  0xdf   :  { %7161 = vst [vmem:[#allocation50_spill] sm:$0xff] %v4602_v29  ;;  %7162 = vst [vmem:[#allocation51_spill] sm:$0xff] %v4607_v30  ;;  %v858_v37 = vmul.f32 %v4506_v35, %v4506_v35  ;;  %v859_v44 = vmul.f32 %v4510_v17, %v4510_v17  ;;  %v860_v56 = vmul.f32 %v4607_v30, %v4607_v30  ;;  %v4622_v47 = vmul.f32 0.0026041667, %v305_v43  ;;  %v3792_v30 = vld [vmem:[#allocation2 + $0x120] sm:$0xff]  ;;  %v3793_v17 = vld [vmem:[#allocation2 + $0x128] sm:$0xff] }
  0xe0   :  { %7163 = vst [vmem:[#allocation52_spill] sm:$0xff] %v4611_v61  ;;  %7164 = vst [vmem:[#allocation53_spill] sm:$0xff] %v4614_v23  ;;  %2560 = vmatpush1.bf16.msra.mxu0 %v3618_v14  ;;  %1301 = vadd.xlane.f32.xlu1 %v1300_v19  ;;  %v1304_v54 = vadd.f32 %v1303_v8, %v1025_v51  ;;  %v4627_v33 = vmul.f32 0.0026041667, %v309_v55  ;;  %v4630_v57 = vsub.f32 %v3791_v21, %v4549_v15  ;;  %v3794_v15 = vld [vmem:[#allocation2 + $0x138] sm:$0xff]  ;;  %v3795_v55 = vld [vmem:[#allocation2 + $0x140] sm:$0xff]  ;;  %v529_v21 = vpop.xlane.xlu0 %528 }
  0xe1   :  { %v861_v35 = vmul.f32 %v4565_v46, %v4565_v46  ;;  %2561 = vmatprep.subr.bf16.mxu0 %v7128_v48  ;;  %v1083_v43 = vadd.f32 %v859_v44, %v858_v37  ;;  %v4636_v14 = vsub.f32 %v3792_v30, %v4622_v47  ;;  %v4639_v19 = vsub.f32 %v3793_v17, %v4622_v47  ;;  %v3796_v44 = vld [vmem:[#allocation2 + $0x628] sm:$0xff] }
  0xe2   :  { %7165 = vst [vmem:[#allocation54_spill] sm:$0xff] %v4630_v57  ;;  %v862_v51 = vmul.f32 %v4568_v6, %v4568_v6  ;;  %3599 = vmatpush1.bf16.msra.mxu1 %v3619_v10  ;;  %1305 = vadd.xlane.f32.xlu0 %v1304_v54  ;;  %v4644_v8 = vsub.f32 %v3794_v15, %v4627_v33  ;;  %v533_v25 = vpop.xlane.xlu1 %532 }
  0xe3   :  { %7166 = vst [vmem:[#allocation55_spill] sm:$0xff] %v4636_v14  ;;  %7167 = vst [vmem:[#allocation56_spill] sm:$0xff] %v4639_v19  ;;  %v4647_v37 = vsub.f32 %v3795_v55, %v4627_v33  ;;  %v863_v30 = vmul.f32 %v4630_v57, %v4630_v57  ;;  %v4652_v17 = vsub.f32 %v3796_v44, %v4520_v22  ;;  %3584 = vmatprep.subr.bf16.mxu1 %v7128_v48  ;;  %v3797_v22 = vld [vmem:[#allocation2 + $0x640] sm:$0xff] }
  0xe4   :  { %7168 = vst [vmem:[#allocation57_spill] sm:$0xff] %v4644_v8  ;;  %v1084_v46 = vadd.f32 %v1083_v43, %v860_v56  ;;  %v1087_v6 = vadd.f32 %v862_v51, %v861_v35  ;;  %v1026_v54 = vmul.f32 %v4540_v40, %v4540_v40  ;;  %v1027_v15 = vmul.f32 %v4543_v38, %v4543_v38  ;;  %v3620_v35 = vld [vmem:[%s6851_s1 + $0x78] sm:$0xff]   ;;  %v3799_v40 = vld [vmem:[#allocation2 + $0x668] sm:$0xff]  ;;  %v3801_v38 = vld [vmem:[#allocation2 + $0x680] sm:$0xff] }
  0xe5   :  { %7169 = vst [vmem:[#allocation58_spill] sm:$0xff] %v4647_v37  ;;  %7170 = vst [vmem:[#allocation59_spill] sm:$0xff] %v4652_v17  ;;  %v1028_v55 = vmul.f32 %v4652_v17, %v4652_v17  ;;  %v611_v57 = vmul.f32 0.0026041667, %v529_v21  ;;  %v4661_v12 = vmul.f32 0.0026041667, %v533_v25  ;;  %v4664_v44 = vsub.f32 %v3797_v22, %v4586_v28  ;;  %2562 = vmatpush1.bf16.msra.mxu0 %v3619_v10 }
  0xe6   :  { %1085 = vadd.xlane.f32.xlu1 %v1084_v46  ;;  %v1088_v56 = vadd.f32 %v1087_v6, %v863_v30  ;;  %v1307_v43 = vadd.f32 %v1027_v15, %v1026_v54  ;;  %v1029_v51 = vmul.f32 %v4599_v50, %v4599_v50  ;;  %v1030_v21 = vmul.f32 %v4602_v29, %v4602_v29  ;;  %v3798_v25 = vld [vmem:[#allocation2 + $0x660] sm:$0xff]  ;;  %v3800_v10 = vld [vmem:[#allocation2 + $0x678] sm:$0xff]  ;;  %v313_v6 = vpop.xlane.xlu0 %312  ;;  %v317_v50 = vpop.xlane.xlu1 %316 }
  0xe7   :  { %7171 = vst [vmem:[#allocation60_spill] sm:$0xff] %v4664_v44  ;;  %v4673_v17 = vsub.f32 %v3798_v25, %v611_v57  ;;  %v4675_v28 = vsub.f32 %v3799_v40, %v611_v57  ;;  %v4678_v22 = vsub.f32 %v3800_v10, %v4661_v12  ;;  %v4681_v46 = vsub.f32 %v3801_v38, %v4661_v12  ;;  %v3802_v25 = vld [vmem:[#allocation2 + $0x118] sm:$0xff] }
  0xe8   :  { %3600 = vmatpush1.bf16.msra.mxu1 %v3620_v35  ;;  %1089 = vadd.xlane.f32.xlu0 %v1088_v56  ;;  %v1308_v30 = vadd.f32 %v1307_v43, %v1028_v55  ;;  %v1031_v54 = vmul.f32 %v4664_v44, %v4664_v44  ;;  %v1311_v15 = vadd.f32 %v1030_v21, %v1029_v51  ;;  %v557_v29 = vmul.f32 0.0026041667, %v313_v6  ;;  %v3803_v43 = vld [vmem:[#allocation2 + $0x130] sm:$0xff] }
  0xe9   :  { %7172 = vst [vmem:[#allocation61_spill] sm:$0xff] %v4673_v17  ;;  %7173 = vst [vmem:[#allocation62_spill] sm:$0xff] %v4675_v28  ;;  %v4686_v40 = vsub.f32 %v3802_v25, %v4554_v5  ;;  %v864_v10 = vmul.f32 %v4573_v13, %v4573_v13  ;;  %v865_v38 = vmul.f32 %v4576_v31, %v4576_v31  ;;  %v4692_v41 = vmul.f32 0.0026041667, %v317_v50  ;;  %v3804_v25 = vld [vmem:[#allocation2 + $0x150] sm:$0xff]  ;;  %v3805_v50 = vld [vmem:[#allocation2 + $0x158] sm:$0xff] }
  0xea   :  { %7174 = vst [vmem:[#allocation63_spill] sm:$0xff] %v4678_v22  ;;  %7175 = vst [vmem:[#allocation64_spill] sm:$0xff] %v4681_v46  ;;  %2563 = vmatprep.subr.bf16.mxu0 %v7128_v48  ;;  %1309 = vadd.xlane.f32.xlu1 %v1308_v30  ;;  %v1312_v55 = vadd.f32 %v1311_v15, %v1031_v54  ;;  %v4698_v5 = vsub.f32 %v3803_v43, %v4622_v47  ;;  %v3806_v48 = vld [vmem:[#allocation2 + $0x168] sm:$0xff]  ;;  %v3807_v54 = vld [vmem:[#allocation2 + $0x170] sm:$0xff] }
  0xeb   :  { %7176 = vst [vmem:[#allocation65_spill] sm:$0xff] %v4686_v40  ;;  %v866_v56 = vmul.f32 %v4686_v40, %v4686_v40  ;;  %v867_v51 = vmul.f32 %v4636_v14, %v4636_v14  ;;  %v1091_v21 = vadd.f32 %v865_v38, %v864_v10  ;;  %v4702_v44 = vsub.f32 %v3804_v25, %v557_v29  ;;  %v3808_v38 = vld [vmem:[#allocation2 + $0x658] sm:$0xff]  ;;  %v3810_v14 = vld [vmem:[#allocation2 + $0x148] sm:$0xff] }
  0xec   :  { %7177 = vst [vmem:[#allocation66_spill] sm:$0xff] %v4698_v5  ;;  %v4704_v6 = vsub.f32 %v3805_v50, %v557_v29  ;;  %v4707_v30 = vsub.f32 %v3806_v48, %v4692_v41  ;;  %2564 = vmatpush1.bf16.msra.mxu0 %v3620_v35  ;;  %1313 = vadd.xlane.f32.xlu0 %v1312_v55  ;;  %v3809_v55 = vld [vmem:[#allocation2 + $0x670] sm:$0xff]  ;;  %v195_v31 = vld [vmem:[#allocation2 + $0x4e8] sm:$0xff] }
  0xed   :  { %7178 = vst [vmem:[#allocation67_spill] sm:$0xff] %v4702_v44  ;;  %v4710_v47 = vsub.f32 %v3807_v54, %v4692_v41  ;;  %v868_v15 = vmul.f32 %v4639_v19, %v4639_v19  ;;  %v869_v10 = vmul.f32 %v4698_v5, %v4698_v5  ;;  %v4717_v43 = vsub.f32 %v3808_v38, %v4593_v4 }
  0xee   :  { %7179 = vst [vmem:[#allocation68_spill] sm:$0xff] %v4704_v6  ;;  %7180 = vst [vmem:[#allocation69_spill] sm:$0xff] %v4707_v30  ;;  %v1092_v25 = vadd.f32 %v1091_v21, %v866_v56  ;;  %v1032_v50 = vmul.f32 %v4611_v61, %v4611_v61  ;;  %v1033_v35 = vmul.f32 %v4614_v23, %v4614_v23  ;;  %v537_v56 = vpop.xlane.xlu0 %536  ;;  %v191_v61 = vld [vmem:[#allocation2 + $0x4c8] sm:$0xff]  ;;  %v190_v23 = vld [vmem:[#allocation2 + $0x4c0] sm:$0xff] }
  0xef   :  { %7181 = vst [vmem:[#allocation70_spill] sm:$0xff] %v4710_v47  ;;  %7182 = vst [vmem:[#allocation71_spill] sm:$0xff] %v4717_v43  ;;  %v4723_v48 = vsub.f32 %v3809_v55, %v611_v57  ;;  %v1095_v54 = vadd.f32 %v868_v15, %v867_v51  ;;  %v1034_v40 = vmul.f32 %v4717_v43, %v4717_v43 }
  0xf0   :  { %v1035_v5 = vmul.f32 %v4673_v17, %v4673_v17  ;;  %v1036_v4 = vmul.f32 %v4675_v28, %v4675_v28  ;;  %1093 = vadd.xlane.f32.xlu1 %v1092_v25  ;;  %v1315_v21 = vadd.f32 %v1033_v35, %v1032_v50  ;;  %v4734_v57 = vsub.f32 %v3810_v14, %v4627_v33  ;;  %v3811_v17 = vld [vmem:[#allocation2 + $0x160] sm:$0xff] }
  0xf1   :  { %7183 = vst [vmem:[#allocation72_spill] sm:$0xff] %v4723_v48  ;;  %v1037_v38 = vmul.f32 %v4723_v48, %v4723_v48  ;;  %v870_v51 = vmul.f32 %v4644_v8, %v4644_v8  ;;  %v1096_v15 = vadd.f32 %v1095_v54, %v869_v10  ;;  %v871_v43 = vmul.f32 %v4647_v37, %v4647_v37  ;;  %v146_v14 = vld [vmem:[#allocation2 + $0x360] sm:$0xff]  ;;  %v147_v48 = vld [vmem:[#allocation2 + $0x368] sm:$0xff] }
  0xf2   :  { %7184 = vst [vmem:[#allocation73_spill] sm:$0xff] %v4734_v57  ;;  %v1319_v55 = vadd.f32 %v1036_v4, %v1035_v5  ;;  %v4740_v28 = vsub.f32 %v3811_v17, %v557_v29  ;;  %v1316_v25 = vadd.f32 %v1315_v21, %v1034_v40  ;;  %v872_v50 = vmul.f32 %v4734_v57, %v4734_v57  ;;  %v3812_v29 = vld [vmem:[#allocation2 + $0x688] sm:$0xff] }
  0xf3   :  { %v873_v35 = vmul.f32 %v4702_v44, %v4702_v44  ;;  %v874_v33 = vmul.f32 %v4704_v6, %v4704_v6  ;;  %1097 = vadd.xlane.f32.xlu0 %v1096_v15  ;;  %v1099_v10 = vadd.f32 %v871_v43, %v870_v51  ;;  %v4751_v17 = vsub.f32 %v3812_v29, %v4661_v12  ;;  %v541_v15 = vpop.xlane.xlu1 %540  ;;  %v321_v43 = vpop.xlane.xlu0 %320  ;;  %v148_v12 = vld [vmem:[#allocation2 + $0x370] sm:$0xff]  ;;  %v3813_v29 = vld [vmem:[#allocation2 + $0x178] sm:$0xff] }
  0xf4   :  { %7185 = vst [vmem:[#allocation74_spill] sm:$0xff] %v4740_v28  ;;  %v1320_v5 = vadd.f32 %v1319_v55, %v1037_v38  ;;  %v875_v54 = vmul.f32 %v4740_v28, %v4740_v28  ;;  %1317 = vadd.xlane.f32.xlu1 %v1316_v25  ;;  %v1038_v4 = vmul.f32 %v4678_v22, %v4678_v22  ;;  %v613_v57 = vmul.f32 0.0026041667, %v537_v56  ;;  %v3814_v6 = vld [vmem:[#allocation2 + $0x690] sm:$0xff]  ;;  %v3815_v56 = vld [vmem:[#allocation2 + $0x698] sm:$0xff] }
  0xf5   :  { %7186 = vst [vmem:[#allocation75_spill] sm:$0xff] %v4751_v17  ;;  %v1103_v40 = vadd.f32 %v874_v33, %v873_v35  ;;  %v1039_v21 = vmul.f32 %v4681_v46, %v4681_v46  ;;  %v1100_v44 = vadd.f32 %v1099_v10, %v872_v50  ;;  %v398_v38 = vadd.f32 %v147_v48, %v146_v14  ;;  %v152_v35 = vld [vmem:[#allocation2 + $0x390] sm:$0xff]  ;;  %v153_v33 = vld [vmem:[#allocation2 + $0x398] sm:$0xff] }
  0xf6   :  { %v1040_v55 = vmul.f32 %v4751_v17, %v4751_v17  ;;  %v4760_v25 = vsub.f32 %v3813_v29, %v4692_v41  ;;  %v4762_v22 = vsub.f32 %v3814_v6, %v613_v57  ;;  %v4764_v50 = vsub.f32 %v3815_v56, %v613_v57  ;;  %v154_v56 = vld [vmem:[#allocation2 + $0x3a0] sm:$0xff] }
  0xf7   :  { %v1104_v51 = vadd.f32 %v1103_v40, %v875_v54  ;;  %v1323_v28 = vadd.f32 %v1039_v21, %v1038_v4  ;;  %1321 = vadd.xlane.f32.xlu0 %v1320_v5  ;;  %v876_v48 = vmul.f32 %v4707_v30, %v4707_v30  ;;  %v877_v14 = vmul.f32 %v4710_v47, %v4710_v47  ;;  %v149_v4 = vld [vmem:[#allocation2 + $0x378] sm:$0xff]  ;;  %v150_v21 = vld [vmem:[#allocation2 + $0x380] sm:$0xff] }
  0xf8   :  { %7187 = vst [vmem:[#allocation76_spill] sm:$0xff] %v4760_v25  ;;  %7188 = vst [vmem:[#allocation77_spill] sm:$0xff] %v4762_v22  ;;  %1101 = vadd.xlane.f32.xlu1 %v1100_v44  ;;  %v559_v10 = vmul.f32 0.0026041667, %v321_v43  ;;  %v614_v54 = vmul.f32 0.0026041667, %v541_v15  ;;  %v399_v41 = vadd.f32 %v398_v38, %v148_v12  ;;  %v406_v40 = vadd.f32 %v153_v33, %v152_v35  ;;  %v325_v15 = vpop.xlane.xlu1 %324 }
  0xf9   :  { %7189 = vst [vmem:[#allocation78_spill] sm:$0xff] %v4764_v50  ;;  %v1324_v5 = vadd.f32 %v1323_v28, %v1040_v55  ;;  %v878_v6 = vmul.f32 %v4760_v25, %v4760_v25  ;;  %v1107_v29 = vadd.f32 %v877_v14, %v876_v48  ;;  %v3816_v17 = vld [vmem:[#allocation2 + $0x6a0] sm:$0xff]  ;;  %v3818_v44 = vld [vmem:[#allocation2 + $0x188] sm:$0xff]  ;;  %v1041_v38 = vmul.f32 %v4762_v22, %v4762_v22  ;;  %v3820_v33 = vld [vmem:[#allocation2 + $0x6b0] sm:$0xff] }
  0xfa   :  { %v4772_v46 = vsub.f32 %v3816_v17, %v613_v57  ;;  %v3817_v30 = vld [vmem:[#allocation2 + $0x180] sm:$0xff]  ;;  %v4776_v43 = vsub.f32 %v3818_v44, %v559_v10  ;;  %v1042_v28 = vmul.f32 %v4764_v50, %v4764_v50  ;;  %v402_v55 = vadd.f32 %v150_v21, %v149_v4  ;;  %v3819_v12 = vld [vmem:[#allocation2 + $0x6a8] sm:$0xff]  ;;  %v3821_v50 = vld [vmem:[#allocation2 + $0x190] sm:$0xff] }
  0xfb   :  { %1105 = vadd.xlane.f32.xlu0 %v1104_v51  ;;  %v4774_v8 = vsub.f32 %v3817_v30, %v559_v10  ;;  %v4782_v35 = vsub.f32 %v3819_v12, %v614_v54  ;;  %v407_v57 = vadd.f32 %v406_v40, %v154_v56  ;;  %v151_v17 = vld [vmem:[#allocation2 + $0x388] sm:$0xff]  ;;  %v156_v30 = vld [vmem:[#allocation2 + $0x3b0] sm:$0xff]  ;;  %v4784_v48 = vsub.f32 %v3820_v33, %v614_v54  ;;  %v329_v12 = vpop.xlane.xlu0 %328  ;;  %v3823_v33 = vld [vmem:[#allocation2 + $0x198] sm:$0xff] }
  0xfc   :  { %7190 = vst [vmem:[#allocation79_spill] sm:$0xff] %v4772_v46  ;;  %7192 = vst [vmem:[#allocation81_spill] sm:$0xff] %v4776_v43  ;;  %1325 = vadd.xlane.f32.xlu1 %v1324_v5  ;;  %v155_v51 = vld [vmem:[#allocation2 + $0x3a8] sm:$0xff]  ;;  %v1108_v14 = vadd.f32 %v1107_v29, %v878_v6  ;;  %v560_v44 = vmul.f32 0.0026041667, %v325_v15  ;;  %v1043_v25 = vmul.f32 %v4772_v46, %v4772_v46  ;;  %v157_v6 = vld [vmem:[#allocation2 + $0x3b8] sm:$0xff] }
  0xfd   :  { %7191 = vst [vmem:[#allocation80_spill] sm:$0xff] %v4774_v8  ;;  %7193 = vst [vmem:[#allocation82_spill] sm:$0xff] %v4782_v35  ;;  %v1327_v22 = vadd.f32 %v1042_v28, %v1041_v38  ;;  %v4788_v5 = vsub.f32 %v3821_v50, %v559_v10  ;;  %v879_v4 = vmul.f32 %v4774_v8, %v4774_v8  ;;  %v3822_v29 = vld [vmem:[#allocation2 + $0x6b8] sm:$0xff]  ;;  %v3824_v38 = vld [vmem:[#allocation2 + $0x1a0] sm:$0xff] }
  0xfe   :  { %7194 = vst [vmem:[#allocation83_spill] sm:$0xff] %v4784_v48  ;;  %v880_v40 = vmul.f32 %v4776_v43, %v4776_v43  ;;  %v403_v21 = vadd.f32 %v402_v55, %v151_v17  ;;  %v410_v56 = vadd.f32 %v156_v30, %v155_v51  ;;  %v4794_v15 = vsub.f32 %v3822_v29, %v614_v54  ;;  %v159_v55 = vld [vmem:[#allocation2 + $0x3c8] sm:$0xff]  ;;  %v160_v8 = vld [vmem:[#allocation2 + $0x3d0] sm:$0xff]  ;;  %v181_v47 = vld [vmem:[#allocation2 + $0x478] sm:$0xff] }
  0xff   :  { %400 = vadd.xlane.f32.xlu0 %v399_v41  ;;  %7195 = vst [vmem:[#allocation84_spill] sm:$0xff] %v4788_v5  ;;  %v4796_v41 = vsub.f32 %v3823_v33, %v560_v44  ;;  %v4798_v50 = vsub.f32 %v3824_v38, %v560_v44  ;;  %v1044_v10 = vmul.f32 %v4782_v35, %v4782_v35  ;;  %v561_v30 = vmul.f32 0.0026041667, %v329_v12  ;;  %v3825_v43 = vld [vmem:[#allocation2 + $0x1a8] sm:$0xff]  ;;  %v333_v12 = vpop.xlane.xlu1 %332 }
 0x100   :  { %1109 = vadd.xlane.f32.xlu1 %v1108_v14  ;;  %7196 = vst [vmem:[#allocation85_spill] sm:$0xff] %v4794_v15  ;;  %v1045_v28 = vmul.f32 %v4784_v48, %v4784_v48  ;;  %v158_v14 = vld [vmem:[#allocation2 + $0x3c0] sm:$0xff]  ;;  %v1328_v17 = vadd.f32 %v1327_v22, %v1043_v25  ;;  %v881_v54 = vmul.f32 %v4788_v5, %v4788_v5  ;;  %v168_v5 = vld [vmem:[#allocation2 + $0x410] sm:$0xff] }
 0x101   :  { %7197 = vst [vmem:[#allocation86_spill] sm:$0xff] %v4796_v41  ;;  %7198 = vst [vmem:[#allocation87_spill] sm:$0xff] %v4798_v50  ;;  %v1111_v51 = vadd.f32 %v880_v40, %v879_v4  ;;  %v411_v29 = vadd.f32 %v410_v56, %v157_v6  ;;  %v1046_v33 = vmul.f32 %v4794_v15, %v4794_v15  ;;  %v3826_v4 = vld [vmem:[#allocation2 + $0x1b0] sm:$0xff] }
 0x102   :  { %v414_v38 = vadd.f32 %v159_v55, %v158_v14  ;;  %v1331_v46 = vadd.f32 %v1045_v28, %v1044_v10  ;;  %v4808_v35 = vsub.f32 %v3825_v43, %v560_v44  ;;  %v883_v22 = vmul.f32 %v4798_v50, %v4798_v50  ;;  %v164_v6 = vld [vmem:[#allocation2 + $0x3f0] sm:$0xff]  ;;  %v165_v10 = vld [vmem:[#allocation2 + $0x3f8] sm:$0xff]  ;;  %v162_v28 = vld [vmem:[#allocation2 + $0x3e0] sm:$0xff] }
 0x103   :  { %408 = vadd.xlane.f32.xlu0 %v407_v57  ;;  %v882_v57 = vmul.f32 %v4796_v41, %v4796_v41  ;;  %v1112_v25 = vadd.f32 %v1111_v51, %v881_v54  ;;  %v4814_v40 = vsub.f32 %v3826_v4, %v561_v30  ;;  %v161_v44 = vld [vmem:[#allocation2 + $0x3d8] sm:$0xff]  ;;  %v562_v55 = vmul.f32 0.0026041667, %v333_v12  ;;  %v3828_v54 = vld [vmem:[#allocation2 + $0x1c0] sm:$0xff]  ;;  %v167_v12 = vld [vmem:[#allocation2 + $0x408] sm:$0xff] }
 0x104   :  { %404 = vadd.xlane.f32.xlu1 %v403_v21  ;;  %7199 = vst [vmem:[#allocation88_spill] sm:$0xff] %v4808_v35  ;;  %v3827_v21 = vld [vmem:[#allocation2 + $0x1b8] sm:$0xff]  ;;  %v415_v43 = vadd.f32 %v414_v38, %v160_v8  ;;  %v1332_v14 = vadd.f32 %v1331_v46, %v1046_v33  ;;  %v884_v15 = vmul.f32 %v4808_v35, %v4808_v35  ;;  %v166_v8 = vld [vmem:[#allocation2 + $0x400] sm:$0xff]  ;;  %v337_v46 = vpop.xlane.xlu0 %336  ;;  %v163_v33 = vld [vmem:[#allocation2 + $0x3e8] sm:$0xff] }
 0x105   :  { %7200 = vst [vmem:[#allocation89_spill] sm:$0xff] %v4814_v40  ;;  %v4816_v56 = vsub.f32 %v3827_v21, %v561_v30  ;;  %v4820_v51 = vsub.f32 %v3828_v54, %v561_v30  ;;  %v422_v4 = vadd.f32 %v165_v10, %v164_v6  ;;  %v885_v21 = vmul.f32 %v4814_v40, %v4814_v40  ;;  %v3829_v35 = vld [vmem:[#allocation2 + $0x1c8] sm:$0xff]  ;;  %v170_v40 = vld [vmem:[#allocation2 + $0x420] sm:$0xff]  ;;  %v169_v41 = vld [vmem:[#allocation2 + $0x418] sm:$0xff] }
 0x106   :  { %v418_v38 = vadd.f32 %v162_v28, %v161_v44  ;;  %v171_v44 = vld [vmem:[#allocation2 + $0x428] sm:$0xff] }
 0x107   :  { %1329 = vadd.xlane.f32.xlu0 %v1328_v17  ;;  %7201 = vst [vmem:[#allocation90_spill] sm:$0xff] %v4816_v56  ;;  %v1115_v17 = vadd.f32 %v883_v22, %v882_v57  ;;  %7202 = vst [vmem:[#allocation91_spill] sm:$0xff] %v4820_v51  ;;  %v4826_v57 = vsub.f32 %v3829_v35, %v562_v55  ;;  %v3830_v22 = vld [vmem:[#allocation2 + $0x1d0] sm:$0xff]  ;;  %v423_v6 = vadd.f32 %v422_v4, %v166_v8  ;;  %v3831_v35 = vld [vmem:[#allocation2 + $0x1d8] sm:$0xff] }
 0x108   :  { %412 = vadd.xlane.f32.xlu1 %v411_v29  ;;  %v886_v29 = vmul.f32 %v4816_v56, %v4816_v56  ;;  %v4828_v30 = vsub.f32 %v3830_v22, %v562_v55  ;;  %v887_v10 = vmul.f32 %v4820_v51, %v4820_v51  ;;  %v419_v28 = vadd.f32 %v418_v38, %v163_v33  ;;  %v345_v50 = vpop.xlane.xlu0 %344  ;;  %v3832_v4 = vld [vmem:[#allocation2 + $0x1e0] sm:$0xff]  ;;  %v172_v38 = vld [vmem:[#allocation2 + $0x430] sm:$0xff]  ;;  %v173_v33 = vld [vmem:[#allocation2 + $0x438] sm:$0xff] }
 0x109   :  { %7203 = vst [vmem:[#allocation92_spill] sm:$0xff] %v4826_v57  ;;  %v426_v56 = vadd.f32 %v168_v5, %v167_v12  ;;  %v4832_v48 = vsub.f32 %v3831_v35, %v562_v55  ;;  %v430_v22 = vadd.f32 %v171_v44, %v170_v40  ;;  %v341_v5 = vpop.xlane.xlu1 %340  ;;  %v177_v40 = vld [vmem:[#allocation2 + $0x458] sm:$0xff]  ;;  %v174_v12 = vld [vmem:[#allocation2 + $0x440] sm:$0xff] }
 0x10a   :  { %7204 = vst [vmem:[#allocation93_spill] sm:$0xff] %v4828_v30  ;;  %v1119_v54 = vadd.f32 %v886_v29, %v885_v21  ;;  %v3833_v29 = vld [vmem:[#allocation2 + $0x1e8] sm:$0xff]  ;;  %v564_v44 = vmul.f32 0.0026041667, %v341_v5  ;;  %v178_v51 = vld [vmem:[#allocation2 + $0x460] sm:$0xff]  ;;  %v434_v5 = vadd.f32 %v174_v12, %v173_v33 }
 0x10b   :  { %1113 = vadd.xlane.f32.xlu0 %v1112_v25  ;;  %v1116_v25 = vadd.f32 %v1115_v17, %v884_v15  ;;  %7205 = vst [vmem:[#allocation94_spill] sm:$0xff] %v4832_v48  ;;  %v888_v15 = vmul.f32 %v4826_v57, %v4826_v57  ;;  %v427_v55 = vadd.f32 %v426_v56, %v169_v41  ;;  %v180_v57 = vld [vmem:[#allocation2 + $0x470] sm:$0xff] }
 0x10c   :  { %1333 = vadd.xlane.f32.xlu1 %v1332_v14  ;;  %v563_v14 = vmul.f32 0.0026041667, %v337_v46  ;;  %v1120_v17 = vadd.f32 %v1119_v54, %v887_v10  ;;  %v176_v46 = vld [vmem:[#allocation2 + $0x450] sm:$0xff]  ;;  %v431_v35 = vadd.f32 %v430_v22, %v172_v38  ;;  %v175_v22 = vld [vmem:[#allocation2 + $0x448] sm:$0xff] }
 0x10d   :  { %v3834_v54 = vld [vmem:[#allocation2 + $0x1f0] sm:$0xff]  ;;  %v349_v56 = vpop.xlane.xlu1 %348  ;;  %v179_v38 = vld [vmem:[#allocation2 + $0x468] sm:$0xff]  ;;  %v435_v33 = vadd.f32 %v434_v5, %v175_v22  ;;  %v186_v5 = vld [vmem:[#allocation2 + $0x4a0] sm:$0xff] }
 0x10e   :  { %v4838_v21 = vsub.f32 %v3832_v4, %v563_v14  ;;  %v4840_v8 = vsub.f32 %v3833_v29, %v563_v14  ;;  %v4844_v4 = vsub.f32 %v3834_v54, %v563_v14  ;;  %v438_v29 = vadd.f32 %v177_v40, %v176_v46  ;;  %v3836_v14 = vld [vmem:[#allocation2 + $0x200] sm:$0xff] }
 0x10f   :  { %416 = vadd.xlane.f32.xlu0 %v415_v43  ;;  %v889_v43 = vmul.f32 %v4828_v30, %v4828_v30  ;;  %v442_v12 = vadd.f32 %v180_v57, %v179_v38  ;;  %v182_v30 = vld [vmem:[#allocation2 + $0x480] sm:$0xff] }
 0x110   :  { %1117 = vadd.xlane.f32.xlu1 %v1116_v25  ;;  %7206 = vst [vmem:[#allocation95_spill] sm:$0xff] %v4838_v21  ;;  %7207 = vst [vmem:[#allocation96_spill] sm:$0xff] %v4840_v8  ;;  %v353_v25 = vpop.xlane.xlu0 %352  ;;  %v892_v41 = vmul.f32 %v4840_v8, %v4840_v8  ;;  %v439_v40 = vadd.f32 %v438_v29, %v178_v51  ;;  %v893_v54 = vmul.f32 %v4844_v4, %v4844_v4  ;;  %v189_v51 = vld [vmem:[#allocation2 + $0x4b8] sm:$0xff] }
 0x111   :  { %v1123_v10 = vadd.f32 %v889_v43, %v888_v15  ;;  %7208 = vst [vmem:[#allocation97_spill] sm:$0xff] %v4844_v4  ;;  %v3835_v15 = vld [vmem:[#allocation2 + $0x1f8] sm:$0xff]  ;;  %v357_v8 = vpop.xlane.xlu1 %356  ;;  %v566_v29 = vmul.f32 0.0026041667, %v349_v56  ;;  %v567_v4 = vmul.f32 0.0026041667, %v353_v25 }
 0x112   :  { %v4850_v43 = vsub.f32 %v3835_v15, %v564_v44  ;;  %v3837_v15 = vld [vmem:[#allocation2 + $0x210] sm:$0xff] }
 0x113   :  { %424 = vadd.xlane.f32.xlu0 %v423_v6  ;;  %v890_v6 = vmul.f32 %v4832_v48, %v4832_v48  ;;  %v565_v48 = vmul.f32 0.0026041667, %v345_v50  ;;  %v183_v50 = vld [vmem:[#allocation2 + $0x488] sm:$0xff] }
 0x114   :  { %420 = vadd.xlane.f32.xlu1 %v419_v28  ;;  %v891_v28 = vmul.f32 %v4838_v21, %v4838_v21  ;;  %7209 = vst [vmem:[#allocation98_spill] sm:$0xff] %v4850_v43  ;;  %v446_v38 = vadd.f32 %v183_v50, %v182_v30  ;;  %v187_v50 = vld [vmem:[#allocation2 + $0x4a8] sm:$0xff] }
 0x115   :  { %v1124_v46 = vadd.f32 %v1123_v10, %v890_v6  ;;  %v4856_v37 = vsub.f32 %v3837_v15, %v565_v48  ;;  %v3839_v6 = vld [vmem:[#allocation2 + $0x208] sm:$0xff]  ;;  %v184_v15 = vld [vmem:[#allocation2 + $0x490] sm:$0xff]  ;;  %v365_v30 = vpop.xlane.xlu1 %364 }
 0x116   :  { %v1127_v21 = vadd.f32 %v892_v41, %v891_v28  ;;  %v4860_v10 = vsub.f32 %v3839_v6, %v564_v44  ;;  %v894_v28 = vmul.f32 %v4850_v43, %v4850_v43  ;;  %v185_v41 = vld [vmem:[#allocation2 + $0x498] sm:$0xff]  ;;  %v3840_v6 = vld [vmem:[#allocation2 + $0x220] sm:$0xff] }
 0x117   :  { %1121 = vadd.xlane.f32.xlu0 %v1120_v17  ;;  %v4852_v17 = vsub.f32 %v3836_v14, %v564_v44  ;;  %7211 = vst [vmem:[#allocation100_spill] sm:$0xff] %v4856_v37  ;;  %v3838_v14 = vld [vmem:[#allocation2 + $0x218] sm:$0xff]  ;;  %v192_v44 = vld [vmem:[#allocation2 + $0x4d0] sm:$0xff]  ;;  %v4866_v56 = vsub.f32 %v3840_v6, %v565_v48  ;;  %v450_v43 = vadd.f32 %v186_v5, %v185_v41  ;;  %v3843_v6 = vld [vmem:[#allocation2 + $0x240] sm:$0xff] }
 0x118   :  { %428 = vadd.xlane.f32.xlu1 %v427_v55  ;;  %v361_v55 = vpop.xlane.xlu0 %360  ;;  %v4858_v19 = vsub.f32 %v3838_v14, %v565_v48  ;;  %7213 = vst [vmem:[#allocation102_spill] sm:$0xff] %v4860_v10  ;;  %v1128_v22 = vadd.f32 %v1127_v21, %v893_v54  ;;  %v3841_v54 = vld [vmem:[#allocation2 + $0x228] sm:$0xff]  ;;  %v896_v48 = vmul.f32 %v4860_v10, %v4860_v10 }
 0x119   :  { %7210 = vst [vmem:[#allocation99_spill] sm:$0xff] %v4852_v17  ;;  %v895_v57 = vmul.f32 %v4852_v17, %v4852_v17  ;;  %7214 = vst [vmem:[#allocation103_spill] sm:$0xff] %v4866_v56  ;;  %v897_v17 = vmul.f32 %v4856_v37, %v4856_v37  ;;  %v458_v41 = vadd.f32 %v192_v44, %v191_v61  ;;  %v569_v13 = vmul.f32 0.0026041667, %v361_v55 }
 0x11a   :  { %7212 = vst [vmem:[#allocation101_spill] sm:$0xff] %v4858_v19  ;;  %v4878_v37 = vsub.f32 %v3843_v6, %v567_v4  ;;  %v899_v61 = vmul.f32 %v4866_v56, %v4866_v56 }
 0x11b   :  { %432 = vadd.xlane.f32.xlu0 %v431_v35  ;;  %v188_v35 = vld [vmem:[#allocation2 + $0x4b0] sm:$0xff] }
 0x11c   :  { %1125 = vadd.xlane.f32.xlu1 %v1124_v46  ;;  %v443_v46 = vadd.f32 %v442_v12, %v181_v47  ;;  %v454_v14 = vadd.f32 %v189_v51, %v188_v35  ;;  %v369_v21 = vpop.xlane.xlu0 %368  ;;  %v4872_v47 = vsub.f32 %v3841_v54, %v566_v29  ;;  %v1131_v12 = vadd.f32 %v895_v57, %v894_v28  ;;  %v193_v51 = vld [vmem:[#allocation2 + $0x4d8] sm:$0xff]  ;;  %v4885_v28 = vld [vmem:[%s6851_s1 + $0x80] sm:$0xff]  }
 0x11d   :  { %v447_v35 = vadd.f32 %v446_v38, %v184_v15  ;;  %7217 = vst [vmem:[#allocation106_spill] sm:$0xff] %v4878_v37  ;;  %v451_v57 = vadd.f32 %v450_v43, %v187_v50  ;;  %v3845_v38 = vld [vmem:[#allocation2 + $0x238] sm:$0xff]  ;;  %3481 = vmatprep.subr.bf16.mxu1 %v4885_v28  ;;  %v459_v44 = vadd.f32 %v458_v41, %v193_v51  ;;  %v3849_v51 = vld [vmem:[#allocation2 + $0x280] sm:$0xff] }
 0x11e   :  { %7215 = vst [vmem:[#allocation104_spill] sm:$0xff] %v4872_v47  ;;  %v455_v5 = vadd.f32 %v454_v14, %v190_v23  ;;  %v568_v23 = vmul.f32 0.0026041667, %v357_v8  ;;  %v1132_v15 = vadd.f32 %v1131_v12, %v896_v48  ;;  %v3846_v14 = vld [vmem:[#allocation2 + $0x250] sm:$0xff]  ;;  %v3848_v12 = vld [vmem:[#allocation2 + $0x278] sm:$0xff]  ;;  %v903_v56 = vmul.f32 %v4878_v37, %v4878_v37 }
 0x11f   :  { %440 = vadd.xlane.f32.xlu0 %v439_v40  ;;  %v898_v40 = vmul.f32 %v4858_v19, %v4858_v19  ;;  %v3844_v19 = vld [vmem:[#allocation2 + $0x248] sm:$0xff]  ;;  %v4896_v43 = vsub.f32 %v3846_v14, %v567_v4  ;;  %v4900_v6 = vsub.f32 %v3848_v12, %v569_v13 }
 0x120   :  { %436 = vadd.xlane.f32.xlu1 %v435_v33  ;;  %v3842_v33 = vld [vmem:[#allocation2 + $0x230] sm:$0xff]  ;;  %v4880_v54 = vsub.f32 %v3844_v19, %v567_v4  ;;  %v900_v19 = vmul.f32 %v4872_v47, %v4872_v47  ;;  %v377_v8 = vpop.xlane.xlu0 %376 }
 0x121   :  { %v4874_v25 = vsub.f32 %v3842_v33, %v566_v29  ;;  %v194_v33 = vld [vmem:[#allocation2 + $0x4e0] sm:$0xff]  ;;  %7220 = vst [vmem:[#allocation109_spill] sm:$0xff] %v4896_v43  ;;  %7222 = vst [vmem:[#allocation111_spill] sm:$0xff] %v4900_v6  ;;  %v573_v47 = vmul.f32 0.0026041667, %v377_v8 }
 0x122   :  { %7218 = vst [vmem:[#allocation107_spill] sm:$0xff] %v4880_v54  ;;  %v462_v50 = vadd.f32 %v195_v31, %v194_v33  ;;  %v904_v4 = vmul.f32 %v4880_v54, %v4880_v54  ;;  %v4906_v31 = vsub.f32 %v3849_v51, %v569_v13  ;;  %v570_v33 = vmul.f32 0.0026041667, %v365_v30  ;;  %v198_v30 = vld [vmem:[#allocation2 + $0x500] sm:$0xff] }
 0x123   :  { %7216 = vst [vmem:[#allocation105_spill] sm:$0xff] %v4874_v25  ;;  %1129 = vadd.xlane.f32.xlu0 %v1128_v22  ;;  %v1135_v22 = vadd.f32 %v898_v40, %v897_v17  ;;  %v901_v55 = vmul.f32 %v4874_v25, %v4874_v25  ;;  %v571_v17 = vmul.f32 0.0026041667, %v369_v21  ;;  %v373_v40 = vpop.xlane.xlu1 %372  ;;  %v3850_v21 = vld [vmem:[#allocation2 + $0x258] sm:$0xff] }
 0x124   :  { %444 = vadd.xlane.f32.xlu1 %v443_v46  ;;  %v4889_v46 = vsub.f32 %v3845_v38, %v566_v29  ;;  %v3847_v29 = vld [vmem:[#allocation2 + $0x270] sm:$0xff]  ;;  %7223 = vst [vmem:[#allocation112_spill] sm:$0xff] %v4906_v31  ;;  %v4908_v41 = vsub.f32 %v3850_v21, %v568_v23  ;;  %v197_v21 = vld [vmem:[#allocation2 + $0x4f8] sm:$0xff]  ;;  %v385_v8 = vpop.xlane.xlu0 %384 }
 0x125   :  { %v4898_v48 = vsub.f32 %v3847_v29, %v569_v13  ;;  %v196_v38 = vld [vmem:[#allocation2 + $0x4f0] sm:$0xff]  ;;  %v3852_v29 = vld [vmem:[#allocation2 + $0x268] sm:$0xff]  ;;  %v1139_v10 = vadd.f32 %v901_v55, %v900_v19  ;;  %v572_v19 = vmul.f32 0.0026041667, %v373_v40  ;;  %v1769_v40 = vlaneseq }
 0x126   :  { %7219 = vst [vmem:[#allocation108_spill] sm:$0xff] %v4889_v46  ;;  %7224 = vst [vmem:[#allocation113_spill] sm:$0xff] %v4908_v41  ;;  %v4912_v12 = vsub.f32 %v3852_v29, %v568_v23  ;;  %v902_v37 = vmul.f32 %v4889_v46, %v4889_v46  ;;  %v463_v54 = vadd.f32 %v462_v50, %v196_v38  ;;  %v3854_v13 = vld [vmem:[#allocation2 + $0x2a8] sm:$0xff]  ;;  %v3857_v50 = vld [vmem:[#allocation2 + $0x290] sm:$0xff] }
 0x127   :  { %448 = vadd.xlane.f32.xlu0 %v447_v35  ;;  %7221 = vst [vmem:[#allocation110_spill] sm:$0xff] %v4898_v48  ;;  %v1136_v35 = vadd.f32 %v1135_v22, %v899_v61  ;;  %v3853_v61 = vld [vmem:[#allocation2 + $0x2a0] sm:$0xff]  ;;  %v4918_v51 = vsub.f32 %v3854_v13, %v571_v17  ;;  %v1143_v29 = vadd.f32 %v904_v4, %v903_v56  ;;  %v4956_v18 = vshrl.u32 %v1769_v40, 7 }
 0x128   :  { %1133 = vadd.xlane.f32.xlu1 %v1132_v15  ;;  %v3851_v15 = vld [vmem:[#allocation2 + $0x260] sm:$0xff]  ;;  %7226 = vst [vmem:[#allocation115_spill] sm:$0xff] %v4912_v12  ;;  %v4916_v22 = vsub.f32 %v3853_v61, %v571_v17  ;;  %v4926_v38 = vsub.f32 %v3857_v50, %v570_v33  ;;  %v909_v61 = vmul.f32 %v4898_v48, %v4898_v48  ;;  %v199_v50 = vld [vmem:[#allocation2 + $0x508] sm:$0xff]  ;;  %v3859_v48 = vld [vmem:[#allocation2 + $0x2d0] sm:$0xff] }
 0x129   :  { %v4910_v14 = vsub.f32 %v3851_v15, %v568_v23  ;;  %7228 = vst [vmem:[#allocation117_spill] sm:$0xff] %v4918_v51  ;;  %v3855_v15 = vld [vmem:[#allocation2 + $0x2b0] sm:$0xff]  ;;  %v905_v23 = vmul.f32 %v4896_v43, %v4896_v43  ;;  %v1140_v13 = vadd.f32 %v1139_v10, %v902_v37  ;;  %v466_v56 = vadd.f32 %v198_v30, %v197_v21  ;;  %v3861_v10 = vld [vmem:[#allocation2 + $0x2b8] sm:$0xff]  ;;  %v3862_v30 = vld [vmem:[#allocation2 + $0x2c0] sm:$0xff] }
 0x12a   :  { %7227 = vst [vmem:[#allocation116_spill] sm:$0xff] %v4916_v22  ;;  %v4920_v25 = vsub.f32 %v3855_v15, %v571_v17  ;;  %7231 = vst [vmem:[#allocation120_spill] sm:$0xff] %v4926_v38  ;;  %v381_v17 = vpop.xlane.xlu1 %380  ;;  %v3858_v15 = vld [vmem:[#allocation2 + $0x298] sm:$0xff]  ;;  %v915_v4 = vmul.f32 %v4916_v22, %v4916_v22  ;;  %v4938_v43 = vsub.f32 %v3859_v48, %v573_v47 }
 0x12b   :  { %7225 = vst [vmem:[#allocation114_spill] sm:$0xff] %v4910_v14  ;;  %456 = vadd.xlane.f32.xlu0 %v455_v5  ;;  %v3856_v5 = vld [vmem:[#allocation2 + $0x288] sm:$0xff]  ;;  %v4932_v46 = vsub.f32 %v3858_v15, %v570_v33  ;;  %v1144_v37 = vadd.f32 %v1143_v29, %v905_v23  ;;  %v907_v21 = vmul.f32 %v4910_v14, %v4910_v14  ;;  %v3875_v14 = vld [vmem:[#allocation2 + $0x340] sm:$0xff] }
 0x12c   :  { %452 = vadd.xlane.f32.xlu1 %v451_v57  ;;  %7229 = vst [vmem:[#allocation118_spill] sm:$0xff] %v4920_v25  ;;  %v4924_v55 = vsub.f32 %v3856_v5, %v570_v33  ;;  %v910_v57 = vmul.f32 %v4900_v6, %v4900_v6  ;;  %v916_v5 = vmul.f32 %v4918_v51, %v4918_v51  ;;  %7233 = vst [vmem:[#allocation122_spill] sm:$0xff] %v4938_v43  ;;  %v3860_v6 = vld [vmem:[#allocation2 + $0x2d8] sm:$0xff]  ;;  %v3864_v29 = vld [vmem:[#allocation2 + $0x2c8] sm:$0xff] }
 0x12d   :  { %7232 = vst [vmem:[#allocation121_spill] sm:$0xff] %v4932_v46  ;;  %v4940_v3 = vsub.f32 %v3860_v6, %v573_v47  ;;  %v4942_v33 = vsub.f32 %v3861_v10, %v572_v19  ;;  %v4948_v15 = vsub.f32 %v3862_v30, %v572_v19  ;;  %v911_v48 = vmul.f32 %v4906_v31, %v4906_v31 }
 0x12e   :  { %7230 = vst [vmem:[#allocation119_spill] sm:$0xff] %v4924_v55  ;;  %v1151_v22 = vadd.f32 %v910_v57, %v909_v61  ;;  %v575_v6 = vmul.f32 0.0026041667, %v385_v8  ;;  %v467_v51 = vadd.f32 %v466_v56, %v199_v50  ;;  %v4954_v10 = vsub.f32 %v3864_v29, %v572_v19  ;;  %v393_v8 = vpop.xlane.xlu0 %392  ;;  %v389_v56 = vpop.xlane.xlu1 %388  ;;  %v3865_v29 = vld [vmem:[#allocation2 + $0x300] sm:$0xff] }
 0x12f   :  { %1137 = vadd.xlane.f32.xlu0 %v1136_v35  ;;  %7234 = vst [vmem:[#allocation123_spill] sm:$0xff] %v4940_v3  ;;  %7235 = vst [vmem:[#allocation124_spill] sm:$0xff] %v4942_v33  ;;  %v906_v35 = vmul.f32 %v4908_v41, %v4908_v41  ;;  %v921_v41 = vmul.f32 %v4938_v43, %v4938_v43  ;;  %v922_v30 = vmul.f32 %v4940_v3, %v4940_v3 }
 0x130   :  { %460 = vadd.xlane.f32.xlu1 %v459_v44  ;;  %7236 = vst [vmem:[#allocation125_spill] sm:$0xff] %v4948_v15  ;;  %v3863_v44 = vld [vmem:[#allocation2 + $0x2e0] sm:$0xff]  ;;  %v908_v61 = vmul.f32 %v4912_v12, %v4912_v12  ;;  %v574_v57 = vmul.f32 0.0026041667, %v381_v17  ;;  %v913_v40 = vmul.f32 %v4926_v38, %v4926_v38  ;;  %v919_v50 = vmul.f32 %v4948_v15, %v4948_v15  ;;  %v3866_v17 = vld [vmem:[#allocation2 + $0x308] sm:$0xff] }
 0x131   :  { %v4952_v23 = vsub.f32 %v3863_v44, %v573_v47  ;;  %v918_v47 = vmul.f32 %v4942_v33, %v4942_v33  ;;  %v1147_v19 = vadd.f32 %v907_v21, %v906_v35  ;;  %v1152_v44 = vadd.f32 %v1151_v22, %v911_v48  ;;  %v3867_v22 = vld [vmem:[#allocation2 + $0x310] sm:$0xff] }
 0x132   :  { %v4972_v43 = vsub.f32 %v3865_v29, %v575_v6  ;;  %v4974_v3 = vsub.f32 %v3866_v17, %v575_v6  ;;  %v917_v35 = vmul.f32 %v4920_v25, %v4920_v25  ;;  %v577_v21 = vmul.f32 0.0026041667, %v393_v8  ;;  %v3868_v29 = vld [vmem:[#allocation2 + $0x2e8] sm:$0xff]  ;;  %v3869_v17 = vld [vmem:[#allocation2 + $0x2f0] sm:$0xff] }
 0x133   :  { %7237 = vst [vmem:[#allocation126_spill] sm:$0xff] %v4952_v23  ;;  %464 = vadd.xlane.f32.xlu0 %v463_v54  ;;  %v912_v54 = vmul.f32 %v4924_v55, %v4924_v55  ;;  %v576_v33 = vmul.f32 0.0026041667, %v389_v56  ;;  %v1779_v31 = vsub.s32 2, %v4956_v18  ;;  %v4984_v48 = vsub.f32 %v3867_v22, %v575_v6  ;;  %v3870_v22 = vld [vmem:[#allocation2 + $0x2f8] sm:$0xff] }
 0x134   :  { %1141 = vadd.xlane.f32.xlu1 %v1140_v13  ;;  %7238 = vst [vmem:[#allocation127_spill] sm:$0xff] %v4972_v43  ;;  %7239 = vst [vmem:[#allocation128_spill] sm:$0xff] %v4974_v3  ;;  %v4979_v13 = vld [vmem:[%s6854_s4] sm:$0x7]  ;;  %v4986_v15 = vsub.f32 %v3868_v29, %v574_v57  ;;  %v4988_v55 = vsub.f32 %v3869_v17, %v574_v57  ;;  %v1159_v38 = vadd.f32 %v916_v5, %v915_v4  ;;  %v397_v4 = vpop.xlane.xlu1 %396  ;;  %v3871_v5 = vld [vmem:[#allocation2 + $0x330] sm:$0xff] }
 0x135   :  { %v1148_v12 = vadd.f32 %v1147_v19, %v908_v61  ;;  %v914_v25 = vmul.f32 %v4932_v46, %v4932_v46  ;;  %v1155_v8 = vadd.f32 %v913_v40, %v912_v54  ;;  %v4993_v56 = vrot.slane %v4979_v13, %v1779_v31  ;;  %v3872_v19 = vld [vmem:[#allocation2 + $0x338] sm:$0xff] }
 0x136   :  { %7240 = vst [vmem:[#allocation129_spill] sm:$0xff] %v4986_v15  ;;  %v928_v6 = vmul.f32 %v4974_v3, %v4974_v3  ;;  %v4999_v29 = vsub.f32 %v3870_v22, %v574_v57  ;;  %v5003_v61 = vsub.f32 %v3871_v5, %v577_v21  ;;  %v5005_v54 = vsub.f32 %v3872_v19, %v577_v21  ;;  %v3873_v40 = vld [vmem:[#allocation2 + $0x318] sm:$0xff]  ;;  %v5012_v3 = vld [vmem:[%s6855_s5] sm:$0x7] }
 0x137   :  { %1145 = vadd.xlane.f32.xlu0 %v1144_v37  ;;  %7241 = vst [vmem:[#allocation130_spill] sm:$0xff] %v4993_v56  ;;  %v927_v37 = vmul.f32 %v4972_v43, %v4972_v43  ;;  %v5007_v17 = vsub.f32 %v3873_v40, %v576_v33  ;;  %v1167_v43 = vadd.f32 %v922_v30, %v921_v41  ;;  %v578_v46 = vmul.f32 0.0026041667, %v397_v4  ;;  %v3878_v4 = vld [vmem:[#allocation2 + $0x350] sm:$0xff] }
 0x138   :  { %468 = vadd.xlane.f32.xlu1 %v467_v51  ;;  %v923_v51 = vmul.f32 %v4952_v23, %v4952_v23  ;;  %7242 = vst [vmem:[#allocation131_spill] sm:$0xff] %v5003_v61  ;;  %7243 = vst [vmem:[#allocation132_spill] sm:$0xff] %v5005_v54  ;;  %v924_v57 = vmul.f32 %v4986_v15, %v4986_v15  ;;  %v925_v22 = vmul.f32 %v4988_v55, %v4988_v55  ;;  %v3874_v23 = vld [vmem:[#allocation2 + $0x320] sm:$0xff] }
 0x139   :  { %7244 = vst [vmem:[#allocation133_spill] sm:$0xff] %v5007_v17  ;;  %v1160_v5 = vadd.f32 %v1159_v38, %v917_v35  ;;  %v920_v19 = vmul.f32 %v4954_v10, %v4954_v10  ;;  %v1156_v40 = vadd.f32 %v1155_v8, %v914_v25  ;;  %v5020_v41 = vsub.f32 %v3874_v23, %v576_v33 }
 0x13a   :  { %v1163_v30 = vadd.f32 %v919_v50, %v918_v47  ;;  %v5022_v56 = vsub.f32 %v3875_v14, %v577_v21  ;;  %v5027_v15 = vrot.slane %v5012_v3, %v1779_v31  ;;  %v933_v38 = vmul.f32 %v5003_v61, %v5003_v61  ;;  %v3877_v21 = vld [vmem:[#allocation2 + $0x348] sm:$0xff] }
 0x13b   :  { %1153 = vadd.xlane.f32.xlu0 %v1152_v44  ;;  %7245 = vst [vmem:[#allocation134_spill] sm:$0xff] %v5020_v41  ;;  %v3876_v44 = vld [vmem:[#allocation2 + $0x328] sm:$0xff]  ;;  %v934_v25 = vmul.f32 %v5005_v54, %v5005_v54  ;;  %v1168_v23 = vadd.f32 %v1167_v43, %v923_v51  ;;  %v929_v14 = vmul.f32 %v4984_v48, %v4984_v48  ;;  %v3879_v43 = vld [vmem:[#allocation2 + $0x358] sm:$0xff] }
 0x13c   :  { %1149 = vadd.xlane.f32.xlu1 %v1148_v12  ;;  %v5024_v27 = vsub.f32 %v3876_v44, %v576_v33  ;;  %v930_v12 = vmul.f32 %v5007_v17, %v5007_v17  ;;  %v1175_v47 = vadd.f32 %v928_v6, %v927_v37  ;;  %v926_v33 = vmul.f32 %v4999_v29, %v4999_v29  ;;  %v3903_v17 = vld [vmem:[#allocation2 + $0x418] sm:$0xff] }
 0x13d   :  { %v1171_v31 = vadd.f32 %v925_v22, %v924_v57  ;;  %v931_v50 = vmul.f32 %v5020_v41, %v5020_v41  ;;  %v1164_v35 = vadd.f32 %v1163_v30, %v920_v19  ;;  %v5041_v8 = vsub.f32 %v3877_v21, %v578_v46 }
 0x13e   :  { %v5043_v44 = vsub.f32 %v3878_v4, %v578_v46  ;;  %v5045_v51 = vsub.f32 %v3879_v43, %v578_v46  ;;  %v1176_v37 = vadd.f32 %v1175_v47, %v929_v14  ;;  %v935_v57 = vmul.f32 %v5022_v56, %v5022_v56  ;;  %v1266_v46 = vpop.xlane.xlu0 %1265 }
 0x13f   :  { %1161 = vadd.xlane.f32.xlu0 %v1160_v5  ;;  %7246 = vst [vmem:[#allocation135_spill] sm:$0xff] %v5041_v8  ;;  %v1172_v6 = vadd.f32 %v1171_v31, %v926_v33  ;;  %v1183_v22 = vadd.f32 %v934_v25, %v933_v38  ;;  %v936_v5 = vmul.f32 %v5041_v8, %v5041_v8  ;;  %v1389_v21 = vmul.f32 0.0026041667, %v1266_v46  ;;  %v7305_v8 = vld [vmem:[#allocation52_spill] sm:$0xff] }
 0x140   :  { %1157 = vadd.xlane.f32.xlu1 %v1156_v40  ;;  %7247 = vst [vmem:[#allocation136_spill] sm:$0xff] %v5043_v44  ;;  %7248 = vst [vmem:[#allocation137_spill] sm:$0xff] %v5045_v51  ;;  %v937_v19 = vmul.f32 %v5043_v44, %v5043_v44  ;;  %v932_v40 = vmul.f32 %v5024_v27, %v5024_v27  ;;  %v1179_v30 = vadd.f32 %v931_v50, %v930_v12  ;;  %v7328_v44 = vld [vmem:[#allocation69_spill] sm:$0xff] }
 0x141   :  { %v1461_v14 = vadd.f32 1e-05, %v1389_v21  ;;  %v938_v38 = vmul.f32 %v5045_v51, %v5045_v51  ;;  %v1270_v31 = vpop.xlane.xlu1 %1269 }
 0x142   :  { %v1180_v47 = vadd.f32 %v1179_v30, %v932_v40  ;;  %v1187_v25 = vadd.f32 %v937_v19, %v936_v5  ;;  %v1050_v33 = vpop.xlane.xlu0 %1049  ;;  %v1390_v4 = vmul.f32 0.0026041667, %v1270_v31  ;;  %v1771_v5 = vsub.s32 0, %v4956_v18 }
 0x143   :  { %1169 = vadd.xlane.f32.xlu0 %v1168_v23  ;;  %v1184_v23 = vadd.f32 %v1183_v22, %v935_v57  ;;  %3629 = vrsqrt.f32 %v1461_v14  ;;  %v1775_v22 = vsub.s32 1, %v4956_v18 }
 0x144   :  { %1165 = vadd.xlane.f32.xlu1 %v1164_v35  ;;  %v1335_v35 = vmul.f32 0.0026041667, %v1050_v33  ;;  %v1462_v61 = vadd.f32 1e-05, %v1390_v4  ;;  %v1188_v12 = vadd.f32 %v1187_v25, %v938_v38 }
 0x145   :  { %v5060_v14 = vrot.slane %v4979_v13, %v1775_v22  ;;  %v5068_v18 = vrot.slane %v5012_v3, %v1775_v22 }
 0x146   :  { %v1407_v43 = vadd.f32 1e-05, %v1335_v35  ;;  %v1274_v50 = vpop.xlane.xlu0 %1273  ;;  %v5075_v35 = vrot.slane %v5012_v3, %v1771_v5 }
 0x147   :  { %1177 = vadd.xlane.f32.xlu0 %v1176_v37  ;;  %v1054_v37 = vpop.xlane.xlu1 %1053  ;;  %v1391_v57 = vmul.f32 0.0026041667, %v1274_v50 }
 0x148   :  { %1173 = vadd.xlane.f32.xlu1 %v1172_v6  ;;  %3631 = vrsqrt.f32 %v1407_v43  ;;  %v1336_v6 = vmul.f32 0.0026041667, %v1054_v37 }
 0x149   :  { %3633 = vrsqrt.f32 %v1462_v61  ;;  %v1463_v19 = vadd.f32 1e-05, %v1391_v57 }
 0x14a   :  { %v1408_v40 = vadd.f32 1e-05, %v1336_v6  ;;  %v1058_v30 = vpop.xlane.xlu0 %1057 }
 0x14b   :  { %1185 = vadd.xlane.f32.xlu0 %v1184_v23  ;;  %3635 = vrsqrt.f32 %v1463_v19  ;;  %v1337_v46 = vmul.f32 0.0026041667, %v1058_v30  ;;  %v1278_v21 = vpop.xlane.xlu1 %1277 }
 0x14c   :  { %1181 = vadd.xlane.f32.xlu1 %v1180_v47  ;;  %3637 = vrsqrt.f32 %v1408_v40  ;;  %v1392_v23 = vmul.f32 0.0026041667, %v1278_v21  ;;  %v5063_v47 = vrot.slane %v4979_v13, %v1771_v5 }
 0x14d   :  { %v5065_v61 = vpop.eup %3629  ;;  %v1409_v38 = vadd.f32 1e-05, %v1337_v46 }
 0x14e   :  { %7249 = vst [vmem:[#allocation138_spill] sm:$0xff] %v5065_v61  ;;  %v1464_v25 = vadd.f32 1e-05, %v1392_v23  ;;  %v1714_v33 = vmul.f32 %v5065_v61, %v4188_v58  ;;  %v1713_v31 = vmul.f32 %v5065_v61, %v4185_v52 }
 0x14f   :  { %v1282_v4 = vpop.xlane.xlu0 %1281 }
 0x150   :  { %1189 = vadd.xlane.f32.xlu1 %v1188_v12  ;;  %3639 = vrsqrt.f32 %v1464_v25  ;;  %v1393_v13 = vmul.f32 0.0026041667, %v1282_v4  ;;  %v1947_v43 = vmul.f32 %v5060_v14, %v1714_v33  ;;  %v1946_v12 = vmul.f32 %v5063_v47, %v1713_v31 }
 0x151   :  { %3641 = vrsqrt.f32 %v1409_v38  ;;  %v1062_v37 = vpop.xlane.xlu1 %1061 }
 0x152   :  { %v3632_v50 = vpop.eup %3631  ;;  %v1465_v6 = vadd.f32 1e-05, %v1393_v13  ;;  %v1338_v58 = vmul.f32 0.0026041667, %v1062_v37  ;;  %v2180_v22 = vadd.f32 %v5068_v18, %v1947_v43  ;;  %v2179_v52 = vadd.f32 %v5075_v35, %v1946_v12 }
 0x153   :  { %v5079_v57 = vpop.eup %3633  ;;  %v1066_v3 = vpop.xlane.xlu0 %1065  ;;  %v1552_v40 = vmul.f32 %v3632_v50, %v4199_v63  ;;  %v1551_v30 = vmul.f32 %v3632_v50, %v4196_v11  ;;  %v5090_v23 = vmul.f32 %v3632_v50, %v4202_v0 }
 0x154   :  { %7250 = vst [vmem:[#allocation139_spill] sm:$0xff] %v5079_v57  ;;  %v1717_v5 = vmul.f32 %v5079_v57, %v4223_v24  ;;  %v1716_v19 = vmul.f32 %v5079_v57, %v4220_v7  ;;  %3643 = vrsqrt.f32 %v1465_v6  ;;  %v1410_v46 = vadd.f32 1e-05, %v1338_v58  ;;  %v3889_v57 = vld [vmem:[#allocation2 + $0x3a8] sm:$0xff] }
 0x155   :  { %v1339_v21 = vmul.f32 0.0026041667, %v1066_v3  ;;  %v5092_v38 = vpop.eup %3635  ;;  %v1785_v24 = vmul.f32 %v5060_v14, %v1552_v40  ;;  %v1784_v7 = vmul.f32 %v5063_v47, %v1551_v30 }
 0x156   :  { %7251 = vst [vmem:[#allocation140_spill] sm:$0xff] %v5092_v38  ;;  %v1950_v25 = vmul.f32 %v5060_v14, %v1717_v5  ;;  %v1949_v33 = vmul.f32 %v5063_v47, %v1716_v19  ;;  %v5098_v31 = vpop.eup %3637  ;;  %3645 = vrsqrt.f32 %v1410_v46  ;;  %v1720_v4 = vmul.f32 %v5092_v38, %v4254_v49 }
 0x157   :  { %v1411_v11 = vadd.f32 1e-05, %v1339_v21  ;;  %v1286_v63 = vpop.xlane.xlu1 %1285  ;;  %v1719_v0 = vmul.f32 %v5092_v38, %v4251_v16  ;;  %v1555_v50 = vmul.f32 %v5098_v31, %v4233_v42  ;;  %v2018_v6 = vadd.f32 %v5068_v18, %v1785_v24 }
 0x158   :  { %v1394_v13 = vmul.f32 0.0026041667, %v1286_v63  ;;  %v2183_v43 = vadd.f32 %v5068_v18, %v1950_v25  ;;  %v2182_v12 = vadd.f32 %v5075_v35, %v1949_v33  ;;  %v1554_v58 = vmul.f32 %v5098_v31, %v4230_v59  ;;  %v3622_v59 = vld [vmem:[%s6851_s1 + $0x88] sm:$0xff]  }
 0x159   :  { %3647 = vrsqrt.f32 %v1411_v11  ;;  %v1290_v37 = vpop.xlane.xlu0 %1289  ;;  %v2017_v49 = vadd.f32 %v5075_v35, %v1784_v7  ;;  %v1788_v30 = vmul.f32 %v5060_v14, %v1555_v50  ;;  %v1953_v42 = vmul.f32 %v5060_v14, %v1720_v4 }
 0x15a   :  { %v1466_v3 = vadd.f32 1e-05, %v1394_v13  ;;  %v1395_v5 = vmul.f32 0.0026041667, %v1290_v37  ;;  %v2315_v16 = vpack.c.bf16 %v2183_v43, %v2180_v22  ;;  %v2314_v19 = vpack.c.bf16 %v2182_v12, %v2179_v52  ;;  %v5112_v40 = vpop.eup %3639 }
 0x15b   :  { %7252 = vst [vmem:[#allocation141_spill] sm:$0xff] %v5112_v40  ;;  %v1787_v46 = vmul.f32 %v5063_v47, %v1554_v58  ;;  %v1952_v21 = vmul.f32 %v5063_v47, %v1719_v0  ;;  %v5121_v25 = vpop.eup %3641  ;;  %v1723_v52 = vmul.f32 %v5112_v40, %v4263_v1  ;;  %v1722_v24 = vmul.f32 %v5112_v40, %v4260_v53  ;;  %v7297_v40 = vld [vmem:[#allocation46_spill] sm:$0xff] }
 0x15c   :  { %3649 = vrsqrt.f32 %v1466_v3  ;;  %v1467_v33 = vadd.f32 1e-05, %v1395_v5  ;;  %v1070_v22 = vpop.xlane.xlu1 %1069  ;;  %2781 = vmatprep.mubr.bf16.mxu1 %v2315_v16  ;;  %v2021_v11 = vadd.f32 %v5068_v18, %v1788_v30  ;;  %v2186_v4 = vadd.f32 %v5068_v18, %v1953_v42 }
 0x15d   :  { %v1340_v7 = vmul.f32 0.0026041667, %v1070_v22  ;;  %2782 = vmatmul.mubr.bf16.vlgmr.msra.gmra.mrb[0].mxu1 %v2314_v19  ;;  %v2020_v63 = vadd.f32 %v5075_v35, %v1787_v46  ;;  %v1956_v13 = vmul.f32 %v5060_v14, %v1723_v52  ;;  %v1955_v43 = vmul.f32 %v5063_v47, %v1722_v24 }
 0x15e   :  { %3651 = vrsqrt.f32 %v1467_v33  ;;  %v2185_v12 = vadd.f32 %v5075_v35, %v1952_v21  ;;  %3482 = vmatpush3.bf16.msra.mxu1 %v4885_v28  ;;  %v5134_v1 = vpop.eup %3643  ;;  %v2234_v37 = vpack.c.bf16 %v2021_v11, %v2018_v6  ;;  %v1558_v19 = vmul.f32 %v5121_v25, %v4287_v32  ;;  %v3623_v28 = vld [vmem:[%s6851_s1 + $0x90] sm:$0xff]  }
 0x15f   :  { %v1074_v0 = vpop.xlane.xlu0 %1073  ;;  %7253 = vst [vmem:[#allocation142_spill] sm:$0xff] %v5134_v1  ;;  %v1412_v53 = vadd.f32 1e-05, %v1340_v7  ;;  %v2233_v58 = vpack.c.bf16 %v2020_v63, %v2017_v49  ;;  %3483 = vmatprep.subr.bf16.mxu1 %v3622_v59  ;;  %v2189_v5 = vadd.f32 %v5068_v18, %v1956_v13  ;;  %v2188_v16 = vadd.f32 %v5075_v35, %v1955_v43 }
 0x160   :  { %v1341_v50 = vmul.f32 0.0026041667, %v1074_v0  ;;  %v1557_v30 = vmul.f32 %v5121_v25, %v4284_v26  ;;  %v5145_v46 = vpop.eup %3645  ;;  %2565 = vmatprep.mubr.bf16.mxu0 %v2234_v37  ;;  %v1726_v42 = vmul.f32 %v5134_v1, %v4317_v20  ;;  %v1791_v26 = vmul.f32 %v5060_v14, %v1558_v19  ;;  %v3624_v0 = vld [vmem:[%s6851_s1 + $0x98] sm:$0xff]  }
 0x161   :  { %v1294_v3 = vpop.xlane.xlu1 %1293  ;;  %3653 = vrsqrt.f32 %v1412_v53  ;;  %2566 = vmatmul.mubr.bf16.vlgmr.msra.gmra.mrb[0].mxu0 %v2233_v58  ;;  %v2318_v21 = vpack.c.bf16 %v2189_v5, %v2186_v4  ;;  %v2317_v33 = vpack.c.bf16 %v2188_v16, %v2185_v12  ;;  %v1561_v32 = vmul.f32 %v5145_v46, %v4293_v9 }
 0x162   :  { %v1413_v6 = vadd.f32 1e-05, %v1341_v50  ;;  %v1396_v49 = vmul.f32 0.0026041667, %v1294_v3  ;;  %v1560_v7 = vmul.f32 %v5145_v46, %v4290_v36  ;;  %v1790_v11 = vmul.f32 %v5063_v47, %v1557_v30  ;;  %3484 = vmatpush3.bf16.msra.mxu1 %v3622_v59 }
 0x163   :  { %v5152_v22 = vpop.eup %3647  ;;  %2789 = vmatprep.mubr.bf16.mxu1 %v2318_v21  ;;  %v1794_v63 = vmul.f32 %v5060_v14, %v1561_v32  ;;  %v2024_v4 = vadd.f32 %v5068_v18, %v1791_v26  ;;  %v1959_v9 = vmul.f32 %v5060_v14, %v1726_v42  ;;  %3485 = vmatprep.subr.bf16.mxu1 %v3623_v28 }
 0x164   :  { %3655 = vrsqrt.f32 %v1413_v6  ;;  %v1468_v52 = vadd.f32 1e-05, %v1396_v49  ;;  %v1793_v36 = vmul.f32 %v5063_v47, %v1560_v7  ;;  %v2023_v59 = vadd.f32 %v5075_v35, %v1790_v11 }
 0x165   :  { %v1298_v24 = vpop.xlane.xlu0 %1297  ;;  %2790 = vmatmul.mubr.bf16.gmra.mrb[4].mxu1 %v2317_v33  ;;  %v1725_v43 = vmul.f32 %v5134_v1, %v4314_v34  ;;  %v2027_v37 = vadd.f32 %v5068_v18, %v1794_v63  ;;  %v2192_v58 = vadd.f32 %v5068_v18, %v1959_v9  ;;  %v1564_v42 = vmul.f32 %v5152_v22, %v4348_v45 }
 0x166   :  { %v1397_v20 = vmul.f32 0.0026041667, %v1298_v24  ;;  %3657 = vrsqrt.f32 %v1468_v52  ;;  %v5167_v12 = vpop.eup %3649  ;;  %v2026_v3 = vadd.f32 %v5075_v35, %v1793_v36  ;;  %3486 = vmatpush3.bf16.msra.mxu1 %v3623_v28  ;;  %v1563_v45 = vmul.f32 %v5152_v22, %v4345_v60  ;;  %v7256_v36 = vld [vmem:[#allocation33_spill] sm:$0xff] }
 0x167   :  { %v1078_v13 = vpop.xlane.xlu1 %1077  ;;  %7254 = vst [vmem:[#allocation143_spill] sm:$0xff] %v5167_v12  ;;  %v1729_v5 = vmul.f32 %v5167_v12, %v4323_v62  ;;  %v1728_v16 = vmul.f32 %v5167_v12, %v4320_v2  ;;  %v1958_v19 = vmul.f32 %v5063_v47, %v1725_v43  ;;  %v2237_v49 = vpack.c.bf16 %v2027_v37, %v2024_v4  ;;  %v3625_v62 = vld [vmem:[%s6851_s1 + $0xa0] sm:$0xff]   ;;  %v3626_v43 = vld [vmem:[%s6851_s1 + $0xa8] sm:$0xff]  }
 0x168   :  { %v1469_v53 = vadd.f32 1e-05, %v1397_v20  ;;  %v1342_v50 = vmul.f32 0.0026041667, %v1078_v13  ;;  %v5177_v34 = vpop.eup %3651  ;;  %3487 = vmatprep.subr.bf16.mxu1 %v3624_v0  ;;  %v2236_v33 = vpack.c.bf16 %v2026_v3, %v2023_v59  ;;  %v1797_v52 = vmul.f32 %v5060_v14, %v1564_v42 }
 0x169   :  { %7255 = vst [vmem:[#allocation144_spill] sm:$0xff] %v5177_v34  ;;  %v1962_v2 = vmul.f32 %v5060_v14, %v1729_v5  ;;  %v1961_v28 = vmul.f32 %v5063_v47, %v1728_v16  ;;  %2573 = vmatprep.mubr.bf16.mxu0 %v2237_v49  ;;  %v2191_v26 = vadd.f32 %v5075_v35, %v1958_v19  ;;  %v7258_v49 = vld [vmem:[#allocation6_spill] sm:$0xff] }
 0x16a   :  { %3659 = vrsqrt.f32 %v1469_v53  ;;  %v1414_v30 = vadd.f32 1e-05, %v1342_v50  ;;  %v1082_v6 = vpop.xlane.xlu0 %1081  ;;  %2574 = vmatmul.mubr.bf16.gmra.mrb[4].mxu0 %v2236_v33  ;;  %3488 = vmatpush3.bf16.msra.mxu1 %v3624_v0  ;;  %v2030_v13 = vadd.f32 %v5068_v18, %v1797_v52  ;;  %v1796_v60 = vmul.f32 %v5063_v47, %v1563_v45  ;;  %v3627_v52 = vld [vmem:[%s6851_s1 + $0xb0] sm:$0xff]  }
 0x16b   :  { %v1343_v21 = vmul.f32 0.0026041667, %v1082_v6  ;;  %v5190_v24 = vpop.eup %3653  ;;  %v2195_v20 = vadd.f32 %v5068_v18, %v1962_v2  ;;  %v2194_v63 = vadd.f32 %v5075_v35, %v1961_v28  ;;  %3489 = vmatprep.subr.bf16.mxu1 %v3625_v62  ;;  %v1732_v42 = vmul.f32 %v5177_v34, %v7258_v49 }
 0x16c   :  { %3661 = vrsqrt.f32 %v1414_v30  ;;  %v1567_v9 = vmul.f32 %v5190_v24, %v4360_v39  ;;  %v1566_v59 = vmul.f32 %v5190_v24, %v7256_v36  ;;  %v2029_v16 = vadd.f32 %v5075_v35, %v1796_v60 }
 0x16d   :  { %v1302_v32 = vpop.xlane.xlu1 %1301  ;;  %v1415_v7 = vadd.f32 1e-05, %v1343_v21  ;;  %v2321_v37 = vpack.c.bf16 %v2195_v20, %v2192_v58  ;;  %v2320_v3 = vpack.c.bf16 %v2194_v63, %v2191_v26  ;;  %v7259_v21 = vld [vmem:[#allocation35_spill] sm:$0xff] }
 0x16e   :  { %v1398_v11 = vmul.f32 0.0026041667, %v1302_v32  ;;  %v5203_v53 = vpop.eup %3655  ;;  %v1800_v39 = vmul.f32 %v5060_v14, %v1567_v9  ;;  %v1799_v5 = vmul.f32 %v5063_v47, %v1566_v59  ;;  %v1731_v33 = vmul.f32 %v5177_v34, %v7259_v21  ;;  %3490 = vmatpush3.bf16.msra.mxu1 %v3625_v62  ;;  %v7260_v32 = vld [vmem:[#allocation9_spill] sm:$0xff]  ;;  %v7264_v21 = vld [vmem:[#allocation14_spill] sm:$0xff] }
 0x16f   :  { %v1306_v4 = vpop.xlane.xlu0 %1305  ;;  %3663 = vrsqrt.f32 %v1415_v7  ;;  %2797 = vmatprep.mubr.bf16.mxu1 %v2321_v37  ;;  %3491 = vmatprep.subr.bf16.mxu1 %v3626_v43  ;;  %v1965_v7 = vmul.f32 %v5060_v14, %v1732_v42 }
 0x170   :  { %v1470_v0 = vadd.f32 1e-05, %v1398_v11  ;;  %v1399_v50 = vmul.f32 0.0026041667, %v1306_v4  ;;  %v5208_v19 = vpop.eup %3657  ;;  %2798 = vmatmul.mubr.bf16.gmra.mrb[8].mxu1 %v2320_v3  ;;  %v2033_v2 = vadd.f32 %v5068_v18, %v1800_v39  ;;  %v2032_v28 = vadd.f32 %v5075_v35, %v1799_v5  ;;  %v7261_v11 = vld [vmem:[#allocation8_spill] sm:$0xff] }
 0x171   :  { %7257 = vst [vmem:[#allocation33_spill] sm:$0xff] %v5208_v19  ;;  %v1735_v26 = vmul.f32 %v5208_v19, %v7260_v32  ;;  %v1734_v62 = vmul.f32 %v5208_v19, %v7261_v11  ;;  %v1964_v20 = vmul.f32 %v5063_v47, %v1731_v33 }
 0x172   :  { %3665 = vrsqrt.f32 %v1470_v0  ;;  %v1471_v30 = vadd.f32 1e-05, %v1399_v50  ;;  %v2240_v36 = vpack.c.bf16 %v2033_v2, %v2030_v13  ;;  %v2239_v59 = vpack.c.bf16 %v2032_v28, %v2029_v16  ;;  %3492 = vmatpush3.bf16.msra.mxu1 %v3626_v43  ;;  %v3628_v16 = vld [vmem:[%s6851_s1 + $0xb8] sm:$0xff]  }
 0x173   :  { %v1086_v6 = vpop.xlane.xlu1 %1085  ;;  %v1968_v0 = vmul.f32 %v5060_v14, %v1735_v26  ;;  %v2198_v50 = vadd.f32 %v5068_v18, %v1965_v7  ;;  %v1967_v37 = vmul.f32 %v5063_v47, %v1734_v62  ;;  %v2197_v3 = vadd.f32 %v5075_v35, %v1964_v20  ;;  %3493 = vmatprep.subr.bf16.mxu1 %v3627_v52  ;;  %v7266_v20 = vld [vmem:[#allocation13_spill] sm:$0xff] }
 0x174   :  { %v1344_v58 = vmul.f32 0.0026041667, %v1086_v6  ;;  %3667 = vrsqrt.f32 %v1471_v30  ;;  %v5225_v63 = vpop.eup %3659  ;;  %2581 = vmatprep.mubr.bf16.mxu0 %v2240_v36  ;;  %v7263_v6 = vld [vmem:[#allocation12_spill] sm:$0xff] }
 0x175   :  { %v1090_v45 = vpop.xlane.xlu0 %1089  ;;  %7262 = vst [vmem:[#allocation6_spill] sm:$0xff] %v5225_v63  ;;  %v1570_v13 = vmul.f32 %v5203_v53, %v7263_v6  ;;  %2582 = vmatmul.mubr.bf16.gmra.mrb[8].mxu0 %v2239_v59  ;;  %v2201_v42 = vadd.f32 %v5068_v18, %v1968_v0  ;;  %v2200_v43 = vadd.f32 %v5075_v35, %v1967_v37  ;;  %v7269_v6 = vld [vmem:[#allocation19_spill] sm:$0xff] }
 0x176   :  { %v1416_v4 = vadd.f32 1e-05, %v1344_v58  ;;  %v1345_v9 = vmul.f32 0.0026041667, %v1090_v45  ;;  %v5231_v39 = vpop.eup %3661  ;;  %v7265_v58 = vld [vmem:[#allocation11_spill] sm:$0xff]  ;;  %3494 = vmatpush3.bf16.msra.mxu1 %v3627_v52 }
 0x177   :  { %v1310_v60 = vpop.xlane.xlu1 %1309  ;;  %v1573_v33 = vmul.f32 %v5231_v39, %v7264_v21  ;;  %v1569_v2 = vmul.f32 %v5203_v53, %v7265_v58  ;;  %v1803_v26 = vmul.f32 %v5060_v14, %v1570_v13  ;;  %v2324_v7 = vpack.c.bf16 %v2201_v42, %v2198_v50  ;;  %3495 = vmatprep.subr.bf16.mxu1 %v3628_v16 }
 0x178   :  { %3669 = vrsqrt.f32 %v1416_v4  ;;  %v1417_v5 = vadd.f32 1e-05, %v1345_v9  ;;  %v1400_v30 = vmul.f32 0.0026041667, %v1310_v60  ;;  %v2323_v11 = vpack.c.bf16 %v2200_v43, %v2197_v3 }
 0x179   :  { %v1314_v49 = vpop.xlane.xlu0 %1313  ;;  %v5245_v45 = vpop.eup %3663  ;;  %v1806_v62 = vmul.f32 %v5060_v14, %v1573_v33  ;;  %v1572_v4 = vmul.f32 %v5231_v39, %v7266_v20  ;;  %v2036_v59 = vadd.f32 %v5068_v18, %v1803_v26  ;;  %v1802_v60 = vmul.f32 %v5063_v47, %v1569_v2  ;;  %2805 = vmatprep.mubr.bf16.mxu1 %v2324_v7 }
 0x17a   :  { %3671 = vrsqrt.f32 %v1417_v5  ;;  %v1472_v28 = vadd.f32 1e-05, %v1400_v30  ;;  %v1401_v32 = vmul.f32 0.0026041667, %v1314_v49  ;;  %v7268_v5 = vld [vmem:[#allocation17_spill] sm:$0xff]  ;;  %2806 = vmatmul.mubr.bf16.gmra.mrb[12].mxu1 %v2323_v11  ;;  %v7270_v49 = vld [vmem:[#allocation16_spill] sm:$0xff] }
 0x17b   :  { %v2039_v50 = vadd.f32 %v5068_v18, %v1806_v62  ;;  %v1805_v3 = vmul.f32 %v5063_v47, %v1572_v4  ;;  %v1738_v30 = vmul.f32 %v5225_v63, %v7268_v5  ;;  %v2035_v52 = vadd.f32 %v5075_v35, %v1802_v60  ;;  %3496 = vmatpush3.bf16.msra.mxu1 %v3628_v16  ;;  %v7272_v11 = vld [vmem:[#allocation18_spill] sm:$0xff] }
 0x17c   :  { %3673 = vrsqrt.f32 %v1472_v28  ;;  %v1473_v9 = vadd.f32 1e-05, %v1401_v32  ;;  %v5252_v0 = vpop.eup %3665  ;;  %v1737_v42 = vmul.f32 %v5225_v63, %v7270_v49  ;;  %v7275_v49 = vld [vmem:[#allocation21_spill] sm:$0xff]  ;;  %v3884_v63 = vld [vmem:[#allocation2 + $0x398] sm:$0xff] }
 0x17d   :  { %v1094_v36 = vpop.xlane.xlu1 %1093  ;;  %7267 = vst [vmem:[#allocation35_spill] sm:$0xff] %v5252_v0  ;;  %v1741_v13 = vmul.f32 %v5252_v0, %v7269_v6  ;;  %v2243_v58 = vpack.c.bf16 %v2039_v50, %v2036_v59  ;;  %v2038_v2 = vadd.f32 %v5075_v35, %v1805_v3  ;;  %v1971_v28 = vmul.f32 %v5060_v14, %v1738_v30  ;;  %v7273_v30 = vld [vmem:[#allocation22_spill] sm:$0xff] }
 0x17e   :  { %v1346_v37 = vmul.f32 0.0026041667, %v1094_v36  ;;  %3675 = vrsqrt.f32 %v1473_v9  ;;  %v5263_v43 = vpop.eup %3667  ;;  %v1740_v62 = vmul.f32 %v5252_v0, %v7272_v11  ;;  %v1970_v20 = vmul.f32 %v5063_v47, %v1737_v42  ;;  %v3885_v0 = vld [vmem:[#allocation2 + $0x3a0] sm:$0xff] }
 0x17f   :  { %7271 = vst [vmem:[#allocation9_spill] sm:$0xff] %v5263_v43  ;;  %v1974_v7 = vmul.f32 %v5060_v14, %v1741_v13  ;;  %2589 = vmatprep.mubr.bf16.mxu0 %v2243_v58  ;;  %v2242_v9 = vpack.c.bf16 %v2038_v2, %v2035_v52  ;;  %v2204_v36 = vadd.f32 %v5068_v18, %v1971_v28  ;;  %v7274_v13 = vld [vmem:[#allocation24_spill] sm:$0xff] }
 0x180   :  { %v1418_v21 = vadd.f32 1e-05, %v1346_v37  ;;  %v1098_v33 = vpop.xlane.xlu0 %1097  ;;  %v1973_v37 = vmul.f32 %v5063_v47, %v1740_v62  ;;  %v2203_v50 = vadd.f32 %v5075_v35, %v1970_v20  ;;  %v1576_v6 = vmul.f32 %v5245_v45, %v7273_v30 }
 0x181   :  { %v1347_v32 = vmul.f32 0.0026041667, %v1098_v33  ;;  %v1318_v26 = vpop.xlane.xlu1 %1317  ;;  %v2207_v16 = vadd.f32 %v5068_v18, %v1974_v7  ;;  %2590 = vmatmul.mubr.bf16.gmra.mrb[12].mxu0 %v2242_v9  ;;  %v1575_v42 = vmul.f32 %v5245_v45, %v7275_v49 }
 0x182   :  { %3677 = vrsqrt.f32 %v1418_v21  ;;  %v1402_v4 = vmul.f32 0.0026041667, %v1318_v26  ;;  %v5272_v59 = vpop.eup %3669  ;;  %v2206_v28 = vadd.f32 %v5075_v35, %v1973_v37  ;;  %v1809_v26 = vmul.f32 %v5060_v14, %v1576_v6 }
 0x183   :  { %v1419_v60 = vadd.f32 1e-05, %v1347_v32  ;;  %v1579_v52 = vmul.f32 %v5272_v59, %v7274_v13  ;;  %v2327_v2 = vpack.c.bf16 %v2207_v16, %v2204_v36 }
 0x184   :  { %v1474_v3 = vadd.f32 1e-05, %v1402_v4  ;;  %v1322_v5 = vpop.xlane.xlu0 %1321  ;;  %v5283_v21 = vpop.eup %3671  ;;  %v2326_v20 = vpack.c.bf16 %v2206_v28, %v2203_v50  ;;  %v7277_v4 = vld [vmem:[#allocation23_spill] sm:$0xff]  ;;  %v2042_v16 = vadd.f32 %v5068_v18, %v1809_v26 }
 0x185   :  { %3679 = vrsqrt.f32 %v1419_v60  ;;  %v1403_v33 = vmul.f32 0.0026041667, %v1322_v5  ;;  %v1102_v58 = vpop.xlane.xlu1 %1101  ;;  %v1812_v7 = vmul.f32 %v5060_v14, %v1579_v52  ;;  %2813 = vmatprep.mubr.bf16.mxu1 %v2327_v2  ;;  %v1578_v9 = vmul.f32 %v5272_v59, %v7277_v4 }
 0x186   :  { %3681 = vrsqrt.f32 %v1474_v3  ;;  %v1348_v32 = vmul.f32 0.0026041667, %v1102_v58  ;;  %v5288_v11 = vpop.eup %3673  ;;  %v1808_v60 = vmul.f32 %v5063_v47, %v1575_v42  ;;  %v7278_v3 = vld [vmem:[#allocation39_spill] sm:$0xff]  ;;  %2814 = vmatmul.mubr.bf16.gmra.mrb[16].mxu1 %v2326_v20  ;;  %v7280_v58 = vld [vmem:[#allocation41_spill] sm:$0xff] }
 0x187   :  { %7276 = vst [vmem:[#allocation8_spill] sm:$0xff] %v5288_v11  ;;  %v1475_v62 = vadd.f32 1e-05, %v1403_v33  ;;  %v2045_v37 = vadd.f32 %v5068_v18, %v1812_v7  ;;  %v1744_v30 = vmul.f32 %v5263_v43, %v7278_v3  ;;  %v1811_v50 = vmul.f32 %v5063_v47, %v1578_v9  ;;  %v7281_v7 = vld [vmem:[#allocation38_spill] sm:$0xff] }
 0x188   :  { %v1420_v5 = vadd.f32 1e-05, %v1348_v32  ;;  %v1106_v36 = vpop.xlane.xlu0 %1105  ;;  %v5297_v6 = vpop.eup %3675  ;;  %v2041_v49 = vadd.f32 %v5075_v35, %v1808_v60  ;;  %v1747_v2 = vmul.f32 %v5288_v11, %v7280_v58 }
 0x189   :  { %7279 = vst [vmem:[#allocation12_spill] sm:$0xff] %v5297_v6  ;;  %3683 = vrsqrt.f32 %v1475_v62  ;;  %v1349_v13 = vmul.f32 0.0026041667, %v1106_v36  ;;  %v1326_v52 = vpop.xlane.xlu1 %1325  ;;  %v2246_v33 = vpack.c.bf16 %v2045_v37, %v2042_v16  ;;  %v2044_v32 = vadd.f32 %v5075_v35, %v1811_v50  ;;  %v7283_v16 = vld [vmem:[#allocation45_spill] sm:$0xff] }
 0x18a   :  { %3685 = vrsqrt.f32 %v1420_v5  ;;  %v1404_v42 = vmul.f32 0.0026041667, %v1326_v52  ;;  %v1977_v26 = vmul.f32 %v5060_v14, %v1744_v30  ;;  %v1743_v62 = vmul.f32 %v5263_v43, %v7281_v7  ;;  %v7282_v5 = vld [vmem:[#allocation40_spill] sm:$0xff] }
 0x18b   :  { %v1421_v28 = vadd.f32 1e-05, %v1349_v13  ;;  %2597 = vmatprep.mubr.bf16.mxu0 %v2246_v33  ;;  %v1980_v60 = vmul.f32 %v5060_v14, %v1747_v2  ;;  %v1746_v36 = vmul.f32 %v5288_v11, %v7282_v5  ;;  %v1582_v37 = vmul.f32 %v5283_v21, %v7283_v16  ;;  %v3880_v2 = vld [vmem:[#allocation2 + $0x360] sm:$0xff]  ;;  %v3881_v5 = vld [vmem:[#allocation2 + $0x368] sm:$0xff]  ;;  %v7288_v16 = vld [vmem:[#allocation47_spill] sm:$0xff] }
 0x18c   :  { %v5307_v4 = vpop.eup %3677  ;;  %v1476_v20 = vadd.f32 1e-05, %v1404_v42  ;;  %v401_v9 = vpop.xlane.xlu0 %400  ;;  %v2245_v30 = vpack.c.bf16 %v2044_v32, %v2041_v49  ;;  %v2210_v52 = vadd.f32 %v5068_v18, %v1977_v26  ;;  %v1976_v33 = vmul.f32 %v5063_v47, %v1743_v62 }
 0x18d   :  { %3687 = vrsqrt.f32 %v1421_v28  ;;  %v579_v3 = vmul.f32 0.0026041667, %v401_v9  ;;  %v1110_v13 = vpop.xlane.xlu1 %1109  ;;  %v2213_v42 = vadd.f32 %v5068_v18, %v1980_v60  ;;  %v3882_v28 = vld [vmem:[#allocation2 + $0x370] sm:$0xff]  ;;  %v1979_v49 = vmul.f32 %v5063_v47, %v1746_v36 }
 0x18e   :  { %3689 = vrsqrt.f32 %v1476_v20  ;;  %v1350_v50 = vmul.f32 0.0026041667, %v1110_v13  ;;  %2598 = vmatmul.mubr.bf16.gmra.mrb[16].mxu0 %v2245_v30  ;;  %v2209_v62 = vadd.f32 %v5075_v35, %v1976_v33  ;;  %v1585_v13 = vmul.f32 %v5307_v4, %v7288_v16 }
 0x18f   :  { %v5317_v58 = vpop.eup %3679  ;;  %v5319_v7 = vsub.f32 %v3880_v2, %v579_v3  ;;  %v5321_v43 = vsub.f32 %v3881_v5, %v579_v3  ;;  %v5323_v9 = vsub.f32 %v3882_v28, %v579_v3  ;;  %v2330_v60 = vpack.c.bf16 %v2213_v42, %v2210_v52  ;;  %v3883_v28 = vld [vmem:[#allocation2 + $0x390] sm:$0xff] }
 0x190   :  { %v5326_v32 = vpop.eup %3681  ;;  %v1422_v26 = vadd.f32 1e-05, %v1350_v50  ;;  %v409_v20 = vpop.xlane.xlu0 %408  ;;  %v2212_v36 = vadd.f32 %v5075_v35, %v1979_v49  ;;  %v1815_v52 = vmul.f32 %v5060_v14, %v1582_v37  ;;  %v1818_v42 = vmul.f32 %v5060_v14, %v1585_v13  ;;  %v3887_v37 = vld [vmem:[#allocation2 + $0x380] sm:$0xff]  ;;  %v3888_v13 = vld [vmem:[#allocation2 + $0x388] sm:$0xff] }
 0x191   :  { %7284 = vst [vmem:[#allocation14_spill] sm:$0xff] %v5319_v7  ;;  %7285 = vst [vmem:[#allocation11_spill] sm:$0xff] %v5321_v43  ;;  %v939_v2 = vmul.f32 %v5319_v7, %v5319_v7  ;;  %v940_v3 = vmul.f32 %v5321_v43, %v5321_v43  ;;  %v581_v5 = vmul.f32 0.0026041667, %v409_v20  ;;  %v405_v30 = vpop.xlane.xlu1 %404  ;;  %2821 = vmatprep.mubr.bf16.mxu1 %v2330_v60  ;;  %v7304_v43 = vld [vmem:[#allocation49_spill] sm:$0xff] }
 0x192   :  { %7286 = vst [vmem:[#allocation13_spill] sm:$0xff] %v5323_v9  ;;  %7287 = vst [vmem:[#allocation17_spill] sm:$0xff] %v5326_v32  ;;  %3691 = vrsqrt.f32 %v1422_v26  ;;  %v580_v50 = vmul.f32 0.0026041667, %v405_v30  ;;  %v2329_v34 = vpack.c.bf16 %v2212_v36, %v2209_v62  ;;  %v3886_v26 = vld [vmem:[#allocation2 + $0x378] sm:$0xff]  ;;  %v2048_v19 = vadd.f32 %v5068_v18, %v1815_v52 }
 0x193   :  { %v5338_v33 = vpop.eup %3683  ;;  %v5340_v16 = vsub.f32 %v3883_v28, %v581_v5  ;;  %v5342_v11 = vsub.f32 %v3884_v63, %v581_v5  ;;  %v5344_v20 = vsub.f32 %v3885_v0, %v581_v5  ;;  %v2051_v5 = vadd.f32 %v5068_v18, %v1818_v42 }
 0x194   :  { %7289 = vst [vmem:[#allocation19_spill] sm:$0xff] %v5338_v33  ;;  %v5346_v49 = vpop.eup %3685  ;;  %v5348_v60 = vsub.f32 %v3886_v26, %v580_v50  ;;  %v5350_v30 = vsub.f32 %v3887_v37, %v580_v50  ;;  %v5352_v1 = vsub.f32 %v3888_v13, %v580_v50  ;;  %v1330_v28 = vpop.xlane.xlu0 %1329  ;;  %2822 = vmatmul.mubr.bf16.gmra.mrb[20].mxu1 %v2329_v34  ;;  %v7296_v13 = vld [vmem:[#allocation44_spill] sm:$0xff] }
 0x195   :  { %7290 = vst [vmem:[#allocation16_spill] sm:$0xff] %v5340_v16  ;;  %7291 = vst [vmem:[#allocation18_spill] sm:$0xff] %v5342_v11  ;;  %v945_v63 = vmul.f32 %v5340_v16, %v5340_v16  ;;  %v946_v0 = vmul.f32 %v5342_v11, %v5342_v11  ;;  %v1405_v62 = vmul.f32 0.0026041667, %v1330_v28  ;;  %v413_v36 = vpop.xlane.xlu1 %412  ;;  %v1581_v52 = vmul.f32 %v5283_v21, %v7296_v13  ;;  %v3890_v11 = vld [vmem:[#allocation2 + $0x3b0] sm:$0xff] }
 0x196   :  { %7292 = vst [vmem:[#allocation22_spill] sm:$0xff] %v5344_v20  ;;  %7293 = vst [vmem:[#allocation24_spill] sm:$0xff] %v5348_v60  ;;  %v942_v26 = vmul.f32 %v5348_v60, %v5348_v60  ;;  %v943_v50 = vmul.f32 %v5350_v30, %v5350_v30  ;;  %v582_v37 = vmul.f32 0.0026041667, %v413_v36  ;;  %v2249_v61 = vpack.c.bf16 %v2051_v5, %v2048_v19  ;;  %v3891_v60 = vld [vmem:[#allocation2 + $0x3b8] sm:$0xff] }
 0x197   :  { %7294 = vst [vmem:[#allocation21_spill] sm:$0xff] %v5350_v30  ;;  %7295 = vst [vmem:[#allocation23_spill] sm:$0xff] %v5352_v1  ;;  %v5366_v12 = vpop.eup %3687  ;;  %v1477_v38 = vadd.f32 1e-05, %v1405_v62  ;;  %v1584_v34 = vmul.f32 %v5307_v4, %v7297_v40  ;;  %v941_v42 = vmul.f32 %v5323_v9, %v5323_v9  ;;  %v1814_v62 = vmul.f32 %v5063_v47, %v1581_v52 }
 0x198   :  { %v5372_v28 = vpop.eup %3689  ;;  %v5374_v16 = vsub.f32 %v3889_v57, %v582_v37  ;;  %v5376_v36 = vsub.f32 %v3890_v11, %v582_v37  ;;  %v5378_v13 = vsub.f32 %v3891_v60, %v582_v37  ;;  %v1114_v19 = vpop.xlane.xlu0 %1113  ;;  %2605 = vmatprep.mubr.bf16.mxu0 %v2249_v61  ;;  %v1191_v5 = vadd.f32 %v940_v3, %v939_v2  ;;  %v7302_v37 = vld [vmem:[#allocation50_spill] sm:$0xff]  ;;  %v7303_v2 = vld [vmem:[#allocation53_spill] sm:$0xff] }
 0x199   :  { %7298 = vst [vmem:[#allocation39_spill] sm:$0xff] %v5372_v28  ;;  %3693 = vrsqrt.f32 %v1477_v38  ;;  %v1817_v40 = vmul.f32 %v5063_v47, %v1584_v34  ;;  %v1351_v30 = vmul.f32 0.0026041667, %v1114_v19  ;;  %v1334_v7 = vpop.xlane.xlu1 %1333  ;;  %v2047_v60 = vadd.f32 %v5075_v35, %v1814_v62 }
 0x19a   :  { %7299 = vst [vmem:[#allocation41_spill] sm:$0xff] %v5374_v16  ;;  %7300 = vst [vmem:[#allocation38_spill] sm:$0xff] %v5376_v36  ;;  %v5384_v57 = vmul.f32 %v5374_v16, %v5374_v16  ;;  %v5388_v11 = vmul.f32 %v5376_v36, %v5376_v36  ;;  %v1750_v52 = vmul.f32 %v5297_v6, %v7302_v37  ;;  %v1406_v9 = vmul.f32 0.0026041667, %v1334_v7 }
 0x19b   :  { %7301 = vst [vmem:[#allocation40_spill] sm:$0xff] %v5378_v13  ;;  %v2050_v61 = vadd.f32 %v5075_v35, %v1817_v40  ;;  %v1192_v38 = vadd.f32 %v1191_v5, %v941_v42  ;;  %v1423_v34 = vadd.f32 1e-05, %v1351_v30  ;;  %v1753_v3 = vmul.f32 %v5326_v32, %v7303_v2 }
 0x19c   :  { %v5396_v19 = vpop.eup %3691  ;;  %v1983_v16 = vmul.f32 %v5060_v14, %v1750_v52  ;;  %v1749_v36 = vmul.f32 %v5297_v6, %v7304_v43  ;;  %v1752_v62 = vmul.f32 %v5326_v32, %v7305_v8  ;;  %v417_v54 = vpop.xlane.xlu0 %416  ;;  %v947_v42 = vmul.f32 %v5344_v20, %v5344_v20  ;;  %v7306_v32 = vld [vmem:[#allocation56_spill] sm:$0xff]  ;;  %v3893_v20 = vld [vmem:[#allocation2 + $0x3c8] sm:$0xff] }
 0x19d   :  { %v2248_v37 = vpack.c.bf16 %v2050_v61, %v2047_v60  ;;  %1193 = vadd.xlane.f32.xlu0 %v1192_v38  ;;  %3695 = vrsqrt.f32 %v1423_v34  ;;  %v1986_v30 = vmul.f32 %v5060_v14, %v1753_v3  ;;  %v1118_v40 = vpop.xlane.xlu1 %1117  ;;  %v1478_v52 = vadd.f32 1e-05, %v1406_v9 }
 0x19e   :  { %v2216_v5 = vadd.f32 %v5068_v18, %v1983_v16  ;;  %v1982_v7 = vmul.f32 %v5063_v47, %v1749_v36  ;;  %v1985_v43 = vmul.f32 %v5063_v47, %v1752_v62  ;;  %v1199_v2 = vadd.f32 %v946_v0, %v945_v63  ;;  %v3892_v63 = vld [vmem:[#allocation2 + $0x3c0] sm:$0xff] }
 0x19f   :  { %2606 = vmatmul.mubr.bf16.gmra.mrb[20].mxu0 %v2248_v37  ;;  %v2219_v8 = vadd.f32 %v5068_v18, %v1986_v30  ;;  %v944_v60 = vmul.f32 %v5352_v1, %v5352_v1  ;;  %v1195_v61 = vadd.f32 %v943_v50, %v942_v26  ;;  %3697 = vrsqrt.f32 %v1478_v52  ;;  %v3894_v50 = vld [vmem:[#allocation2 + $0x3d0] sm:$0xff] }
 0x1a0   :  { %v2215_v38 = vadd.f32 %v5075_v35, %v1982_v7  ;;  %v2218_v34 = vadd.f32 %v5075_v35, %v1985_v43  ;;  %v583_v3 = vmul.f32 0.0026041667, %v417_v54  ;;  %v425_v16 = vpop.xlane.xlu0 %424  ;;  %v1200_v6 = vadd.f32 %v1199_v2, %v947_v42  ;;  %v7311_v54 = vld [vmem:[#allocation58_spill] sm:$0xff]  ;;  %v7312_v43 = vld [vmem:[#allocation55_spill] sm:$0xff] }
 0x1a1   :  { %v2333_v9 = vpack.c.bf16 %v2219_v8, %v2216_v5  ;;  %v1196_v36 = vadd.f32 %v1195_v61, %v944_v60  ;;  %v1588_v62 = vmul.f32 %v5317_v58, %v7306_v32  ;;  %v421_v37 = vpop.xlane.xlu1 %420  ;;  %v1591_v42 = vmul.f32 %v5346_v49, %v7311_v54 }
 0x1a2   :  { %v2332_v30 = vpack.c.bf16 %v2218_v34, %v2215_v38  ;;  %v5416_v0 = vsub.f32 %v3892_v63, %v583_v3  ;;  %v5418_v26 = vsub.f32 %v3893_v20, %v583_v3  ;;  %v5420_v52 = vsub.f32 %v3894_v50, %v583_v3  ;;  %1201 = vadd.xlane.f32.xlu0 %v1200_v6  ;;  %v7313_v6 = vld [vmem:[#allocation57_spill] sm:$0xff]  ;;  %v3895_v50 = vld [vmem:[#allocation2 + $0x3f0] sm:$0xff] }
 0x1a3   :  { %v5422_v7 = vpop.eup %3693  ;;  %2829 = vmatprep.mubr.bf16.mxu1 %v2333_v9  ;;  %v1821_v32 = vmul.f32 %v5060_v14, %v1588_v62  ;;  %v1352_v5 = vmul.f32 0.0026041667, %v1118_v40  ;;  %v1587_v8 = vmul.f32 %v5317_v58, %v7312_v43  ;;  %1197 = vadd.xlane.f32.xlu1 %v1196_v36  ;;  %v1590_v60 = vmul.f32 %v5346_v49, %v7313_v6 }
 0x1a4   :  { %7307 = vst [vmem:[#allocation45_spill] sm:$0xff] %v5416_v0  ;;  %7308 = vst [vmem:[#allocation47_spill] sm:$0xff] %v5418_v26  ;;  %2830 = vmatmul.mubr.bf16.gmra.mrb[24].mxu1 %v2332_v30  ;;  %v5431_v20 = vmul.f32 %v5416_v0, %v5416_v0  ;;  %v5435_v2 = vmul.f32 %v5418_v26, %v5418_v26  ;;  %v585_v61 = vmul.f32 0.0026041667, %v425_v16  ;;  %v1122_v38 = vpop.xlane.xlu0 %1121  ;;  %v7321_v26 = vld [vmem:[#allocation63_spill] sm:$0xff] }
 0x1a5   :  { %7309 = vst [vmem:[#allocation44_spill] sm:$0xff] %v5420_v52  ;;  %7310 = vst [vmem:[#allocation46_spill] sm:$0xff] %v5422_v7  ;;  %v1824_v40 = vmul.f32 %v5060_v14, %v1591_v42  ;;  %v2054_v34 = vadd.f32 %v5068_v18, %v1821_v32  ;;  %v1424_v3 = vadd.f32 1e-05, %v1352_v5  ;;  %v1820_v9 = vmul.f32 %v5063_v47, %v1587_v8  ;;  %v429_v36 = vpop.xlane.xlu1 %428  ;;  %v3896_v5 = vld [vmem:[#allocation2 + $0x3f8] sm:$0xff] }
 0x1a6   :  { %v1823_v62 = vmul.f32 %v5063_v47, %v1590_v60  ;;  %v950_v30 = vmul.f32 %v5378_v13, %v5378_v13  ;;  %v1203_v63 = vadd.f32 %v5388_v11, %v5384_v57  ;;  %v5447_v54 = vsub.f32 %v3895_v50, %v585_v61  ;;  %v3897_v60 = vld [vmem:[#allocation2 + $0x400] sm:$0xff]  ;;  %v7322_v13 = vld [vmem:[#allocation68_spill] sm:$0xff] }
 0x1a7   :  { %v5449_v16 = vpop.eup %3695  ;;  %v2057_v42 = vadd.f32 %v5068_v18, %v1824_v40  ;;  %3699 = vrsqrt.f32 %v1424_v3  ;;  %v2053_v32 = vadd.f32 %v5075_v35, %v1820_v9  ;;  %v5453_v43 = vsub.f32 %v3896_v5, %v585_v61  ;;  %v7317_v3 = vld [vmem:[#allocation62_spill] sm:$0xff]  ;;  %v7318_v5 = vld [vmem:[#allocation64_spill] sm:$0xff] }
 0x1a8   :  { %7314 = vst [vmem:[#allocation50_spill] sm:$0xff] %v5447_v54  ;;  %v2056_v8 = vadd.f32 %v5075_v35, %v1823_v62  ;;  %v1204_v6 = vadd.f32 %v1203_v63, %v950_v30  ;;  %v5456_v0 = vsub.f32 %v3897_v60, %v585_v61  ;;  %v5460_v57 = vmul.f32 %v5447_v54, %v5447_v54  ;;  %v433_v11 = vpop.xlane.xlu0 %432  ;;  %v7320_v60 = vld [vmem:[#allocation61_spill] sm:$0xff] }
 0x1a9   :  { %7315 = vst [vmem:[#allocation53_spill] sm:$0xff] %v5453_v43  ;;  %v2252_v50 = vpack.c.bf16 %v2057_v42, %v2054_v34  ;;  %v5464_v40 = vmul.f32 %v5453_v43, %v5453_v43  ;;  %v1756_v9 = vmul.f32 %v5338_v33, %v7317_v3  ;;  %v1759_v62 = vmul.f32 %v5372_v28, %v7318_v5  ;;  %v5470_v30 = vpop.eup %3697  ;;  %v1126_v1 = vpop.xlane.xlu1 %1125 }
 0x1aa   :  { %7316 = vst [vmem:[#allocation49_spill] sm:$0xff] %v5456_v0  ;;  %7319 = vst [vmem:[#allocation52_spill] sm:$0xff] %v5470_v30  ;;  %v2251_v61 = vpack.c.bf16 %v2056_v8, %v2053_v32  ;;  %1205 = vadd.xlane.f32.xlu1 %v1204_v6  ;;  %v584_v63 = vmul.f32 0.0026041667, %v421_v37  ;;  %v1755_v54 = vmul.f32 %v5338_v33, %v7320_v60  ;;  %v1353_v3 = vmul.f32 0.0026041667, %v1122_v38 }
 0x1ab   :  { %v1758_v34 = vmul.f32 %v5372_v28, %v7321_v26  ;;  %2613 = vmatprep.mubr.bf16.mxu0 %v2252_v50  ;;  %v1989_v42 = vmul.f32 %v5060_v14, %v1756_v9  ;;  %v1992_v43 = vmul.f32 %v5060_v14, %v1759_v62  ;;  %v1594_v5 = vmul.f32 %v5366_v12, %v7322_v13  ;;  %v3898_v32 = vld [vmem:[#allocation2 + $0x3d8] sm:$0xff]  ;;  %v3899_v37 = vld [vmem:[#allocation2 + $0x3e0] sm:$0xff]  ;;  %v3900_v60 = vld [vmem:[#allocation2 + $0x3e8] sm:$0xff] }
 0x1ac   :  { %2614 = vmatmul.mubr.bf16.gmra.mrb[24].mxu0 %v2251_v61  ;;  %v5480_v8 = vsub.f32 %v3898_v32, %v584_v63  ;;  %v5482_v6 = vsub.f32 %v3899_v37, %v584_v63  ;;  %v5484_v33 = vsub.f32 %v3900_v60, %v584_v63  ;;  %v1988_v26 = vmul.f32 %v5063_v47, %v1755_v54  ;;  %v7326_v37 = vld [vmem:[#allocation70_spill] sm:$0xff]  ;;  %v441_v60 = vpop.xlane.xlu0 %440  ;;  %v7327_v28 = vld [vmem:[#allocation67_spill] sm:$0xff] }
 0x1ad   :  { %v2222_v50 = vadd.f32 %v5068_v18, %v1989_v42  ;;  %v2225_v38 = vadd.f32 %v5068_v18, %v1992_v43  ;;  %v1991_v9 = vmul.f32 %v5063_v47, %v1758_v34  ;;  %v1425_v13 = vadd.f32 1e-05, %v1353_v3 }
 0x1ae   :  { %7323 = vst [vmem:[#allocation56_spill] sm:$0xff] %v5480_v8  ;;  %7324 = vst [vmem:[#allocation58_spill] sm:$0xff] %v5482_v6  ;;  %v954_v62 = vmul.f32 %v5480_v8, %v5480_v8  ;;  %v955_v61 = vmul.f32 %v5482_v6, %v5482_v6  ;;  %v2221_v32 = vadd.f32 %v5075_v35, %v1988_v26  ;;  %v586_v3 = vmul.f32 0.0026041667, %v429_v36 }
 0x1af   :  { %7325 = vst [vmem:[#allocation55_spill] sm:$0xff] %v5484_v33  ;;  %v1597_v63 = vmul.f32 %v5396_v19, %v7326_v37  ;;  %v2336_v54 = vpack.c.bf16 %v2225_v38, %v2222_v50  ;;  %v2224_v42 = vadd.f32 %v5075_v35, %v1991_v9  ;;  %3701 = vrsqrt.f32 %v1425_v13  ;;  %v437_v9 = vpop.xlane.xlu1 %436  ;;  %v3901_v13 = vld [vmem:[#allocation2 + $0x408] sm:$0xff] }
 0x1b0   :  { %v1827_v43 = vmul.f32 %v5060_v14, %v1594_v5  ;;  %v1593_v8 = vmul.f32 %v5366_v12, %v7327_v28  ;;  %v1596_v6 = vmul.f32 %v5396_v19, %v7328_v44  ;;  %v953_v38 = vmul.f32 %v5420_v52, %v5420_v52 }
 0x1b1   :  { %v1830_v34 = vmul.f32 %v5060_v14, %v1597_v63  ;;  %v5504_v26 = vpop.eup %3699  ;;  %2837 = vmatprep.mubr.bf16.mxu1 %v2336_v54  ;;  %v2335_v37 = vpack.c.bf16 %v2224_v42, %v2221_v32  ;;  %v1207_v5 = vadd.f32 %v5435_v2, %v5431_v20  ;;  %v5512_v28 = vsub.f32 %v3901_v13, %v586_v3  ;;  %v3902_v63 = vld [vmem:[#allocation2 + $0x410] sm:$0xff] }
 0x1b2   :  { %v2060_v50 = vadd.f32 %v5068_v18, %v1827_v43  ;;  %v5514_v44 = vsub.f32 %v3902_v63, %v586_v3  ;;  %v5516_v54 = vsub.f32 %v3903_v17, %v586_v3  ;;  %v1826_v32 = vmul.f32 %v5063_v47, %v1593_v8  ;;  %v1130_v63 = vpop.xlane.xlu0 %1129  ;;  %v3904_v3 = vld [vmem:[#allocation2 + $0x420] sm:$0xff] }
 0x1b3   :  { %v2063_v36 = vadd.f32 %v5068_v18, %v1830_v34  ;;  %7329 = vst [vmem:[#allocation57_spill] sm:$0xff] %v5512_v28  ;;  %2838 = vmatmul.mubr.bf16.gmra.mrb[28].mxu1 %v2335_v37  ;;  %v1829_v42 = vmul.f32 %v5063_v47, %v1596_v6  ;;  %v1208_v43 = vadd.f32 %v1207_v5, %v953_v38  ;;  %v587_v52 = vmul.f32 0.0026041667, %v433_v11  ;;  %v3905_v6 = vld [vmem:[#allocation2 + $0x428] sm:$0xff]  ;;  %v3906_v11 = vld [vmem:[#allocation2 + $0x430] sm:$0xff] }
 0x1b4   :  { %7330 = vst [vmem:[#allocation62_spill] sm:$0xff] %v5514_v44  ;;  %7331 = vst [vmem:[#allocation64_spill] sm:$0xff] %v5516_v54  ;;  %v960_v2 = vmul.f32 %v5512_v28, %v5512_v28  ;;  %v961_v34 = vmul.f32 %v5514_v44, %v5514_v44  ;;  %v1354_v13 = vmul.f32 0.0026041667, %v1126_v1  ;;  %v2059_v41 = vadd.f32 %v5075_v35, %v1826_v32  ;;  %v3908_v28 = vld [vmem:[#allocation2 + $0x458] sm:$0xff] }
 0x1b5   :  { %v2255_v20 = vpack.c.bf16 %v2063_v36, %v2060_v50  ;;  %v2062_v17 = vadd.f32 %v5075_v35, %v1829_v42  ;;  %1209 = vadd.xlane.f32.xlu0 %v1208_v43  ;;  %v5526_v8 = vsub.f32 %v3904_v3, %v587_v52  ;;  %v5528_v37 = vsub.f32 %v3905_v6, %v587_v52  ;;  %v445_v43 = vpop.xlane.xlu1 %444 }
 0x1b6   :  { %v5530_v50 = vsub.f32 %v3906_v11, %v587_v52  ;;  %v1426_v38 = vadd.f32 1e-05, %v1354_v13  ;;  %v959_v1 = vmul.f32 %v5456_v0, %v5456_v0  ;;  %v1215_v5 = vadd.f32 %v5464_v40, %v5460_v57  ;;  %v7348_v0 = vld [vmem:[#allocation81_spill] sm:$0xff] }
 0x1b7   :  { %7332 = vst [vmem:[#allocation61_spill] sm:$0xff] %v5526_v8  ;;  %7333 = vst [vmem:[#allocation63_spill] sm:$0xff] %v5528_v37  ;;  %2621 = vmatprep.mubr.bf16.mxu0 %v2255_v20  ;;  %v2254_v36 = vpack.c.bf16 %v2062_v17, %v2059_v41  ;;  %v5538_v32 = vmul.f32 %v5526_v8, %v5526_v8  ;;  %v5542_v42 = vmul.f32 %v5528_v37, %v5528_v37  ;;  %v3907_v8 = vld [vmem:[#allocation2 + $0x450] sm:$0xff] }
 0x1b8   :  { %7334 = vst [vmem:[#allocation68_spill] sm:$0xff] %v5530_v50  ;;  %v956_v52 = vmul.f32 %v5484_v33, %v5484_v33  ;;  %3703 = vrsqrt.f32 %v1426_v38  ;;  %v1216_v20 = vadd.f32 %v1215_v5, %v959_v1  ;;  %v1211_v13 = vadd.f32 %v955_v61, %v954_v62  ;;  %v3909_v38 = vld [vmem:[#allocation2 + $0x460] sm:$0xff]  ;;  %v449_v61 = vpop.xlane.xlu0 %448 }
 0x1b9   :  { %v589_v3 = vmul.f32 0.0026041667, %v441_v60  ;;  %v5546_v6 = vpop.eup %3701  ;;  %2622 = vmatmul.mubr.bf16.gmra.mrb[28].mxu0 %v2254_v36  ;;  %v588_v41 = vmul.f32 0.0026041667, %v437_v9  ;;  %v962_v57 = vmul.f32 %v5516_v54, %v5516_v54  ;;  %v1219_v40 = vadd.f32 %v961_v34, %v960_v2  ;;  %v3910_v60 = vld [vmem:[#allocation2 + $0x438] sm:$0xff]  ;;  %v3911_v9 = vld [vmem:[#allocation2 + $0x440] sm:$0xff] }
 0x1ba   :  { %v1355_v17 = vmul.f32 0.0026041667, %v1130_v63  ;;  %1217 = vadd.xlane.f32.xlu0 %v1216_v20  ;;  %v1212_v11 = vadd.f32 %v1211_v13, %v956_v52  ;;  %v3912_v2 = vld [vmem:[#allocation2 + $0x448] sm:$0xff] }
 0x1bb   :  { %v5550_v37 = vsub.f32 %v3907_v8, %v589_v3  ;;  %v5552_v44 = vsub.f32 %v3908_v28, %v589_v3  ;;  %v5554_v62 = vsub.f32 %v3909_v38, %v589_v3  ;;  %v5556_v1 = vsub.f32 %v3910_v60, %v588_v41  ;;  %v7340_v52 = vld [vmem:[#allocation78_spill] sm:$0xff] }
 0x1bc   :  { %v5558_v5 = vsub.f32 %v3911_v9, %v588_v41  ;;  %v5560_v34 = vsub.f32 %v3912_v2, %v588_v41  ;;  %v1220_v63 = vadd.f32 %v1219_v40, %v962_v57  ;;  %1213 = vadd.xlane.f32.xlu1 %v1212_v11  ;;  %v1427_v36 = vadd.f32 1e-05, %v1355_v17  ;;  %v7341_v41 = vld [vmem:[#allocation83_spill] sm:$0xff]  ;;  %v1134_v11 = vpop.xlane.xlu1 %1133  ;;  %v7342_v17 = vld [vmem:[#allocation77_spill] sm:$0xff]  ;;  %v7343_v9 = vld [vmem:[#allocation82_spill] sm:$0xff] }
 0x1bd   :  { %7335 = vst [vmem:[#allocation70_spill] sm:$0xff] %v5550_v37  ;;  %7336 = vst [vmem:[#allocation67_spill] sm:$0xff] %v5552_v44  ;;  %v5564_v8 = vmul.f32 %v5550_v37, %v5550_v37  ;;  %v5568_v28 = vmul.f32 %v5552_v44, %v5552_v44  ;;  %v1762_v20 = vmul.f32 %v5422_v7, %v7340_v52  ;;  %v590_v40 = vmul.f32 0.0026041667, %v445_v43  ;;  %v3913_v37 = vld [vmem:[#allocation2 + $0x468] sm:$0xff] }
 0x1be   :  { %7337 = vst [vmem:[#allocation69_spill] sm:$0xff] %v5554_v62  ;;  %7338 = vst [vmem:[#allocation145_spill] sm:$0xff] %v5556_v1  ;;  %v5574_v13 = vmul.f32 %v5556_v1, %v5556_v1  ;;  %v5578_v3 = vmul.f32 %v5558_v5, %v5558_v5  ;;  %v1765_v57 = vmul.f32 %v5470_v30, %v7341_v41  ;;  %3705 = vrsqrt.f32 %v1427_v36  ;;  %v3914_v1 = vld [vmem:[#allocation2 + $0x470] sm:$0xff]  ;;  %v3915_v41 = vld [vmem:[#allocation2 + $0x478] sm:$0xff] }
 0x1bf   :  { %7339 = vst [vmem:[#allocation146_spill] sm:$0xff] %v5558_v5  ;;  %v1995_v38 = vmul.f32 %v5060_v14, %v1762_v20  ;;  %v1761_v60 = vmul.f32 %v5422_v7, %v7342_v17  ;;  %v1764_v2 = vmul.f32 %v5470_v30, %v7343_v9  ;;  %v5588_v44 = vsub.f32 %v3913_v37, %v590_v40  ;;  %v7346_v7 = vld [vmem:[#allocation27_spill] sm:$0xff] }
 0x1c0   :  { %v1998_v52 = vmul.f32 %v5060_v14, %v1765_v57  ;;  %v5590_v5 = vsub.f32 %v3914_v1, %v590_v40  ;;  %v5592_v43 = vsub.f32 %v3915_v41, %v590_v40  ;;  %1221 = vadd.xlane.f32.xlu1 %v1220_v63  ;;  %v1556_v9 = vmul.f32 %v5098_v31, %v7346_v7  ;;  %v457_v57 = vpop.xlane.xlu0 %456  ;;  %v7347_v63 = vld [vmem:[#allocation130_spill] sm:$0xff]  ;;  %v453_v54 = vpop.xlane.xlu1 %452 }
 0x1c1   :  { %7344 = vst [vmem:[#allocation78_spill] sm:$0xff] %v5588_v44  ;;  %v2228_v36 = vadd.f32 %v5068_v18, %v1995_v38  ;;  %v1994_v20 = vmul.f32 %v5063_v47, %v1761_v60  ;;  %v1997_v17 = vmul.f32 %v5063_v47, %v1764_v2  ;;  %v5602_v1 = vmul.f32 %v5588_v44, %v5588_v44 }
 0x1c2   :  { %7345 = vst [vmem:[#allocation83_spill] sm:$0xff] %v5590_v5  ;;  %v2231_v37 = vadd.f32 %v5068_v18, %v1998_v52  ;;  %v5606_v40 = vmul.f32 %v5590_v5, %v5590_v5  ;;  %v1786_v38 = vmul.f32 %v7347_v63, %v5090_v23  ;;  %v5610_v60 = vpop.eup %3703  ;;  %v1789_v7 = vmul.f32 %v7347_v63, %v1556_v9 }
 0x1c3   :  { %v2227_v2 = vadd.f32 %v5075_v35, %v1994_v20  ;;  %v2230_v31 = vadd.f32 %v5075_v35, %v1997_v17  ;;  %v965_v52 = vmul.f32 %v5530_v50, %v5530_v50  ;;  %v1223_v44 = vadd.f32 %v5542_v42, %v5538_v32  ;;  %v7349_v17 = vld [vmem:[#allocation87_spill] sm:$0xff]  ;;  %v3916_v50 = vld [vmem:[#allocation2 + $0x480] sm:$0xff] }
 0x1c4   :  { %v2339_v41 = vpack.c.bf16 %v2231_v37, %v2228_v36  ;;  %v2019_v30 = vadd.f32 %v5027_v15, %v1786_v38  ;;  %v591_v5 = vmul.f32 0.0026041667, %v449_v61  ;;  %v2022_v33 = vadd.f32 %v5027_v15, %v1789_v7  ;;  %v3917_v37 = vld [vmem:[#allocation2 + $0x488] sm:$0xff]  ;;  %v3918_v32 = vld [vmem:[#allocation2 + $0x490] sm:$0xff]  ;;  %v1138_v7 = vpop.xlane.xlu0 %1137 }
 0x1c5   :  { %v2338_v23 = vpack.c.bf16 %v2230_v31, %v2227_v2  ;;  %v1600_v20 = vmul.f32 %v5449_v16, %v7348_v0  ;;  %v1603_v9 = vmul.f32 %v5504_v26, %v7349_v17  ;;  %v1224_v51 = vadd.f32 %v1223_v44, %v965_v52  ;;  %v7352_v52 = vld [vmem:[#allocation80_spill] sm:$0xff] }
 0x1c6   :  { %2845 = vmatprep.mubr.bf16.mxu1 %v2339_v41  ;;  %v5625_v36 = vsub.f32 %v3916_v50, %v591_v5  ;;  %v5627_v38 = vsub.f32 %v3917_v37, %v591_v5  ;;  %v5629_v42 = vsub.f32 %v3918_v32, %v591_v5  ;;  %v2235_v61 = vpack.c.bf16 %v2022_v33, %v2019_v30  ;;  %v7353_v41 = vld [vmem:[#allocation86_spill] sm:$0xff] }
 0x1c7   :  { %2846 = vmatmul.mubr.bf16.gmra.mrb[32].mxu1 %v2338_v23  ;;  %v1833_v2 = vmul.f32 %v5060_v14, %v1600_v20  ;;  %v1836_v0 = vmul.f32 %v5060_v14, %v1603_v9  ;;  %v1356_v31 = vmul.f32 0.0026041667, %v1134_v11  ;;  %1225 = vadd.xlane.f32.xlu0 %v1224_v51  ;;  %v1599_v5 = vmul.f32 %v5449_v16, %v7352_v52  ;;  %v461_v52 = vpop.xlane.xlu1 %460 }
 0x1c8   :  { %7350 = vst [vmem:[#allocation77_spill] sm:$0xff] %v5625_v36  ;;  %7351 = vst [vmem:[#allocation82_spill] sm:$0xff] %v5627_v38  ;;  %v5635_v44 = vmul.f32 %v5625_v36, %v5625_v36  ;;  %v5639_v50 = vmul.f32 %v5627_v38, %v5627_v38  ;;  %v1602_v33 = vmul.f32 %v5504_v26, %v7353_v41  ;;  %v5645_v30 = vpop.eup %3705  ;;  %3497 = vmatprep.mubr.bf16.mxu1 %v2235_v61  ;;  %v3919_v38 = vld [vmem:[#allocation2 + $0x4b0] sm:$0xff] }
 0x1c9   :  { %v2066_v11 = vadd.f32 %v5068_v18, %v1833_v2  ;;  %v2069_v51 = vadd.f32 %v5068_v18, %v1836_v0  ;;  %v1428_v23 = vadd.f32 1e-05, %v1356_v31  ;;  %v971_v20 = vmul.f32 %v5554_v62, %v5554_v62 }
 0x1ca   :  { %v1832_v17 = vmul.f32 %v5063_v47, %v1599_v5  ;;  %v1835_v9 = vmul.f32 %v5063_v47, %v1602_v33  ;;  %v1231_v37 = vadd.f32 %v5568_v28, %v5564_v8  ;;  %v968_v32 = vmul.f32 %v5560_v34, %v5560_v34  ;;  %v3920_v28 = vld [vmem:[#allocation2 + $0x4b8] sm:$0xff] }
 0x1cb   :  { %v2258_v61 = vpack.c.bf16 %v2069_v51, %v2066_v11  ;;  %3707 = vrsqrt.f32 %v1428_v23  ;;  %v1227_v2 = vadd.f32 %v5578_v3, %v5574_v13  ;;  %v593_v0 = vmul.f32 0.0026041667, %v457_v57  ;;  %v3921_v11 = vld [vmem:[#allocation2 + $0x4c0] sm:$0xff]  ;;  %v465_v23 = vpop.xlane.xlu0 %464  ;;  %v3922_v3 = vld [vmem:[#allocation2 + $0x498] sm:$0xff] }
 0x1cc   :  { %v2065_v31 = vadd.f32 %v5075_v35, %v1832_v17  ;;  %v2068_v41 = vadd.f32 %v5075_v35, %v1835_v9  ;;  %v1232_v5 = vadd.f32 %v1231_v37, %v971_v20  ;;  %v592_v36 = vmul.f32 0.0026041667, %v453_v54  ;;  %v3923_v17 = vld [vmem:[#allocation2 + $0x4a0] sm:$0xff]  ;;  %v3924_v54 = vld [vmem:[#allocation2 + $0x4a8] sm:$0xff] }
 0x1cd   :  { %2629 = vmatprep.mubr.bf16.mxu0 %v2258_v61  ;;  %v1228_v33 = vadd.f32 %v1227_v2, %v968_v32  ;;  %v5661_v8 = vsub.f32 %v3919_v38, %v593_v0  ;;  %v5663_v62 = vsub.f32 %v3920_v28, %v593_v0  ;;  %v5665_v51 = vsub.f32 %v3921_v11, %v593_v0  ;;  %v7359_v32 = vld [vmem:[#allocation30_spill] sm:$0xff]  ;;  %v7360_v2 = vld [vmem:[#allocation32_spill] sm:$0xff]  ;;  %v1142_v11 = vpop.xlane.xlu1 %1141 }
 0x1ce   :  { %v2257_v13 = vpack.c.bf16 %v2068_v41, %v2065_v31  ;;  %1233 = vadd.xlane.f32.xlu0 %v1232_v5  ;;  %v5667_v57 = vsub.f32 %v3922_v3, %v592_v36  ;;  %v5669_v20 = vsub.f32 %v3923_v17, %v592_v36  ;;  %v5671_v9 = vsub.f32 %v3924_v54, %v592_v36  ;;  %v7361_v41 = vld [vmem:[#allocation34_spill] sm:$0xff] }
 0x1cf   :  { %7354 = vst [vmem:[#allocation27_spill] sm:$0xff] %v5661_v8  ;;  %7355 = vst [vmem:[#allocation130_spill] sm:$0xff] %v5663_v62  ;;  %1229 = vadd.xlane.f32.xlu1 %v1228_v33  ;;  %v5675_v38 = vmul.f32 %v5661_v8, %v5661_v8  ;;  %v5679_v37 = vmul.f32 %v5663_v62, %v5663_v62  ;;  %v1559_v61 = vmul.f32 %v5121_v25, %v7359_v32  ;;  %v7362_v33 = vld [vmem:[#allocation7_spill] sm:$0xff] }
 0x1d0   :  { %7356 = vst [vmem:[#allocation81_spill] sm:$0xff] %v5667_v57  ;;  %7357 = vst [vmem:[#allocation87_spill] sm:$0xff] %v5669_v20  ;;  %v1562_v0 = vmul.f32 %v5145_v46, %v7360_v2  ;;  %2630 = vmatmul.mubr.bf16.gmra.mrb[32].mxu0 %v2257_v13  ;;  %v5687_v36 = vmul.f32 %v5667_v57, %v5667_v57  ;;  %v5691_v31 = vmul.f32 %v5669_v20, %v5669_v20 }
 0x1d1   :  { %7358 = vst [vmem:[#allocation80_spill] sm:$0xff] %v5671_v9  ;;  %v1565_v5 = vmul.f32 %v5152_v22, %v7361_v41  ;;  %v1568_v28 = vmul.f32 %v5190_v24, %v7362_v33  ;;  %v1792_v25 = vmul.f32 %v7347_v63, %v1559_v61  ;;  %v974_v13 = vmul.f32 %v5592_v43, %v5592_v43 }
 0x1d2   :  { %v1795_v46 = vmul.f32 %v7347_v63, %v1562_v0  ;;  %v1235_v3 = vadd.f32 %v5606_v40, %v5602_v1  ;;  %v1357_v32 = vmul.f32 0.0026041667, %v1138_v7  ;;  %v594_v22 = vmul.f32 0.0026041667, %v461_v52  ;;  %v5709_v0 = vpop.xlane.xlu0 %1145 }
 0x1d3   :  { %v1798_v17 = vmul.f32 %v7347_v63, %v1565_v5  ;;  %v1801_v54 = vmul.f32 %v7347_v63, %v1568_v28  ;;  %v2025_v2 = vadd.f32 %v5027_v15, %v1792_v25  ;;  %v977_v61 = vmul.f32 %v5629_v42, %v5629_v42  ;;  %v3925_v5 = vld [vmem:[#allocation2 + $0x4c8] sm:$0xff]  ;;  %v3926_v28 = vld [vmem:[#allocation2 + $0x4d0] sm:$0xff] }
 0x1d4   :  { %v2028_v24 = vadd.f32 %v5027_v15, %v1795_v46  ;;  %v1236_v41 = vadd.f32 %v1235_v3, %v974_v13  ;;  %v1429_v40 = vadd.f32 1e-05, %v1357_v32  ;;  %v5713_v8 = vsub.f32 %v3925_v5, %v594_v22  ;;  %v3927_v46 = vld [vmem:[#allocation2 + $0x4d8] sm:$0xff]  ;;  %v469_v5 = vpop.xlane.xlu1 %468 }
 0x1d5   :  { %v2031_v33 = vadd.f32 %v5027_v15, %v1798_v17  ;;  %v2034_v1 = vadd.f32 %v5027_v15, %v1801_v54  ;;  %v5715_v7 = vpop.eup %3707  ;;  %v5717_v25 = vsub.f32 %v3926_v28, %v594_v22  ;;  %v5719_v13 = vsub.f32 %v3927_v46, %v594_v22  ;;  %v7366_v22 = vld [vmem:[#allocation93_spill] sm:$0xff] }
 0x1d6   :  { %7363 = vst [vmem:[#allocation86_spill] sm:$0xff] %v5713_v8  ;;  %v2238_v52 = vpack.c.bf16 %v2028_v24, %v2025_v2  ;;  %1237 = vadd.xlane.f32.xlu1 %v1236_v41  ;;  %v1239_v3 = vadd.f32 %v5639_v50, %v5635_v44  ;;  %3709 = vrsqrt.f32 %v1429_v40  ;;  %v984_v54 = vmul.f32 %v5713_v8, %v5713_v8  ;;  %v7365_v41 = vld [vmem:[#allocation90_spill] sm:$0xff]  ;;  %v3928_v44 = vld [vmem:[#allocation2 + $0x4e0] sm:$0xff] }
 0x1d7   :  { %7364 = vst [vmem:[#allocation30_spill] sm:$0xff] %v5717_v25  ;;  %v2241_v17 = vpack.c.bf16 %v2034_v1, %v2031_v33  ;;  %v595_v32 = vmul.f32 0.0026041667, %v465_v23  ;;  %v985_v2 = vmul.f32 %v5717_v25, %v5717_v25  ;;  %v1606_v28 = vmul.f32 %v5546_v6, %v7365_v41  ;;  %v3929_v33 = vld [vmem:[#allocation2 + $0x4e8] sm:$0xff]  ;;  %v3930_v23 = vld [vmem:[#allocation2 + $0x4f0] sm:$0xff]  ;;  %v7369_v41 = vld [vmem:[#allocation89_spill] sm:$0xff] }
 0x1d8   :  { %3498 = vmatmul.mubr.bf16.vlgmr.msra.gmra.mrb[36].mxu1 %v2238_v52  ;;  %v1240_v24 = vadd.f32 %v1239_v3, %v977_v61  ;;  %v1609_v46 = vmul.f32 %v5610_v60, %v7366_v22  ;;  %v1358_v52 = vmul.f32 0.0026041667, %v1142_v11  ;;  %v1605_v8 = vmul.f32 %v5546_v6, %v7369_v41  ;;  %v7370_v22 = vld [vmem:[#allocation92_spill] sm:$0xff]  ;;  %v7372_v25 = vld [vmem:[#allocation37_spill] sm:$0xff]  ;;  %v1150_v57 = vpop.xlane.xlu1 %1149 }
 0x1d9   :  { %3501 = vmatprep.mubr.bf16.mxu1 %v2241_v17  ;;  %v5731_v50 = vsub.f32 %v3928_v44, %v595_v32  ;;  %v5733_v1 = vsub.f32 %v3929_v33, %v595_v32  ;;  %v5735_v40 = vsub.f32 %v3930_v23, %v595_v32  ;;  %v1839_v61 = vmul.f32 %v5060_v14, %v1606_v28  ;;  %v1154_v44 = vpop.xlane.xlu0 %1153 }
 0x1da   :  { %1241 = vadd.xlane.f32.xlu0 %v1240_v24  ;;  %v1842_v3 = vmul.f32 %v5060_v14, %v1609_v46  ;;  %v1608_v17 = vmul.f32 %v5610_v60, %v7370_v22  ;;  %v1430_v11 = vadd.f32 1e-05, %v1358_v52  ;;  %v7371_v24 = vld [vmem:[#allocation15_spill] sm:$0xff]  ;;  %v1838_v41 = vmul.f32 %v5063_v47, %v1605_v8 }
 0x1db   :  { %7367 = vst [vmem:[#allocation32_spill] sm:$0xff] %v5731_v50  ;;  %7368 = vst [vmem:[#allocation34_spill] sm:$0xff] %v5733_v1  ;;  %v5745_v33 = vmul.f32 %v5731_v50, %v5731_v50  ;;  %v5749_v32 = vmul.f32 %v5733_v1, %v5733_v1  ;;  %v1571_v28 = vmul.f32 %v5203_v53, %v7371_v24  ;;  %v7373_v1 = vld [vmem:[#allocation42_spill] sm:$0xff] }
 0x1dc   :  { %v2072_v46 = vadd.f32 %v5068_v18, %v1839_v61  ;;  %v2075_v23 = vadd.f32 %v5068_v18, %v1842_v3  ;;  %v1841_v22 = vmul.f32 %v5063_v47, %v1608_v17  ;;  %3711 = vrsqrt.f32 %v1430_v11  ;;  %v7374_v3 = vld [vmem:[#allocation51_spill] sm:$0xff] }
 0x1dd   :  { %v1574_v50 = vmul.f32 %v5231_v39, %v7372_v25  ;;  %v1804_v62 = vmul.f32 %v7347_v63, %v1571_v28  ;;  %v1577_v52 = vmul.f32 %v5245_v45, %v7373_v1  ;;  %v2071_v53 = vadd.f32 %v5075_v35, %v1838_v41 }
 0x1de   :  { %v2261_v20 = vpack.c.bf16 %v2075_v23, %v2072_v46  ;;  %v2074_v61 = vadd.f32 %v5075_v35, %v1841_v22  ;;  %v1580_v8 = vmul.f32 %v5272_v59, %v7374_v3  ;;  %v983_v25 = vmul.f32 %v5665_v51, %v5665_v51  ;;  %v1162_v59 = vpop.xlane.xlu0 %1161 }
 0x1df   :  { %v1807_v17 = vmul.f32 %v7347_v63, %v1574_v50  ;;  %v2037_v11 = vadd.f32 %v5027_v15, %v1804_v62  ;;  %v1810_v39 = vmul.f32 %v7347_v63, %v1577_v52  ;;  %v1247_v24 = vadd.f32 %v5679_v37, %v5675_v38 }
 0x1e0   :  { %2637 = vmatprep.mubr.bf16.mxu0 %v2261_v20  ;;  %v2260_v45 = vpack.c.bf16 %v2074_v61, %v2071_v53  ;;  %v1813_v1 = vmul.f32 %v7347_v63, %v1580_v8  ;;  %v980_v28 = vmul.f32 %v5671_v9, %v5671_v9  ;;  %v5776_v46 = vpop.eup %3709  ;;  %v1243_v23 = vadd.f32 %v5691_v31, %v5687_v36  ;;  %v1158_v8 = vpop.xlane.xlu1 %1157  ;;  %v3932_v36 = vld [vmem:[#allocation2 + $0x500] sm:$0xff] }
 0x1e1   :  { %v2040_v62 = vadd.f32 %v5027_v15, %v1807_v17  ;;  %v2043_v50 = vadd.f32 %v5027_v15, %v1810_v39  ;;  %v1359_v20 = vmul.f32 0.0026041667, %v5709_v0  ;;  %v1248_v22 = vadd.f32 %v1247_v24, %v983_v25  ;;  %v3931_v39 = vld [vmem:[#allocation2 + $0x4f8] sm:$0xff]  ;;  %v3933_v0 = vld [vmem:[#allocation2 + $0x508] sm:$0xff] }
 0x1e2   :  { %2638 = vmatmul.mubr.bf16.gmra.mrb[36].mxu0 %v2260_v45  ;;  %v2046_v41 = vadd.f32 %v5027_v15, %v1813_v1  ;;  %v596_v38 = vmul.f32 0.0026041667, %v469_v5  ;;  %v986_v37 = vmul.f32 %v5719_v13, %v5719_v13  ;;  %v1244_v53 = vadd.f32 %v1243_v23, %v980_v28  ;;  %v7375_v1 = vld [vmem:[#allocation54_spill] sm:$0xff]  ;;  %v7376_v28 = vld [vmem:[#allocation65_spill] sm:$0xff] }
 0x1e3   :  { %v2244_v52 = vpack.c.bf16 %v2040_v62, %v2037_v11  ;;  %v1431_v61 = vadd.f32 1e-05, %v1359_v20  ;;  %v1251_v3 = vadd.f32 %v985_v2, %v984_v54  ;;  %1249 = vadd.xlane.f32.xlu0 %v1248_v22  ;;  %v1361_v11 = vmul.f32 0.0026041667, %v1154_v44  ;;  %v7377_v44 = vld [vmem:[#allocation66_spill] sm:$0xff]  ;;  %v7378_v22 = vld [vmem:[#allocation73_spill] sm:$0xff] }
 0x1e4   :  { %v2247_v17 = vpack.c.bf16 %v2046_v41, %v2043_v50  ;;  %v5786_v9 = vsub.f32 %v3931_v39, %v596_v38  ;;  %v5788_v31 = vsub.f32 %v3932_v36, %v596_v38  ;;  %v5790_v45 = vsub.f32 %v3933_v0, %v596_v38  ;;  %1245 = vadd.xlane.f32.xlu1 %v1244_v53  ;;  %v1170_v50 = vpop.xlane.xlu0 %1169 }
 0x1e5   :  { %3502 = vmatmul.mubr.bf16.gmra.mrb[40].mxu1 %v2244_v52  ;;  %3713 = vrsqrt.f32 %v1431_v61  ;;  %v1252_v5 = vadd.f32 %v1251_v3, %v986_v37  ;;  %v1360_v25 = vmul.f32 0.0026041667, %v1150_v57  ;;  %v1583_v24 = vmul.f32 %v5283_v21, %v7375_v1  ;;  %v1166_v3 = vpop.xlane.xlu1 %1165 }
 0x1e6   :  { %3505 = vmatprep.mubr.bf16.mxu1 %v2247_v17  ;;  %v990_v54 = vmul.f32 %v5786_v9, %v5786_v9  ;;  %v991_v2 = vmul.f32 %v5788_v31, %v5788_v31  ;;  %v1586_v62 = vmul.f32 %v5307_v4, %v7376_v28  ;;  %v5800_v23 = vpop.eup %3711  ;;  %v1433_v20 = vadd.f32 1e-05, %v1361_v11 }
 0x1e7   :  { %v1432_v41 = vadd.f32 1e-05, %v1360_v25  ;;  %v1589_v57 = vmul.f32 %v5317_v58, %v7377_v44  ;;  %v1592_v38 = vmul.f32 %v5346_v49, %v7378_v22  ;;  %v1816_v37 = vmul.f32 %v7347_v63, %v1583_v24  ;;  %v7380_v25 = vld [vmem:[#allocation99_spill] sm:$0xff]  ;;  %v7382_v44 = vld [vmem:[#allocation98_spill] sm:$0xff] }
 0x1e8   :  { %v1819_v52 = vmul.f32 %v7347_v63, %v1586_v62  ;;  %v989_v21 = vmul.f32 %v5735_v40, %v5735_v40  ;;  %v1255_v4 = vadd.f32 %v5749_v32, %v5745_v33  ;;  %1253 = vadd.xlane.f32.xlu1 %v1252_v5  ;;  %3715 = vrsqrt.f32 %v1433_v20  ;;  %v7379_v33 = vld [vmem:[#allocation96_spill] sm:$0xff]  ;;  %v7381_v24 = vld [vmem:[#allocation95_spill] sm:$0xff]  ;;  %v1178_v62 = vpop.xlane.xlu0 %1177 }
 0x1e9   :  { %v1822_v53 = vmul.f32 %v7347_v63, %v1589_v57  ;;  %v1825_v61 = vmul.f32 %v7347_v63, %v1592_v38  ;;  %v1363_v58 = vmul.f32 0.0026041667, %v1162_v59  ;;  %3717 = vrsqrt.f32 %v1432_v41 }
 0x1ea   :  { %v2049_v49 = vadd.f32 %v5027_v15, %v1816_v37  ;;  %v2052_v17 = vadd.f32 %v5027_v15, %v1819_v52  ;;  %v1256_v39 = vadd.f32 %v1255_v4, %v989_v21  ;;  %v1612_v32 = vmul.f32 %v5645_v30, %v7379_v33  ;;  %v7383_v33 = vld [vmem:[#allocation74_spill] sm:$0xff] }
 0x1eb   :  { %v2055_v36 = vadd.f32 %v5027_v15, %v1822_v53  ;;  %v2058_v0 = vadd.f32 %v5027_v15, %v1825_v61  ;;  %v1435_v11 = vadd.f32 1e-05, %v1363_v58  ;;  %v1615_v59 = vmul.f32 %v5715_v7, %v7380_v25  ;;  %v1174_v58 = vpop.xlane.xlu1 %1173 }
 0x1ec   :  { %v2250_v5 = vpack.c.bf16 %v2052_v17, %v2049_v49  ;;  %1257 = vadd.xlane.f32.xlu0 %v1256_v39  ;;  %v1362_v1 = vmul.f32 0.0026041667, %v1158_v8  ;;  %v1611_v28 = vmul.f32 %v5645_v30, %v7381_v24  ;;  %v1845_v41 = vmul.f32 %v5060_v14, %v1612_v32 }
 0x1ed   :  { %v2253_v20 = vpack.c.bf16 %v2058_v0, %v2055_v36  ;;  %3719 = vrsqrt.f32 %v1435_v11  ;;  %v1614_v57 = vmul.f32 %v5715_v7, %v7382_v44  ;;  %v1848_v22 = vmul.f32 %v5060_v14, %v1615_v59  ;;  %v7384_v59 = vld [vmem:[#allocation76_spill] sm:$0xff] }
 0x1ee   :  { %3506 = vmatmul.mubr.bf16.gmra.mrb[44].mxu1 %v2250_v5  ;;  %v1434_v38 = vadd.f32 1e-05, %v1362_v1  ;;  %v1844_v37 = vmul.f32 %v5063_v47, %v1611_v28  ;;  %v992_v8 = vmul.f32 %v5790_v45, %v5790_v45  ;;  %v2078_v21 = vadd.f32 %v5068_v18, %v1845_v41  ;;  %v1186_v1 = vpop.xlane.xlu0 %1185 }
 0x1ef   :  { %v5831_v52 = vpop.eup %3713  ;;  %3509 = vmatprep.mubr.bf16.mxu1 %v2253_v20  ;;  %v1847_v4 = vmul.f32 %v5063_v47, %v1614_v57  ;;  %v1259_v53 = vadd.f32 %v991_v2, %v990_v54  ;;  %v1365_v61 = vmul.f32 0.0026041667, %v1170_v50  ;;  %v2081_v49 = vadd.f32 %v5068_v18, %v1848_v22  ;;  %v7385_v2 = vld [vmem:[#allocation84_spill] sm:$0xff] }
 0x1f0   :  { %3721 = vrsqrt.f32 %v1434_v38  ;;  %v2077_v17 = vadd.f32 %v5075_v35, %v1844_v37  ;;  %v1364_v39 = vmul.f32 0.0026041667, %v1166_v3  ;;  %v1595_v32 = vmul.f32 %v5366_v12, %v7383_v33  ;;  %v7386_v20 = vld [vmem:[#allocation88_spill] sm:$0xff] }
 0x1f1   :  { %v2080_v36 = vadd.f32 %v5075_v35, %v1847_v4  ;;  %v1260_v0 = vadd.f32 %v1259_v53, %v992_v8  ;;  %v1437_v11 = vadd.f32 1e-05, %v1365_v61  ;;  %v2264_v5 = vpack.c.bf16 %v2081_v49, %v2078_v21  ;;  %v1182_v8 = vpop.xlane.xlu1 %1181  ;;  %v7387_v53 = vld [vmem:[#allocation101_spill] sm:$0xff] }
 0x1f2   :  { %v1436_v25 = vadd.f32 1e-05, %v1364_v39  ;;  %v1598_v54 = vmul.f32 %v5396_v19, %v7384_v59  ;;  %v1601_v50 = vmul.f32 %v5449_v16, %v7385_v2  ;;  %v5844_v24 = vpop.eup %3715  ;;  %v1828_v3 = vmul.f32 %v7347_v63, %v1595_v32 }
 0x1f3   :  { %v2263_v28 = vpack.c.bf16 %v2080_v36, %v2077_v17  ;;  %1261 = vadd.xlane.f32.xlu1 %v1260_v0  ;;  %3723 = vrsqrt.f32 %v1437_v11  ;;  %v1604_v41 = vmul.f32 %v5504_v26, %v7386_v20  ;;  %v5849_v12 = vpop.eup %3717  ;;  %2645 = vmatprep.mubr.bf16.mxu0 %v2264_v5  ;;  %v1367_v16 = vmul.f32 0.0026041667, %v1178_v62  ;;  %v7388_v36 = vld [vmem:[#allocation105_spill] sm:$0xff] }
 0x1f4   :  { %3725 = vrsqrt.f32 %v1436_v25  ;;  %v1831_v19 = vmul.f32 %v7347_v63, %v1598_v54  ;;  %v1834_v44 = vmul.f32 %v7347_v63, %v1601_v50  ;;  %v2061_v57 = vadd.f32 %v5027_v15, %v1828_v3  ;;  %v7389_v25 = vld [vmem:[#allocation100_spill] sm:$0xff] }
 0x1f5   :  { %2646 = vmatmul.mubr.bf16.gmra.mrb[40].mxu0 %v2263_v28  ;;  %v1837_v22 = vmul.f32 %v7347_v63, %v1604_v41  ;;  %v1366_v38 = vmul.f32 0.0026041667, %v1174_v58  ;;  %v1369_v37 = vmul.f32 0.0026041667, %v1186_v1  ;;  %v1439_v4 = vadd.f32 1e-05, %v1367_v16 }
 0x1f6   :  { %v2064_v21 = vadd.f32 %v5027_v15, %v1831_v19  ;;  %v2067_v26 = vadd.f32 %v5027_v15, %v1834_v44  ;;  %v1618_v61 = vmul.f32 %v5776_v46, %v7387_v53  ;;  %v1621_v0 = vmul.f32 %v5800_v23, %v7388_v36  ;;  %v7390_v1 = vld [vmem:[#allocation104_spill] sm:$0xff]  ;;  %v7391_v41 = vld [vmem:[#allocation91_spill] sm:$0xff]  ;;  %v7392_v44 = vld [vmem:[#allocation94_spill] sm:$0xff] }
 0x1f7   :  { %v5859_v49 = vpop.eup %3719  ;;  %v2070_v62 = vadd.f32 %v5027_v15, %v1837_v22  ;;  %v1438_v17 = vadd.f32 1e-05, %v1366_v38  ;;  %v1441_v39 = vadd.f32 1e-05, %v1369_v37  ;;  %3727 = vrsqrt.f32 %v1439_v4  ;;  %v7393_v38 = vld [vmem:[#allocation97_spill] sm:$0xff] }
 0x1f8   :  { %v2256_v58 = vpack.c.bf16 %v2064_v21, %v2061_v57  ;;  %v1851_v11 = vmul.f32 %v5060_v14, %v1618_v61  ;;  %v1368_v33 = vmul.f32 0.0026041667, %v1182_v8  ;;  %v1854_v5 = vmul.f32 %v5060_v14, %v1621_v0  ;;  %v1190_v57 = vpop.xlane.xlu1 %1189  ;;  %v7394_v8 = vld [vmem:[#allocation102_spill] sm:$0xff]  ;;  %v7395_v0 = vld [vmem:[#allocation107_spill] sm:$0xff] }
 0x1f9   :  { %v2259_v32 = vpack.c.bf16 %v2070_v62, %v2067_v26  ;;  %3729 = vrsqrt.f32 %v1438_v17  ;;  %v1617_v59 = vmul.f32 %v5776_v46, %v7389_v25  ;;  %v1620_v28 = vmul.f32 %v5800_v23, %v7390_v1 }
 0x1fa   :  { %v5868_v54 = vpop.eup %3721  ;;  %3510 = vmatmul.mubr.bf16.gmra.mrb[48].mxu1 %v2256_v58  ;;  %3731 = vrsqrt.f32 %v1441_v39  ;;  %v2084_v2 = vadd.f32 %v5068_v18, %v1851_v11  ;;  %v1440_v50 = vadd.f32 1e-05, %v1368_v33  ;;  %v2087_v3 = vadd.f32 %v5068_v18, %v1854_v5  ;;  %v7396_v11 = vld [vmem:[#allocation114_spill] sm:$0xff] }
 0x1fb   :  { %3513 = vmatprep.mubr.bf16.mxu1 %v2259_v32  ;;  %v1850_v20 = vmul.f32 %v5063_v47, %v1617_v59  ;;  %v1607_v19 = vmul.f32 %v5546_v6, %v7391_v41  ;;  %v1610_v16 = vmul.f32 %v5610_v60, %v7392_v44  ;;  %v1853_v22 = vmul.f32 %v5063_v47, %v1620_v28  ;;  %v7397_v28 = vld [vmem:[#allocation106_spill] sm:$0xff] }
 0x1fc   :  { %3733 = vrsqrt.f32 %v1440_v50  ;;  %v1613_v37 = vmul.f32 %v5645_v30, %v7393_v38  ;;  %v1616_v21 = vmul.f32 %v5715_v7, %v7394_v8  ;;  %v2267_v4 = vpack.c.bf16 %v2087_v3, %v2084_v2 }
 0x1fd   :  { %v5884_v26 = vpop.eup %3723  ;;  %v2083_v53 = vadd.f32 %v5075_v35, %v1850_v20  ;;  %v1840_v6 = vmul.f32 %v7347_v63, %v1607_v19  ;;  %v1843_v61 = vmul.f32 %v7347_v63, %v1610_v16  ;;  %v2086_v62 = vadd.f32 %v5075_v35, %v1853_v22  ;;  %v7398_v19 = vld [vmem:[#allocation113_spill] sm:$0xff]  ;;  %v7399_v16 = vld [vmem:[#allocation103_spill] sm:$0xff] }
 0x1fe   :  { %v5889_v60 = vpop.eup %3725  ;;  %v1846_v17 = vmul.f32 %v7347_v63, %v1613_v37  ;;  %v1849_v30 = vmul.f32 %v7347_v63, %v1616_v21  ;;  %v1370_v39 = vmul.f32 0.0026041667, %v1190_v57  ;;  %2653 = vmatprep.mubr.bf16.mxu0 %v2267_v4  ;;  %v1624_v58 = vmul.f32 %v5831_v52, %v7395_v0  ;;  %v7400_v21 = vld [vmem:[#allocation108_spill] sm:$0xff]  ;;  %v7403_v0 = vld [vmem:[#allocation111_spill] sm:$0xff] }
 0x1ff   :  { %v2073_v7 = vadd.f32 %v5027_v15, %v1840_v6  ;;  %v2076_v36 = vadd.f32 %v5027_v15, %v1843_v61  ;;  %v1627_v33 = vmul.f32 %v5849_v12, %v7396_v11  ;;  %v2266_v32 = vpack.c.bf16 %v2086_v62, %v2083_v53 }
 0x200   :  { %v2079_v5 = vadd.f32 %v5027_v15, %v1846_v17  ;;  %v2082_v25 = vadd.f32 %v5027_v15, %v1849_v30  ;;  %v1442_v59 = vadd.f32 1e-05, %v1370_v39  ;;  %v1857_v50 = vmul.f32 %v5060_v14, %v1624_v58  ;;  %v7402_v17 = vld [vmem:[#allocation115_spill] sm:$0xff] }
 0x201   :  { %v2262_v2 = vpack.c.bf16 %v2076_v36, %v2073_v7  ;;  %v1860_v1 = vmul.f32 %v5060_v14, %v1627_v33  ;;  %v1623_v3 = vmul.f32 %v5831_v52, %v7397_v28  ;;  %v5906_v20 = vpop.eup %3727  ;;  %2654 = vmatmul.mubr.bf16.gmra.mrb[44].mxu0 %v2266_v32  ;;  %v1626_v44 = vmul.f32 %v5849_v12, %v7398_v19 }
 0x202   :  { %v2265_v41 = vpack.c.bf16 %v2082_v25, %v2079_v5  ;;  %3735 = vrsqrt.f32 %v1442_v59  ;;  %v1619_v57 = vmul.f32 %v5776_v46, %v7399_v16  ;;  %v2090_v38 = vadd.f32 %v5068_v18, %v1857_v50  ;;  %v7401_v46 = vld [vmem:[#allocation109_spill] sm:$0xff]  ;;  %v7404_v5 = vld [vmem:[#allocation120_spill] sm:$0xff] }
 0x203   :  { %v5912_v22 = vpop.eup %3729  ;;  %3514 = vmatmul.mubr.bf16.gmra.mrb[52].mxu1 %v2262_v2  ;;  %v2093_v37 = vadd.f32 %v5068_v18, %v1860_v1  ;;  %v1856_v8 = vmul.f32 %v5063_v47, %v1623_v3  ;;  %v1622_v4 = vmul.f32 %v5800_v23, %v7400_v21  ;;  %v1859_v6 = vmul.f32 %v5063_v47, %v1626_v44  ;;  %v7405_v2 = vld [vmem:[#allocation110_spill] sm:$0xff]  ;;  %v7407_v21 = vld [vmem:[#allocation112_spill] sm:$0xff] }
 0x204   :  { %v5919_v53 = vpop.eup %3731  ;;  %3517 = vmatprep.mubr.bf16.mxu1 %v2265_v41  ;;  %v1852_v61 = vmul.f32 %v7347_v63, %v1619_v57  ;;  %v1625_v62 = vmul.f32 %v5831_v52, %v7401_v46  ;;  %v1628_v30 = vmul.f32 %v5849_v12, %v7402_v17  ;;  %v1630_v23 = vmul.f32 %v5844_v24, %v7403_v0  ;;  %v7406_v41 = vld [vmem:[#allocation119_spill] sm:$0xff]  ;;  %v7409_v17 = vld [vmem:[#allocation117_spill] sm:$0xff] }
 0x205   :  { %v2270_v39 = vpack.c.bf16 %v2093_v37, %v2090_v38  ;;  %v2089_v7 = vadd.f32 %v5075_v35, %v1856_v8  ;;  %v1855_v36 = vmul.f32 %v7347_v63, %v1622_v4  ;;  %v2092_v11 = vadd.f32 %v5075_v35, %v1859_v6  ;;  %v7408_v6 = vld [vmem:[#allocation121_spill] sm:$0xff] }
 0x206   :  { %v5931_v58 = vpop.eup %3733  ;;  %v2085_v33 = vadd.f32 %v5027_v15, %v1852_v61  ;;  %v1858_v32 = vmul.f32 %v7347_v63, %v1625_v62  ;;  %v1861_v52 = vmul.f32 %v7347_v63, %v1628_v30  ;;  %v1633_v25 = vmul.f32 %v5868_v54, %v7404_v5 }
 0x207   :  { %2661 = vmatprep.mubr.bf16.mxu0 %v2270_v39  ;;  %v2088_v12 = vadd.f32 %v5027_v15, %v1855_v36  ;;  %v1863_v59 = vmul.f32 %v5060_v14, %v1630_v23  ;;  %v1629_v50 = vmul.f32 %v5844_v24, %v7405_v2  ;;  %v2269_v1 = vpack.c.bf16 %v2092_v11, %v2089_v7  ;;  %v7410_v39 = vld [vmem:[#allocation125_spill] sm:$0xff]  ;;  %v7411_v23 = vld [vmem:[#allocation118_spill] sm:$0xff] }
 0x208   :  { %v2091_v28 = vadd.f32 %v5027_v15, %v1858_v32  ;;  %v2094_v3 = vadd.f32 %v5027_v15, %v1861_v52  ;;  %v1632_v19 = vmul.f32 %v5868_v54, %v7406_v41  ;;  %v1866_v16 = vmul.f32 %v5060_v14, %v1633_v25 }
 0x209   :  { %v2268_v44 = vpack.c.bf16 %v2088_v12, %v2085_v33  ;;  %v2096_v57 = vadd.f32 %v5068_v18, %v1863_v59  ;;  %v1862_v38 = vmul.f32 %v5063_v47, %v1629_v50  ;;  %2662 = vmatmul.mubr.bf16.gmra.mrb[48].mxu0 %v2269_v1  ;;  %v1631_v4 = vmul.f32 %v5844_v24, %v7407_v21 }
 0x20a   :  { %v2271_v37 = vpack.c.bf16 %v2094_v3, %v2091_v28  ;;  %v1865_v8 = vmul.f32 %v5063_v47, %v1632_v19  ;;  %v1634_v61 = vmul.f32 %v5868_v54, %v7408_v6  ;;  %v2099_v46 = vadd.f32 %v5068_v18, %v1866_v16  ;;  %v7412_v3 = vld [vmem:[#allocation116_spill] sm:$0xff] }
 0x20b   :  { %3518 = vmatmul.mubr.bf16.gmra.mrb[56].mxu1 %v2268_v44  ;;  %v2095_v62 = vadd.f32 %v5075_v35, %v1862_v38  ;;  %v1636_v30 = vmul.f32 %v5859_v49, %v7409_v17  ;;  %v1639_v7 = vmul.f32 %v5889_v60, %v7410_v39  ;;  %v1864_v24 = vmul.f32 %v7347_v63, %v1631_v4  ;;  %v7413_v44 = vld [vmem:[#allocation124_spill] sm:$0xff] }
 0x20c   :  { %v5961_v36 = vpop.eup %3735  ;;  %3521 = vmatprep.mubr.bf16.mxu1 %v2271_v37  ;;  %v2098_v0 = vadd.f32 %v5075_v35, %v1865_v8  ;;  %v1867_v54 = vmul.f32 %v7347_v63, %v1634_v61  ;;  %v1637_v11 = vmul.f32 %v5859_v49, %v7411_v23  ;;  %v2273_v33 = vpack.c.bf16 %v2099_v46, %v2096_v57  ;;  %v7414_v57 = vld [vmem:[#allocation126_spill] sm:$0xff]  ;;  %v7415_v61 = vld [vmem:[#allocation123_spill] sm:$0xff] }
 0x20d   :  { %v1869_v32 = vmul.f32 %v5060_v14, %v1636_v30  ;;  %v1872_v52 = vmul.f32 %v5060_v14, %v1639_v7  ;;  %v1640_v12 = vmul.f32 %v5889_v60, %v4954_v10  ;;  %v2097_v25 = vadd.f32 %v5027_v15, %v1864_v24 }
 0x20e   :  { %v2272_v5 = vpack.c.bf16 %v2098_v0, %v2095_v62  ;;  %v2100_v59 = vadd.f32 %v5027_v15, %v1867_v54  ;;  %v1870_v2 = vmul.f32 %v7347_v63, %v1637_v11  ;;  %2669 = vmatprep.mubr.bf16.mxu0 %v2273_v33  ;;  %v1635_v41 = vmul.f32 %v5859_v49, %v7412_v3  ;;  %v7416_v11 = vld [vmem:[#allocation122_spill] sm:$0xff]  ;;  %v7419_v3 = vld [vmem:[#allocation128_spill] sm:$0xff] }
 0x20f   :  { %v2102_v50 = vadd.f32 %v5068_v18, %v1869_v32  ;;  %v2105_v1 = vadd.f32 %v5068_v18, %v1872_v52  ;;  %v1873_v28 = vmul.f32 %v7347_v63, %v1640_v12  ;;  %v1638_v16 = vmul.f32 %v5889_v60, %v7413_v44  ;;  %v7417_v32 = vld [vmem:[#allocation129_spill] sm:$0xff]  ;;  %v7420_v44 = vld [vmem:[#allocation134_spill] sm:$0xff] }
 0x210   :  { %v2274_v19 = vpack.c.bf16 %v2100_v59, %v2097_v25  ;;  %v2103_v10 = vadd.f32 %v5027_v15, %v1870_v2  ;;  %v1643_v38 = vmul.f32 %v5884_v26, %v7414_v57  ;;  %v1868_v21 = vmul.f32 %v5063_v47, %v1635_v41 }
 0x211   :  { %v2276_v37 = vpack.c.bf16 %v2105_v1, %v2102_v50  ;;  %v2106_v8 = vadd.f32 %v5027_v15, %v1873_v28  ;;  %v1646_v4 = vmul.f32 %v5912_v22, %v4999_v29  ;;  %2670 = vmatmul.mubr.bf16.gmra.mrb[52].mxu0 %v2272_v5  ;;  %v1871_v49 = vmul.f32 %v5063_v47, %v1638_v16  ;;  %v7418_v50 = vld [vmem:[#allocation137_spill] sm:$0xff] }
 0x212   :  { %v1876_v6 = vmul.f32 %v7347_v63, %v1643_v38  ;;  %v1642_v46 = vmul.f32 %v5884_v26, %v7415_v61  ;;  %v1645_v60 = vmul.f32 %v5912_v22, %v4988_v55  ;;  %v2101_v7 = vadd.f32 %v5075_v35, %v1868_v21 }
 0x213   :  { %3522 = vmatmul.mubr.bf16.gmra.mrb[60].mxu1 %v2274_v19  ;;  %2677 = vmatprep.mubr.bf16.mxu0 %v2276_v37  ;;  %v2277_v62 = vpack.c.bf16 %v2106_v8, %v2103_v10  ;;  %v1879_v17 = vmul.f32 %v7347_v63, %v1646_v4  ;;  %v2104_v30 = vadd.f32 %v5075_v35, %v1871_v49  ;;  %v7421_v4 = vld [vmem:[#allocation133_spill] sm:$0xff] }
 0x214   :  { %v1875_v29 = vmul.f32 %v5060_v14, %v1642_v46  ;;  %v1878_v39 = vmul.f32 %v5060_v14, %v1645_v60  ;;  %v1649_v24 = vmul.f32 %v5906_v20, %v4984_v48  ;;  %v1652_v55 = vmul.f32 %v5931_v58, %v5024_v27  ;;  %v7422_v46 = vld [vmem:[#allocation127_spill] sm:$0xff] }
 0x215   :  { %3525 = vmatprep.mubr.bf16.mxu1 %v2277_v62  ;;  %v2112_v0 = vadd.f32 %v5027_v15, %v1879_v17  ;;  %v2109_v54 = vadd.f32 %v5027_v15, %v1876_v6  ;;  %v1641_v33 = vmul.f32 %v5884_v26, %v7416_v11  ;;  %v1644_v52 = vmul.f32 %v5912_v22, %v7417_v32  ;;  %v7423_v62 = vld [vmem:[#allocation136_spill] sm:$0xff] }
 0x216   :  { %v2111_v23 = vadd.f32 %v5068_v18, %v1878_v39  ;;  %v2275_v12 = vpack.c.bf16 %v2104_v30, %v2101_v7  ;;  %v2108_v5 = vadd.f32 %v5068_v18, %v1875_v29  ;;  %v1882_v25 = vmul.f32 %v7347_v63, %v1649_v24  ;;  %v7424_v39 = vld [vmem:[#allocation132_spill] sm:$0xff] }
 0x217   :  { %v1885_v48 = vmul.f32 %v7347_v63, %v1652_v55  ;;  %v2280_v59 = vpack.c.bf16 %v2112_v0, %v2109_v54  ;;  %v1877_v27 = vmul.f32 %v5063_v47, %v1644_v52  ;;  %v1655_v2 = vmul.f32 %v5919_v53, %v5022_v56 }
 0x218   :  { %v1658_v1 = vmul.f32 %v5961_v36, %v7418_v50  ;;  %v2279_v26 = vpack.c.bf16 %v2111_v23, %v2108_v5  ;;  %v2115_v28 = vadd.f32 %v5027_v15, %v1882_v25  ;;  %v1648_v41 = vmul.f32 %v5906_v20, %v7419_v3  ;;  %v7426_v5 = vld [vmem:[#allocation131_spill] sm:$0xff] }
 0x219   :  { %v2118_v22 = vadd.f32 %v5027_v15, %v1885_v48  ;;  %2678 = vmatmul.mubr.bf16.gmra.mrb[56].mxu0 %v2275_v12  ;;  %v1874_v19 = vmul.f32 %v5063_v47, %v1641_v33  ;;  %v1651_v16 = vmul.f32 %v5931_v58, %v7420_v44  ;;  %v1888_v57 = vmul.f32 %v7347_v63, %v1655_v2  ;;  %v7425_v33 = vld [vmem:[#allocation135_spill] sm:$0xff] }
 0x21a   :  { %v1891_v10 = vmul.f32 %v7347_v63, %v1658_v1  ;;  %2685 = vmatprep.mubr.bf16.mxu0 %v2279_v26  ;;  %v1881_v38 = vmul.f32 %v5060_v14, %v1648_v41  ;;  %v2110_v37 = vadd.f32 %v5075_v35, %v1877_v27  ;;  %v1650_v49 = vmul.f32 %v5931_v58, %v7421_v4 }
 0x21b   :  { %3526 = vmatmul.mubr.bf16.gmra.mrb[64].mxu1 %v2280_v59  ;;  %v2283_v56 = vpack.c.bf16 %v2118_v22, %v2115_v28  ;;  %v1884_v8 = vmul.f32 %v5060_v14, %v1651_v16  ;;  %v2107_v6 = vadd.f32 %v5075_v35, %v1874_v19  ;;  %v1647_v60 = vmul.f32 %v5906_v20, %v7422_v46  ;;  %v7427_v46 = vld [vmem:[#allocation11_spill] sm:$0xff] }
 0x21c   :  { %v2124_v21 = vadd.f32 %v5027_v15, %v1891_v10  ;;  %v1657_v17 = vmul.f32 %v5961_v36, %v7423_v62  ;;  %v2121_v30 = vadd.f32 %v5027_v15, %v1888_v57  ;;  %v2114_v29 = vadd.f32 %v5068_v18, %v1881_v38  ;;  %v7428_v62 = vld [vmem:[#allocation13_spill] sm:$0xff] }
 0x21d   :  { %3529 = vmatprep.mubr.bf16.mxu1 %v2283_v56  ;;  %v2117_v61 = vadd.f32 %v5068_v18, %v1884_v8  ;;  %v1654_v7 = vmul.f32 %v5919_v53, %v7424_v39  ;;  %v2278_v0 = vpack.c.bf16 %v2110_v37, %v2107_v6  ;;  %v1883_v58 = vmul.f32 %v5063_v47, %v1650_v49 }
 0x21e   :  { %v2286_v24 = vpack.c.bf16 %v2124_v21, %v2121_v30  ;;  %v1890_v54 = vmul.f32 %v5060_v14, %v1657_v17  ;;  %v1880_v20 = vmul.f32 %v5063_v47, %v1647_v60  ;;  %v1656_v32 = vmul.f32 %v5961_v36, %v7425_v33  ;;  %v7429_v30 = vld [vmem:[#allocation14_spill] sm:$0xff] }
 0x21f   :  { %v2282_v55 = vpack.c.bf16 %v2117_v61, %v2114_v29  ;;  %v1887_v23 = vmul.f32 %v5060_v14, %v1654_v7  ;;  %v2116_v11 = vadd.f32 %v5075_v35, %v1883_v58  ;;  %v1653_v25 = vmul.f32 %v5919_v53, %v7426_v5 }
 0x220   :  { %v2123_v52 = vadd.f32 %v5068_v18, %v1890_v54  ;;  %v2113_v12 = vadd.f32 %v5075_v35, %v1880_v20  ;;  %v1889_v27 = vmul.f32 %v5063_v47, %v1656_v32  ;;  %v7430_v32 = vld [vmem:[#allocation21_spill] sm:$0xff] }
 0x221   :  { %2686 = vmatmul.mubr.bf16.gmra.mrb[60].mxu0 %v2278_v0  ;;  %v2120_v48 = vadd.f32 %v5068_v18, %v1887_v23  ;;  %v1886_v50 = vmul.f32 %v5063_v47, %v1653_v25  ;;  %v7432_v25 = vld [vmem:[#allocation24_spill] sm:$0xff] }
 0x222   :  { %2693 = vmatprep.mubr.bf16.mxu0 %v2282_v55  ;;  %v2281_v59 = vpack.c.bf16 %v2116_v11, %v2113_v12  ;;  %v2122_v1 = vadd.f32 %v5075_v35, %v1889_v27  ;;  %v7431_v12 = vld [vmem:[#allocation23_spill] sm:$0xff]  ;;  %v7433_v27 = vld [vmem:[#allocation18_spill] sm:$0xff] }
 0x223   :  { %3530 = vmatmul.mubr.bf16.gmra.mrb[68].mxu1 %v2286_v24  ;;  %v2285_v2 = vpack.c.bf16 %v2123_v52, %v2120_v48  ;;  %v2119_v28 = vadd.f32 %v5075_v35, %v1886_v50  ;;  %v7434_v50 = vld [vmem:[#allocation22_spill] sm:$0xff] }
 0x225   :  { %v2284_v3 = vpack.c.bf16 %v2122_v1, %v2119_v28 }
 0x229   :  { %2694 = vmatmul.mubr.bf16.gmra.mrb[64].mxu0 %v2281_v59 }
 0x22a   :  { %2701 = vmatprep.mubr.bf16.mxu0 %v2285_v2  ;;  %v1194_v36 = vpop.xlane.xlu0 %1193 }
 0x22b   :  { %v1371_v26 = vmul.f32 0.0026041667, %v1194_v36 }
 0x22d   :  { %v1443_v22 = vadd.f32 1e-05, %v1371_v26 }
 0x22f   :  { %3737 = vrsqrt.f32 %v1443_v22  ;;  %v1202_v53 = vpop.xlane.xlu0 %1201 }
 0x230   :  { %v1373_v41 = vmul.f32 0.0026041667, %v1202_v53  ;;  %v1198_v19 = vpop.xlane.xlu1 %1197  ;;  %v6060_v56 = vpop.f32.mrb[0].mxu1 }
 0x231   :  { %2702 = vmatmul.mubr.bf16.gmra.mrb[68].mxu0 %v2284_v3  ;;  %v1372_v10 = vmul.f32 0.0026041667, %v1198_v19  ;;  %v2785_v57 = vpop.f32.mrb[1].mxu1 }
 0x232   :  { %v1445_v44 = vadd.f32 1e-05, %v1373_v41  ;;  %v6062_v37 = vpop.f32.mrb[2].mxu1 }
 0x233   :  { %v1444_v16 = vadd.f32 1e-05, %v1372_v10  ;;  %v2788_v21 = vpop.f32.mrb[3].mxu1 }
 0x234   :  { %3739 = vrsqrt.f32 %v1445_v44  ;;  %v6064_v6 = vpop.f32.mrb[0].mxu0  ;;  %v7435_v44 = vld [vmem:[#allocation16_spill] sm:$0xff] }
 0x235   :  { %3741 = vrsqrt.f32 %v1444_v16  ;;  %v2569_v61 = vpop.f32.mrb[1].mxu0 }
 0x236   :  { %v6069_v39 = vpop.f32.mrb[2].mxu0 }
 0x237   :  { %v1206_v38 = vpop.xlane.xlu1 %1205  ;;  %v2572_v7 = vpop.f32.mrb[3].mxu0 }
 0x238   :  { %v1374_v8 = vmul.f32 0.0026041667, %v1206_v38  ;;  %v6071_v0 = vpop.f32.mrb[4].mxu1 }
 0x239   :  { %v3738_v4 = vpop.eup %3737  ;;  %v2793_v58 = vpop.f32.mrb[5].mxu1 }
 0x23a   :  { %v1446_v49 = vadd.f32 1e-05, %v1374_v8  ;;  %v1660_v60 = vmul.f32 %v3738_v4, %v7427_v46  ;;  %v1661_v17 = vmul.f32 %v3738_v4, %v7428_v62  ;;  %v1659_v29 = vmul.f32 %v3738_v4, %v7429_v30  ;;  %v6073_v55 = vpop.f32.mrb[6].mxu1  ;;  %v7436_v58 = vld [vmem:[#allocation38_spill] sm:$0xff] }
 0x23b   :  { %v2796_v33 = vpop.f32.mrb[7].mxu1 }
 0x23c   :  { %3743 = vrsqrt.f32 %v1446_v49  ;;  %v1893_v20 = vmul.f32 %v5060_v14, %v1660_v60  ;;  %v1894_v23 = vmul.f32 %v7347_v63, %v1661_v17  ;;  %v1892_v11 = vmul.f32 %v5063_v47, %v1659_v29 }
 0x23d   :  { %v6086_v3 = vpop.f32.mrb[4].mxu0 }
 0x23e   :  { %v3740_v24 = vpop.eup %3739  ;;  %v2126_v53 = vadd.f32 %v5068_v18, %v1893_v20  ;;  %v2127_v41 = vadd.f32 %v5027_v15, %v1894_v23  ;;  %v2125_v19 = vadd.f32 %v5075_v35, %v1892_v11  ;;  %v2577_v10 = vpop.f32.mrb[5].mxu0  ;;  %v7438_v23 = vld [vmem:[#allocation41_spill] sm:$0xff] }
 0x23f   :  { %v3742_v54 = vpop.eup %3741  ;;  %v1666_v2 = vmul.f32 %v3740_v24, %v7433_v27  ;;  %v1667_v1 = vmul.f32 %v3740_v24, %v7434_v50  ;;  %v1665_v16 = vmul.f32 %v3740_v24, %v7435_v44  ;;  %v6095_v4 = vpop.f32.mrb[6].mxu0 }
 0x240   :  { %v1663_v52 = vmul.f32 %v3742_v54, %v7430_v32  ;;  %v1664_v5 = vmul.f32 %v3742_v54, %v7431_v12  ;;  %v1662_v48 = vmul.f32 %v3742_v54, %v7432_v25  ;;  %v2580_v60 = vpop.f32.mrb[7].mxu0  ;;  %v7437_v54 = vld [vmem:[#allocation40_spill] sm:$0xff] }
 0x241   :  { %v1899_v61 = vmul.f32 %v5060_v14, %v1666_v2  ;;  %v1900_v46 = vmul.f32 %v7347_v63, %v1667_v1  ;;  %v7439_v60 = vld [vmem:[#allocation47_spill] sm:$0xff] }
 0x242   :  { %v1210_v59 = vpop.xlane.xlu0 %1209  ;;  %v1896_v26 = vmul.f32 %v5060_v14, %v1663_v52  ;;  %v1897_v28 = vmul.f32 %v7347_v63, %v1664_v5  ;;  %v1895_v22 = vmul.f32 %v5063_v47, %v1662_v48  ;;  %v1898_v52 = vmul.f32 %v5063_v47, %v1665_v16 }
 0x243   :  { %v1375_v36 = vmul.f32 0.0026041667, %v1210_v59  ;;  %v6102_v33 = vpop.f32.mrb[8].mxu1  ;;  %v2132_v2 = vadd.f32 %v5068_v18, %v1899_v61  ;;  %v2133_v50 = vadd.f32 %v5027_v15, %v1900_v46 }
 0x244   :  { %v2129_v38 = vadd.f32 %v5068_v18, %v1896_v26  ;;  %v2130_v8 = vadd.f32 %v5027_v15, %v1897_v28  ;;  %v2128_v21 = vadd.f32 %v5075_v35, %v1895_v22  ;;  %v2801_v12 = vpop.f32.mrb[9].mxu1 }
 0x245   :  { %v1447_v57 = vadd.f32 1e-05, %v1375_v36  ;;  %v6107_v27 = vpop.f32.mrb[10].mxu1 }
 0x246   :  { %v3744_v49 = vpop.eup %3743  ;;  %v2288_v17 = vpack.c.bf16 %v2129_v38, %v2126_v53  ;;  %v2289_v30 = vpack.c.bf16 %v2130_v8, %v2127_v41  ;;  %v2287_v29 = vpack.c.bf16 %v2128_v21, %v2125_v19  ;;  %v2804_v36 = vpop.f32.mrb[11].mxu1  ;;  %v2131_v41 = vadd.f32 %v5075_v35, %v1898_v52 }
 0x247   :  { %3745 = vrsqrt.f32 %v1447_v57  ;;  %v1218_v62 = vpop.xlane.xlu0 %1217  ;;  %v1669_v24 = vmul.f32 %v3744_v49, %v7436_v58  ;;  %v1670_v20 = vmul.f32 %v3744_v49, %v7437_v54  ;;  %v1668_v11 = vmul.f32 %v3744_v49, %v7438_v23 }
 0x248   :  { %v1377_v7 = vmul.f32 0.0026041667, %v1218_v62  ;;  %2709 = vmatprep.mubr.bf16.mxu0 %v2288_v17  ;;  %3533 = vmatprep.mubr.bf16.mxu1 %v2289_v30  ;;  %v6116_v10 = vpop.f32.mrb[8].mxu0  ;;  %v7440_v17 = vld [vmem:[#allocation44_spill] sm:$0xff] }
 0x249   :  { %v1214_v32 = vpop.xlane.xlu1 %1213  ;;  %2710 = vmatmul.mubr.bf16.gmra.mrb[72].mxu0 %v2287_v29  ;;  %v1902_v48 = vmul.f32 %v5060_v14, %v1669_v24  ;;  %v1903_v59 = vmul.f32 %v7347_v63, %v1670_v20  ;;  %v1901_v1 = vmul.f32 %v5063_v47, %v1668_v11  ;;  %v2585_v38 = vpop.f32.mrb[9].mxu0  ;;  %v7441_v29 = vld [vmem:[#allocation45_spill] sm:$0xff] }
 0x24a   :  { %v1449_v5 = vadd.f32 1e-05, %v1377_v7  ;;  %v1376_v25 = vmul.f32 0.0026041667, %v1214_v32  ;;  %v6118_v8 = vpop.f32.mrb[10].mxu0 }
 0x24b   :  { %v2135_v28 = vadd.f32 %v5068_v18, %v1902_v48  ;;  %v2136_v22 = vadd.f32 %v5027_v15, %v1903_v59  ;;  %v2134_v19 = vadd.f32 %v5075_v35, %v1901_v1  ;;  %v2588_v61 = vpop.f32.mrb[11].mxu0  ;;  %v7443_v1 = vld [vmem:[#allocation49_spill] sm:$0xff] }
 0x24c   :  { %3747 = vrsqrt.f32 %v1449_v5  ;;  %v1448_v26 = vadd.f32 1e-05, %v1376_v25 }
 0x24d   :  { %v1222_v53 = vpop.xlane.xlu1 %1221  ;;  %v2291_v16 = vpack.c.bf16 %v2135_v28, %v2132_v2  ;;  %v2292_v57 = vpack.c.bf16 %v2136_v22, %v2133_v50  ;;  %v2290_v49 = vpack.c.bf16 %v2134_v19, %v2131_v41  ;;  %v6123_v58 = vpop.f32.mrb[12].mxu1  ;;  %v7442_v2 = vld [vmem:[#allocation53_spill] sm:$0xff]  ;;  %v7444_v28 = vld [vmem:[#allocation58_spill] sm:$0xff]  ;;  %v7446_v19 = vld [vmem:[#allocation56_spill] sm:$0xff] }
 0x24e   :  { %3749 = vrsqrt.f32 %v1448_v26  ;;  %v1378_v44 = vmul.f32 0.0026041667, %v1222_v53  ;;  %v2809_v24 = vpop.f32.mrb[13].mxu1  ;;  %v7445_v53 = vld [vmem:[#allocation55_spill] sm:$0xff] }
 0x24f   :  { %2717 = vmatprep.mubr.bf16.mxu0 %v2291_v16  ;;  %3534 = vmatmul.mubr.bf16.gmra.mrb[72].mxu1 %v2292_v57  ;;  %v6125_v20 = vpop.f32.mrb[14].mxu1 }
 0x250   :  { %v1450_v21 = vadd.f32 1e-05, %v1378_v44  ;;  %v2812_v11 = vpop.f32.mrb[15].mxu1 }
 0x251   :  { %v3746_v46 = vpop.eup %3745  ;;  %2718 = vmatmul.mubr.bf16.gmra.mrb[76].mxu0 %v2290_v49 }
 0x252   :  { %3751 = vrsqrt.f32 %v1450_v21  ;;  %v1672_v62 = vmul.f32 %v3746_v46, %v7439_v60  ;;  %v1673_v30 = vmul.f32 %v3746_v46, %v7440_v17  ;;  %v1671_v7 = vmul.f32 %v3746_v46, %v7441_v29 }
 0x254   :  { %v1226_v54 = vpop.xlane.xlu0 %1225  ;;  %v1905_v52 = vmul.f32 %v5060_v14, %v1672_v62  ;;  %v1906_v12 = vmul.f32 %v7347_v63, %v1673_v30  ;;  %v1904_v5 = vmul.f32 %v5063_v47, %v1671_v7  ;;  %v6130_v48 = vpop.f32.mrb[12].mxu0 }
 0x255   :  { %v1379_v23 = vmul.f32 0.0026041667, %v1226_v54  ;;  %v2593_v26 = vpop.f32.mrb[13].mxu0 }
 0x256   :  { %v3748_v32 = vpop.eup %3747  ;;  %v6137_v16 = vpop.f32.mrb[14].mxu0  ;;  %v2138_v38 = vadd.f32 %v5068_v18, %v1905_v52  ;;  %v2139_v21 = vadd.f32 %v5027_v15, %v1906_v12  ;;  %v2137_v49 = vadd.f32 %v5075_v35, %v1904_v5  ;;  %v7448_v26 = vld [vmem:[#allocation62_spill] sm:$0xff] }
 0x257   :  { %v1451_v25 = vadd.f32 1e-05, %v1379_v23  ;;  %v1678_v50 = vmul.f32 %v3748_v32, %v7442_v2  ;;  %v1679_v36 = vmul.f32 %v3748_v32, %v7443_v1  ;;  %v2596_v61 = vpop.f32.mrb[15].mxu0  ;;  %v7447_v23 = vld [vmem:[#allocation50_spill] sm:$0xff] }
 0x258   :  { %v3750_v59 = vpop.eup %3749  ;;  %v1677_v11 = vmul.f32 %v3748_v32, %v7447_v23 }
 0x259   :  { %3753 = vrsqrt.f32 %v1451_v25  ;;  %v1675_v22 = vmul.f32 %v3750_v59, %v7444_v28  ;;  %v1676_v41 = vmul.f32 %v3750_v59, %v7445_v53  ;;  %v1674_v44 = vmul.f32 %v3750_v59, %v7446_v19  ;;  %v6148_v52 = vpop.f32.mrb[16].mxu1 }
 0x25a   :  { %v1911_v24 = vmul.f32 %v5060_v14, %v1678_v50  ;;  %v1912_v54 = vmul.f32 %v7347_v63, %v1679_v36  ;;  %v2817_v2 = vpop.f32.mrb[17].mxu1  ;;  %v7450_v50 = vld [vmem:[#allocation57_spill] sm:$0xff] }
 0x25b   :  { %v1234_v57 = vpop.xlane.xlu0 %1233  ;;  %v1908_v62 = vmul.f32 %v5060_v14, %v1675_v22  ;;  %v1909_v17 = vmul.f32 %v7347_v63, %v1676_v41  ;;  %v1907_v30 = vmul.f32 %v5063_v47, %v1674_v44  ;;  %v7449_v22 = vld [vmem:[#allocation64_spill] sm:$0xff]  ;;  %v6156_v36 = vpop.f32.mrb[18].mxu1 }
 0x25c   :  { %v1381_v46 = vmul.f32 0.0026041667, %v1234_v57  ;;  %v1230_v60 = vpop.xlane.xlu1 %1229  ;;  %v3752_v29 = vpop.eup %3751 }
 0x25d   :  { %v1380_v7 = vmul.f32 0.0026041667, %v1230_v60  ;;  %v2141_v5 = vadd.f32 %v5068_v18, %v1908_v62  ;;  %v2142_v25 = vadd.f32 %v5027_v15, %v1909_v17  ;;  %v2140_v59 = vadd.f32 %v5075_v35, %v1907_v30  ;;  %v2820_v57 = vpop.f32.mrb[19].mxu1 }
 0x25e   :  { %v1453_v12 = vadd.f32 1e-05, %v1381_v46  ;;  %v1681_v28 = vmul.f32 %v3752_v29, %v7448_v26  ;;  %v1682_v53 = vmul.f32 %v3752_v29, %v7449_v22  ;;  %v1680_v41 = vmul.f32 %v3752_v29, %v7450_v50 }
 0x25f   :  { %v1452_v1 = vadd.f32 1e-05, %v1380_v7  ;;  %v2294_v32 = vpack.c.bf16 %v2141_v5, %v2138_v38  ;;  %v2295_v19 = vpack.c.bf16 %v2142_v25, %v2139_v21  ;;  %v2293_v44 = vpack.c.bf16 %v2140_v59, %v2137_v49 }
 0x260   :  { %3755 = vrsqrt.f32 %v1453_v12  ;;  %v1914_v61 = vmul.f32 %v5060_v14, %v1681_v28  ;;  %v1915_v46 = vmul.f32 %v7347_v63, %v1682_v53  ;;  %v1913_v60 = vmul.f32 %v5063_v47, %v1680_v41  ;;  %v7452_v53 = vld [vmem:[#allocation68_spill] sm:$0xff]  ;;  %v7453_v41 = vld [vmem:[#allocation61_spill] sm:$0xff] }
 0x261   :  { %3757 = vrsqrt.f32 %v1452_v1  ;;  %2725 = vmatprep.mubr.bf16.mxu0 %v2294_v32  ;;  %3537 = vmatprep.mubr.bf16.mxu1 %v2295_v19  ;;  %v2144_v17 = vadd.f32 %v5068_v18, %v1911_v24  ;;  %v1910_v30 = vmul.f32 %v5063_v47, %v1677_v11  ;;  %v2145_v21 = vadd.f32 %v5027_v15, %v1912_v54  ;;  %v6166_v7 = vpop.f32.mrb[16].mxu0  ;;  %v7451_v54 = vld [vmem:[#allocation63_spill] sm:$0xff] }
 0x262   :  { %2726 = vmatmul.mubr.bf16.gmra.mrb[80].mxu0 %v2293_v44  ;;  %v2147_v38 = vadd.f32 %v5068_v18, %v1914_v61  ;;  %v2148_v49 = vadd.f32 %v5027_v15, %v1915_v46  ;;  %v2601_v12 = vpop.f32.mrb[17].mxu0  ;;  %v2146_v2 = vadd.f32 %v5075_v35, %v1913_v60 }
 0x263   :  { %v1238_v62 = vpop.xlane.xlu1 %1237  ;;  %v3754_v23 = vpop.eup %3753  ;;  %v2143_v1 = vadd.f32 %v5075_v35, %v1910_v30 }
 0x264   :  { %v1382_v29 = vmul.f32 0.0026041667, %v1238_v62  ;;  %v2297_v25 = vpack.c.bf16 %v2147_v38, %v2144_v17  ;;  %v2298_v59 = vpack.c.bf16 %v2148_v49, %v2145_v21  ;;  %v6169_v24 = vpop.f32.mrb[18].mxu0  ;;  %v1684_v22 = vmul.f32 %v3754_v23, %v7451_v54  ;;  %v7456_v49 = vld [vmem:[#allocation145_spill] sm:$0xff] }
 0x265   :  { %v2604_v26 = vpop.f32.mrb[19].mxu0  ;;  %v1685_v50 = vmul.f32 %v3754_v23, %v7452_v53  ;;  %v1683_v32 = vmul.f32 %v3754_v23, %v7453_v41  ;;  %v2296_v19 = vpack.c.bf16 %v2146_v2, %v2143_v1  ;;  %v7458_v2 = vld [vmem:[#allocation67_spill] sm:$0xff] }
 0x266   :  { %v1454_v5 = vadd.f32 1e-05, %v1382_v29  ;;  %2733 = vmatprep.mubr.bf16.mxu0 %v2297_v25  ;;  %3538 = vmatmul.mubr.bf16.gmra.mrb[76].mxu1 %v2298_v59  ;;  %v1917_v62 = vmul.f32 %v5060_v14, %v1684_v22  ;;  %v7455_v29 = vld [vmem:[#allocation146_spill] sm:$0xff]  ;;  %v7457_v25 = vld [vmem:[#allocation69_spill] sm:$0xff] }
 0x267   :  { %v1242_v11 = vpop.xlane.xlu0 %1241  ;;  %v6175_v44 = vpop.f32.mrb[20].mxu1  ;;  %v1918_v17 = vmul.f32 %v7347_v63, %v1685_v50  ;;  %v1916_v12 = vmul.f32 %v5063_v47, %v1683_v32 }
 0x268   :  { %3759 = vrsqrt.f32 %v1454_v5  ;;  %v1383_v28 = vmul.f32 0.0026041667, %v1242_v11  ;;  %v2825_v46 = vpop.f32.mrb[21].mxu1  ;;  %v2150_v54 = vadd.f32 %v5068_v18, %v1917_v62 }
 0x269   :  { %v6179_v30 = vpop.f32.mrb[22].mxu1  ;;  %v2149_v41 = vadd.f32 %v5075_v35, %v1916_v12 }
 0x26a   :  { %v3756_v57 = vpop.eup %3755  ;;  %v1455_v61 = vadd.f32 1e-05, %v1383_v28  ;;  %2734 = vmatmul.mubr.bf16.gmra.mrb[84].mxu0 %v2296_v19  ;;  %7454 = vst [vmem:[#allocation7_spill] sm:$0xff] %v6179_v30  ;;  %v2828_v5 = vpop.f32.mrb[23].mxu1 }
 0x26b   :  { %v3758_v60 = vpop.eup %3757  ;;  %v1691_v59 = vmul.f32 %v3756_v57, %v7457_v25  ;;  %v1690_v11 = vmul.f32 %v3756_v57, %v7458_v2  ;;  %v7460_v2 = vld [vmem:[#allocation83_spill] sm:$0xff] }
 0x26c   :  { %v1687_v38 = vmul.f32 %v3758_v60, %v7455_v29  ;;  %v1688_v21 = vmul.f32 %v3758_v60, %v5560_v34  ;;  %v1686_v23 = vmul.f32 %v3758_v60, %v7456_v49  ;;  %3761 = vrsqrt.f32 %v1455_v61 }
 0x26d   :  { %v2151_v34 = vadd.f32 %v5027_v15, %v1918_v17  ;;  %v1924_v60 = vmul.f32 %v7347_v63, %v1691_v59  ;;  %v1923_v29 = vmul.f32 %v5060_v14, %v1690_v11 }
 0x26e   :  { %v1920_v1 = vmul.f32 %v5060_v14, %v1687_v38  ;;  %v1921_v26 = vmul.f32 %v7347_v63, %v1688_v21  ;;  %v1919_v28 = vmul.f32 %v5063_v47, %v1686_v23  ;;  %v7459_v38 = vld [vmem:[#allocation70_spill] sm:$0xff] }
 0x26f   :  { %v1689_v62 = vmul.f32 %v3756_v57, %v7459_v38 }
 0x270   :  { %v1250_v22 = vpop.xlane.xlu0 %1249  ;;  %v2153_v53 = vadd.f32 %v5068_v18, %v1920_v1  ;;  %v2154_v50 = vadd.f32 %v5027_v15, %v1921_v26  ;;  %v2152_v32 = vadd.f32 %v5075_v35, %v1919_v28  ;;  %v7461_v26 = vld [vmem:[#allocation78_spill] sm:$0xff] }
 0x271   :  { %v1385_v61 = vmul.f32 0.0026041667, %v1250_v22  ;;  %v1246_v46 = vpop.xlane.xlu1 %1245 }
 0x272   :  { %v3760_v19 = vpop.eup %3759  ;;  %v1384_v21 = vmul.f32 0.0026041667, %v1246_v46  ;;  %v2300_v17 = vpack.c.bf16 %v2153_v53, %v2150_v54  ;;  %v2301_v49 = vpack.c.bf16 %v2154_v50, %v2151_v34  ;;  %v2299_v25 = vpack.c.bf16 %v2152_v32, %v2149_v41  ;;  %v6201_v1 = vpop.f32.mrb[20].mxu0 }
 0x273   :  { %v1694_v23 = vmul.f32 %v3760_v19, %v5592_v43  ;;  %v1457_v5 = vadd.f32 1e-05, %v1385_v61  ;;  %v1693_v12 = vmul.f32 %v3760_v19, %v7460_v2  ;;  %v1692_v28 = vmul.f32 %v3760_v19, %v7461_v26  ;;  %v2609_v11 = vpop.f32.mrb[21].mxu0 }
 0x274   :  { %v1456_v22 = vadd.f32 1e-05, %v1384_v21  ;;  %2741 = vmatprep.mubr.bf16.mxu0 %v2300_v17  ;;  %3541 = vmatprep.mubr.bf16.mxu1 %v2301_v49  ;;  %v1922_v43 = vmul.f32 %v5063_v47, %v1689_v62  ;;  %v6208_v53 = vpop.f32.mrb[22].mxu0  ;;  %v2157_v41 = vadd.f32 %v5027_v15, %v1924_v60  ;;  %v2156_v61 = vadd.f32 %v5068_v18, %v1923_v29 }
 0x275   :  { %v1927_v59 = vmul.f32 %v7347_v63, %v1694_v23  ;;  %3763 = vrsqrt.f32 %v1457_v5  ;;  %v1254_v57 = vpop.xlane.xlu1 %1253  ;;  %2742 = vmatmul.mubr.bf16.gmra.mrb[88].mxu0 %v2299_v25  ;;  %v1926_v54 = vmul.f32 %v5060_v14, %v1693_v12  ;;  %v1925_v34 = vmul.f32 %v5063_v47, %v1692_v28  ;;  %v2612_v19 = vpop.f32.mrb[23].mxu0 }
 0x276   :  { %3765 = vrsqrt.f32 %v1456_v22  ;;  %v1386_v50 = vmul.f32 0.0026041667, %v1254_v57  ;;  %v3762_v21 = vpop.eup %3761  ;;  %v2155_v2 = vadd.f32 %v5075_v35, %v1922_v43  ;;  %v7464_v57 = vld [vmem:[#allocation77_spill] sm:$0xff] }
 0x277   :  { %v2160_v32 = vadd.f32 %v5027_v15, %v1927_v59  ;;  %v2159_v46 = vadd.f32 %v5068_v18, %v1926_v54  ;;  %v2158_v38 = vadd.f32 %v5075_v35, %v1925_v34  ;;  %v6215_v23 = vpop.f32.mrb[24].mxu1  ;;  %v1697_v26 = vmul.f32 %v3762_v21, %v5629_v42  ;;  %v7463_v59 = vld [vmem:[#allocation82_spill] sm:$0xff] }
 0x278   :  { %v1458_v17 = vadd.f32 1e-05, %v1386_v50  ;;  %v2833_v60 = vpop.f32.mrb[25].mxu1  ;;  %v1696_v11 = vmul.f32 %v3762_v21, %v7463_v59  ;;  %v1695_v54 = vmul.f32 %v3762_v21, %v7464_v57 }
 0x279   :  { %v1258_v62 = vpop.xlane.xlu0 %1257  ;;  %v2304_v49 = vpack.c.bf16 %v2160_v32, %v2157_v41  ;;  %v2303_v25 = vpack.c.bf16 %v2159_v46, %v2156_v61  ;;  %v6218_v12 = vpop.f32.mrb[26].mxu1  ;;  %v2302_v28 = vpack.c.bf16 %v2158_v38, %v2155_v2  ;;  %v1930_v43 = vmul.f32 %v7347_v63, %v1697_v26  ;;  %v7465_v38 = vld [vmem:[#allocation80_spill] sm:$0xff] }
 0x27a   :  { %v1387_v5 = vmul.f32 0.0026041667, %v1258_v62  ;;  %3767 = vrsqrt.f32 %v1458_v17  ;;  %7462 = vst [vmem:[#allocation90_spill] sm:$0xff] %v6218_v12  ;;  %v2836_v22 = vpop.f32.mrb[27].mxu1  ;;  %v1929_v19 = vmul.f32 %v5060_v14, %v1696_v11  ;;  %v1928_v42 = vmul.f32 %v5063_v47, %v1695_v54  ;;  %v7466_v62 = vld [vmem:[#allocation87_spill] sm:$0xff] }
 0x27b   :  { %3542 = vmatmul.mubr.bf16.gmra.mrb[80].mxu1 %v2304_v49  ;;  %2749 = vmatprep.mubr.bf16.mxu0 %v2303_v25  ;;  %v7473_v12 = vld [vmem:[#allocation139_spill] sm:$0xff] }
 0x27c   :  { %v1459_v29 = vadd.f32 1e-05, %v1387_v5  ;;  %v7467_v5 = vld [vmem:[#allocation81_spill] sm:$0xff]  ;;  %v2162_v54 = vadd.f32 %v5068_v18, %v1929_v19 }
 0x27d   :  { %2750 = vmatmul.mubr.bf16.gmra.mrb[92].mxu0 %v2302_v28 }
 0x27e   :  { %3769 = vrsqrt.f32 %v1459_v29  ;;  %v7468_v29 = vld [vmem:[#allocation130_spill] sm:$0xff] }
 0x27f   :  { %v3764_v34 = vpop.eup %3763  ;;  %v6226_v46 = vpop.f32.mrb[24].mxu0 }
 0x280   :  { %v1262_v50 = vpop.xlane.xlu1 %1261  ;;  %v3766_v41 = vpop.eup %3765  ;;  %v1703_v61 = vmul.f32 %v3764_v34, %v5665_v51  ;;  %v1702_v26 = vmul.f32 %v3764_v34, %v7468_v29  ;;  %v2163_v51 = vadd.f32 %v5027_v15, %v1930_v43 }
 0x281   :  { %v1388_v32 = vmul.f32 0.0026041667, %v1262_v50  ;;  %v1700_v17 = vmul.f32 %v3766_v41, %v7465_v38  ;;  %v1699_v21 = vmul.f32 %v3766_v41, %v7466_v62  ;;  %v2617_v49 = vpop.f32.mrb[25].mxu0  ;;  %v1698_v25 = vmul.f32 %v3766_v41, %v7467_v5  ;;  %v7469_v62 = vld [vmem:[#allocation30_spill] sm:$0xff]  ;;  %v7470_v5 = vld [vmem:[#allocation27_spill] sm:$0xff] }
 0x282   :  { %v6232_v60 = vpop.f32.mrb[26].mxu0  ;;  %v1936_v50 = vmul.f32 %v7347_v63, %v1703_v61  ;;  %v2161_v41 = vadd.f32 %v5075_v35, %v1928_v42  ;;  %v1935_v49 = vmul.f32 %v5060_v14, %v1702_v26 }
 0x283   :  { %v1460_v2 = vadd.f32 1e-05, %v1388_v32  ;;  %v1933_v28 = vmul.f32 %v7347_v63, %v1700_v17  ;;  %v1932_v22 = vmul.f32 %v5060_v14, %v1699_v21  ;;  %v1931_v59 = vmul.f32 %v5063_v47, %v1698_v25  ;;  %v2620_v11 = vpop.f32.mrb[27].mxu0 }
 0x284   :  { %v3768_v57 = vpop.eup %3767  ;;  %v1701_v25 = vmul.f32 %v3764_v34, %v7470_v5  ;;  %v2169_v34 = vadd.f32 %v5027_v15, %v1936_v50  ;;  %v7476_v5 = vld [vmem:[#allocation34_spill] sm:$0xff] }
 0x285   :  { %3771 = vrsqrt.f32 %v1460_v2  ;;  %v2166_v32 = vadd.f32 %v5027_v15, %v1933_v28  ;;  %v2165_v38 = vadd.f32 %v5068_v18, %v1932_v22  ;;  %v1706_v17 = vmul.f32 %v3768_v57, %v5719_v13  ;;  %v7471_v2 = vld [vmem:[#allocation86_spill] sm:$0xff] }
 0x286   :  { %v2164_v43 = vadd.f32 %v5075_v35, %v1931_v59  ;;  %v1705_v21 = vmul.f32 %v3768_v57, %v7469_v62  ;;  %v1704_v19 = vmul.f32 %v3768_v57, %v7471_v2  ;;  %v6251_v28 = vpop.f32.mrb[28].mxu1  ;;  %v7472_v59 = vld [vmem:[#allocation26_spill] sm:$0xff] }
 0x287   :  { %v2307_v61 = vpack.c.bf16 %v2166_v32, %v2163_v51  ;;  %v2306_v11 = vpack.c.bf16 %v2165_v38, %v2162_v54  ;;  %v1939_v42 = vmul.f32 %v7347_v63, %v1706_v17  ;;  %v2841_v30 = vpop.f32.mrb[29].mxu1  ;;  %v1718_v62 = vmul.f32 %v7473_v12, %v7472_v59  ;;  %v7474_v54 = vld [vmem:[#allocation29_spill] sm:$0xff]  ;;  %v7480_v59 = vld [vmem:[#allocation140_spill] sm:$0xff] }
 0x288   :  { %v3770_v29 = vpop.eup %3769  ;;  %v2305_v22 = vpack.c.bf16 %v2164_v43, %v2161_v41  ;;  %v1938_v13 = vmul.f32 %v5060_v14, %v1705_v21  ;;  %v1937_v26 = vmul.f32 %v5063_v47, %v1704_v19  ;;  %v6259_v57 = vpop.f32.mrb[30].mxu1  ;;  %v7475_v32 = vld [vmem:[#allocation141_spill] sm:$0xff]  ;;  %v2168_v41 = vadd.f32 %v5068_v18, %v1935_v49  ;;  %v7479_v49 = vld [vmem:[#allocation28_spill] sm:$0xff] }
 0x289   :  { %3545 = vmatprep.mubr.bf16.mxu1 %v2307_v61  ;;  %2757 = vmatprep.mubr.bf16.mxu0 %v2306_v11  ;;  %v2172_v51 = vadd.f32 %v5027_v15, %v1939_v42  ;;  %v1724_v38 = vmul.f32 %v7475_v32, %v7474_v54  ;;  %v1709_v12 = vmul.f32 %v3770_v29, %v5735_v40  ;;  %v2844_v17 = vpop.f32.mrb[31].mxu1  ;;  %v7477_v19 = vld [vmem:[#allocation25_spill] sm:$0xff]  ;;  %v7478_v61 = vld [vmem:[#allocation138_spill] sm:$0xff] }
 0x28a   :  { %2758 = vmatmul.mubr.bf16.gmra.mrb[96].mxu0 %v2305_v22  ;;  %v2171_v30 = vadd.f32 %v5068_v18, %v1938_v13  ;;  %v1934_v43 = vmul.f32 %v5063_v47, %v1701_v25  ;;  %v1708_v50 = vmul.f32 %v3770_v29, %v7476_v5  ;;  %v1715_v11 = vmul.f32 %v7478_v61, %v7477_v19 }
 0x28b   :  { %v2310_v21 = vpack.c.bf16 %v2172_v51, %v2169_v34  ;;  %v1951_v42 = vmul.f32 %v7347_v63, %v1718_v62  ;;  %v2170_v22 = vadd.f32 %v5075_v35, %v1937_v26  ;;  %v1721_v13 = vmul.f32 %v7480_v59, %v7479_v49  ;;  %v7483_v49 = vld [vmem:[#allocation143_spill] sm:$0xff]  ;;  %v7484_v59 = vld [vmem:[#allocation36_spill] sm:$0xff] }
 0x28c   :  { %v2309_v2 = vpack.c.bf16 %v2171_v30, %v2168_v41  ;;  %v6274_v54 = vpop.f32.mrb[28].mxu0  ;;  %v1942_v25 = vmul.f32 %v7347_v63, %v1709_v12  ;;  %v1957_v34 = vmul.f32 %v7347_v63, %v1724_v38  ;;  %v2167_v32 = vadd.f32 %v5075_v35, %v1934_v43  ;;  %v7481_v41 = vld [vmem:[#allocation32_spill] sm:$0xff] }
 0x28d   :  { %3546 = vmatmul.mubr.bf16.gmra.mrb[84].mxu1 %v2310_v21  ;;  %v2625_v51 = vpop.f32.mrb[29].mxu0  ;;  %v1707_v30 = vmul.f32 %v3770_v29, %v7481_v41  ;;  %v1941_v21 = vmul.f32 %v5060_v14, %v1708_v50  ;;  %v2184_v12 = vadd.f32 %v5027_v15, %v1951_v42  ;;  %v1954_v29 = vmul.f32 %v7347_v63, %v1721_v13  ;;  %v7482_v50 = vld [vmem:[#allocation5_spill] sm:$0xff]  ;;  %v7487_v41 = vld [vmem:[#allocation142_spill] sm:$0xff] }
 0x28e   :  { %2765 = vmatprep.mubr.bf16.mxu0 %v2309_v2  ;;  %v6281_v26 = vpop.f32.mrb[30].mxu0  ;;  %v1948_v2 = vmul.f32 %v7347_v63, %v1715_v11  ;;  %v2308_v38 = vpack.c.bf16 %v2170_v22, %v2167_v32  ;;  %v7485_v11 = vld [vmem:[#allocation33_spill] sm:$0xff]  ;;  %v2175_v22 = vadd.f32 %v5027_v15, %v1942_v25 }
 0x28f   :  { %v3772_v40 = vpop.eup %3771  ;;  %v2628_v19 = vpop.f32.mrb[31].mxu0  ;;  %v1940_v42 = vmul.f32 %v5063_v47, %v1707_v30  ;;  %v2174_v13 = vadd.f32 %v5068_v18, %v1941_v21  ;;  %v7489_v30 = vld [vmem:[#allocation144_spill] sm:$0xff] }
 0x290   :  { %v1712_v62 = vmul.f32 %v3772_v40, %v5790_v45  ;;  %v1711_v17 = vmul.f32 %v3772_v40, %v5788_v31  ;;  %v1710_v5 = vmul.f32 %v3772_v40, %v5786_v9  ;;  %v2190_v31 = vadd.f32 %v5027_v15, %v1957_v34  ;;  %v7486_v34 = vld [vmem:[#allocation31_spill] sm:$0xff] }
 0x291   :  { %v1730_v9 = vmul.f32 %v7483_v49, %v7482_v50  ;;  %v1736_v40 = vmul.f32 %v7485_v11, %v7484_v59  ;;  %v2181_v32 = vadd.f32 %v5027_v15, %v1948_v2  ;;  %v2173_v21 = vadd.f32 %v5075_v35, %v1940_v42  ;;  %v7491_v59 = vld [vmem:[#allocation35_spill] sm:$0xff] }
 0x292   :  { %v1945_v43 = vmul.f32 %v7347_v63, %v1712_v62  ;;  %v1944_v45 = vmul.f32 %v5060_v14, %v1711_v17  ;;  %v1943_v61 = vmul.f32 %v5063_v47, %v1710_v5  ;;  %2766 = vmatmul.mubr.bf16.gmra.mrb[100].mxu0 %v2308_v38  ;;  %v1727_v62 = vmul.f32 %v7487_v41, %v7486_v34  ;;  %v7488_v47 = vld [vmem:[#allocation10_spill] sm:$0xff]  ;;  %v7492_v42 = vld [vmem:[#allocation59_spill] sm:$0xff] }
 0x293   :  { %v2187_v38 = vadd.f32 %v5027_v15, %v1954_v29  ;;  %v1733_v25 = vmul.f32 %v7489_v30, %v7488_v47  ;;  %v2316_v50 = vpack.c.bf16 %v2184_v12, %v2181_v32  ;;  %v1969_v2 = vmul.f32 %v7347_v63, %v1736_v40  ;;  %v7493_v40 = vld [vmem:[#allocation8_spill] sm:$0xff] }
 0x294   :  { %v2178_v51 = vadd.f32 %v5027_v15, %v1945_v43  ;;  %v2177_v14 = vadd.f32 %v5068_v18, %v1944_v45  ;;  %v2176_v17 = vadd.f32 %v5075_v35, %v1943_v61  ;;  %v1963_v43 = vmul.f32 %v7347_v63, %v1730_v9  ;;  %v7490_v9 = vld [vmem:[#allocation43_spill] sm:$0xff] }
 0x295   :  { %v2319_v18 = vpack.c.bf16 %v2190_v31, %v2187_v38  ;;  %v1960_v45 = vmul.f32 %v7347_v63, %v1727_v62  ;;  %v1966_v29 = vmul.f32 %v7347_v63, %v1733_v25  ;;  %v1742_v35 = vmul.f32 %v7491_v59, %v7490_v9  ;;  %v7496_v62 = vld [vmem:[#allocation48_spill] sm:$0xff]  ;;  %v7501_v9 = vld [vmem:[#allocation39_spill] sm:$0xff] }
 0x296   :  { %v2313_v5 = vpack.c.bf16 %v2178_v51, %v2175_v22  ;;  %v2312_v19 = vpack.c.bf16 %v2177_v14, %v2174_v13  ;;  %v2311_v61 = vpack.c.bf16 %v2176_v17, %v2173_v21  ;;  %v2196_v49 = vadd.f32 %v5027_v15, %v1963_v43  ;;  %v7494_v13 = vld [vmem:[#allocation20_spill] sm:$0xff]  ;;  %v7495_v14 = vld [vmem:[#allocation6_spill] sm:$0xff]  ;;  %v7497_v17 = vld [vmem:[#allocation9_spill] sm:$0xff] }
 0x297   :  { %v2202_v31 = vadd.f32 %v5027_v15, %v1969_v2  ;;  %v1748_v22 = vmul.f32 %v7493_v40, %v7492_v42  ;;  %v2193_v51 = vadd.f32 %v5027_v15, %v1960_v45  ;;  %v1739_v32 = vmul.f32 %v7495_v14, %v7494_v13  ;;  %v7499_v2 = vld [vmem:[#allocation17_spill] sm:$0xff]  ;;  %v7503_v42 = vld [vmem:[#allocation12_spill] sm:$0xff]  ;;  %v7505_v14 = vld [vmem:[#allocation19_spill] sm:$0xff] }
 0x298   :  { %3549 = vmatprep.mubr.bf16.mxu1 %v2313_v5  ;;  %2773 = vmatprep.mubr.bf16.mxu0 %v2312_v19  ;;  %v2199_v41 = vadd.f32 %v5027_v15, %v1966_v29  ;;  %v1745_v5 = vmul.f32 %v7497_v17, %v7496_v62  ;;  %v1975_v47 = vmul.f32 %v7347_v63, %v1742_v35  ;;  %v7504_v13 = vld [vmem:[#allocation72_spill] sm:$0xff] }
 0x299   :  { %3550 = vmatmul.mubr.bf16.gmra.mrb[88].mxu1 %v2316_v50  ;;  %v2322_v19 = vpack.c.bf16 %v2196_v49, %v2193_v51  ;;  %v1981_v25 = vmul.f32 %v7347_v63, %v1748_v22  ;;  %v1972_v50 = vmul.f32 %v7347_v63, %v1739_v32  ;;  %v7500_v49 = vld [vmem:[#allocation75_spill] sm:$0xff]  ;;  %v1757_v32 = vmul.f32 %v7505_v14, %v7504_v13 }
 0x29a   :  { %3553 = vmatprep.mubr.bf16.mxu1 %v2319_v18  ;;  %2774 = vmatmul.mubr.bf16.gmra.mrb[104].mxu0 %v2311_v61  ;;  %v6315_v12 = vpop.f32.mrb[32].mxu1  ;;  %v2325_v30 = vpack.c.bf16 %v2202_v31, %v2199_v41  ;;  %v1978_v43 = vmul.f32 %v7347_v63, %v1745_v5  ;;  %v2208_v21 = vadd.f32 %v5027_v15, %v1975_v47  ;;  %v7498_v18 = vld [vmem:[#allocation71_spill] sm:$0xff] }
 0x29b   :  { %v2849_v11 = vpop.f32.mrb[33].mxu1  ;;  %v1754_v45 = vmul.f32 %v7499_v2, %v7498_v18  ;;  %v2214_v61 = vadd.f32 %v5027_v15, %v1981_v25  ;;  %v1760_v59 = vmul.f32 %v7501_v9, %v7500_v49  ;;  %v2205_v35 = vadd.f32 %v5027_v15, %v1972_v50  ;;  %v6357_v25 = vld [vmem:[%s6852_s2] ss:$0 sm:$0xff] }
 0x29c   :  { %v6325_v34 = vpop.f32.mrb[34].mxu1  ;;  %v7502_v11 = vld [vmem:[#allocation60_spill] sm:$0xff]  ;;  %v2211_v22 = vadd.f32 %v5027_v15, %v1978_v43  ;;  %v1990_v47 = vmul.f32 %v7347_v63, %v1757_v32  ;;  %v7506_v43 = vld [vmem:[#allocation85_spill] sm:$0xff] }
 0x29d   :  { %v2852_v38 = vpop.f32.mrb[35].mxu1  ;;  %v1751_v40 = vmul.f32 %v7503_v42, %v7502_v11  ;;  %v2328_v41 = vpack.c.bf16 %v2208_v21, %v2205_v35  ;;  %v1987_v17 = vmul.f32 %v7347_v63, %v1754_v45  ;;  %v7507_v21 = vld [vmem:[#allocation52_spill] sm:$0xff]  ;;  %v6367_v49 = vld [vmem:[%s6853_s3] ss:$0 sm:$0xff]  ;;  %v7509_v11 = vld [vmem:[#allocation46_spill] sm:$0xff] }
 0x29e   :  { %v2331_v5 = vpack.c.bf16 %v2214_v61, %v2211_v22  ;;  %v1993_v38 = vmul.f32 %v7347_v63, %v1760_v59  ;;  %v1766_v18 = vmul.f32 %v7507_v21, %v7506_v43  ;;  %v2223_v22 = vadd.f32 %v5027_v15, %v1990_v47 }
 0x29f   :  { %v2220_v50 = vadd.f32 %v5027_v15, %v1987_v17 }
 0x2a0   :  { %v2226_v61 = vadd.f32 %v5027_v15, %v1993_v38 }
 0x2a1   :  { %3554 = vmatmul.mubr.bf16.gmra.mrb[92].mxu1 %v2322_v19  ;;  %v1984_v19 = vmul.f32 %v7347_v63, %v1751_v40 }
 0x2a2   :  { %3557 = vmatprep.mubr.bf16.mxu1 %v2325_v30 }
 0x2a3   :  { %v6338_v29 = vpop.f32.mrb[32].mxu0  ;;  %v2217_v59 = vadd.f32 %v5027_v15, %v1984_v19 }
 0x2a4   :  { %v2633_v31 = vpop.f32.mrb[33].mxu0 }
 0x2a5   :  { %v6346_v51 = vpop.f32.mrb[34].mxu0  ;;  %v7508_v31 = vld [vmem:[#allocation79_spill] sm:$0xff]  ;;  %v2334_v32 = vpack.c.bf16 %v2220_v50, %v2217_v59 }
 0x2a6   :  { %v2636_v62 = vpop.f32.mrb[35].mxu0  ;;  %v1763_v42 = vmul.f32 %v7509_v11, %v7508_v31 }
 0x2a8   :  { %v1996_v19 = vmul.f32 %v7347_v63, %v1763_v42 }
 0x2a9   :  { %3558 = vmatmul.mubr.bf16.gmra.mrb[96].mxu1 %v2328_v41 }
 0x2aa   :  { %3561 = vmatprep.mubr.bf16.mxu1 %v2331_v5  ;;  %v2337_v5 = vpack.c.bf16 %v2226_v61, %v2223_v22  ;;  %v2229_v50 = vadd.f32 %v5027_v15, %v1996_v19 }
 0x2ab   :  { %v3499_v30 = vpop.f32.mrb[36].mxu1 }
 0x2ac   :  { %v2897_v2 = vadd.f32 %v3499_v30, %v6086_v3  ;;  %v2888_v45 = vpop.f32.mrb[37].mxu1 }
 0x2ad   :  { %v2889_v9 = vadd.f32 %v2888_v45, %v6064_v6  ;;  %v3500_v35 = vpop.f32.mrb[38].mxu1  ;;  %v1999_v6 = vmul.f32 %v7347_v63, %v1766_v18 }
 0x2ae   :  { %v3184_v40 = vmul.f32 %v6357_v25, %v2897_v2  ;;  %v2900_v3 = vadd.f32 %v3500_v35, %v6095_v4  ;;  %v2891_v13 = vpop.f32.mrb[39].mxu1 }
 0x2af   :  { %v3182_v14 = vmul.f32 %v6357_v25, %v2889_v9  ;;  %v2892_v41 = vadd.f32 %v2891_v13, %v6069_v39  ;;  %v2232_v30 = vadd.f32 %v5027_v15, %v1999_v6 }
 0x2b0   :  { %v3263_v62 = vadd.f32 %v6367_v49, %v3184_v40  ;;  %v3185_v17 = vmul.f32 %v6357_v25, %v2900_v3 }
 0x2b1   :  { %v3261_v38 = vadd.f32 %v6367_v49, %v3182_v14  ;;  %3562 = vmatmul.mubr.bf16.gmra.mrb[100].mxu1 %v2334_v32  ;;  %v3183_v4 = vmul.f32 %v6357_v25, %v2892_v41  ;;  %v2340_v21 = vpack.c.bf16 %v2232_v30, %v2229_v50 }
 0x2b2   :  { %3336 = vst.msk [vmem:[%s6856_s6 + $0x10] sm:$0xff] %vm3333_vm0, %v3263_v62  ;;  %v3264_v39 = vadd.f32 %v6367_v49, %v3185_v17  ;;  %3565 = vmatprep.mubr.bf16.mxu1 %v2337_v5 }
 0x2b3   :  { %3334 = vst.msk [vmem:[%s6856_s6] sm:$0xff] %vm3333_vm0, %v3261_v38  ;;  %v3262_v47 = vadd.f32 %v6367_v49, %v3183_v4 }
 0x2b4   :  { %3337 = vst.msk [vmem:[%s6856_s6 + $0x18] sm:$0xff] %vm3333_vm0, %v3264_v39 }
 0x2b5   :  { %3335 = vst.msk [vmem:[%s6856_s6 + $0x8] sm:$0xff] %vm3333_vm0, %v3262_v47  ;;  %v6403_v63 = vpop.f32.mrb[36].mxu0 }
 0x2b6   :  { %v2641_v43 = vpop.f32.mrb[37].mxu0 }
 0x2b7   :  { %v6406_v18 = vpop.f32.mrb[38].mxu0 }
 0x2b8   :  { %v3503_v2 = vpop.f32.mrb[40].mxu1  ;;  %v2644_v45 = vpop.f32.mrb[39].mxu0 }
 0x2b9   :  { %v2913_v61 = vadd.f32 %v3503_v2, %v6130_v48  ;;  %v2904_v9 = vpop.f32.mrb[41].mxu1  ;;  %3566 = vmatmul.mubr.bf16.gmra.mrb[104].mxu1 %v2340_v21 }
 0x2ba   :  { %v2905_v59 = vadd.f32 %v2904_v9, %v6116_v10  ;;  %v3504_v35 = vpop.f32.mrb[42].mxu1 }
 0x2bb   :  { %v3188_v31 = vmul.f32 %v6357_v25, %v2913_v61  ;;  %v2916_v11 = vadd.f32 %v3504_v35, %v6137_v16  ;;  %v2907_v42 = vpop.f32.mrb[43].mxu1 }
 0x2bc   :  { %v3186_v15 = vmul.f32 %v6357_v25, %v2905_v59  ;;  %v2908_v40 = vadd.f32 %v2907_v42, %v6118_v8 }
 0x2bd   :  { %v3267_v3 = vadd.f32 %v6367_v49, %v3188_v31  ;;  %v3189_v22 = vmul.f32 %v6357_v25, %v2916_v11 }
 0x2be   :  { %v3265_v48 = vadd.f32 %v6367_v49, %v3186_v15  ;;  %v3187_v13 = vmul.f32 %v6357_v25, %v2908_v40 }
 0x2bf   :  { %3340 = vst.msk [vmem:[%s6856_s6 + $0x30] sm:$0xff] %vm3333_vm0, %v3267_v3  ;;  %v3268_v10 = vadd.f32 %v6367_v49, %v3189_v22 }
 0x2c0   :  { %3338 = vst.msk [vmem:[%s6856_s6 + $0x20] sm:$0xff] %vm3333_vm0, %v3265_v48  ;;  %v3266_v8 = vadd.f32 %v6367_v49, %v3187_v13 }
 0x2c1   :  { %3341 = vst.msk [vmem:[%s6856_s6 + $0x38] sm:$0xff] %vm3333_vm0, %v3268_v10  ;;  %v3507_v16 = vpop.f32.mrb[44].mxu1 }
 0x2c2   :  { %3339 = vst.msk [vmem:[%s6856_s6 + $0x28] sm:$0xff] %vm3333_vm0, %v3266_v8  ;;  %v2929_v14 = vadd.f32 %v3507_v16, %v6201_v1  ;;  %v2920_v32 = vpop.f32.mrb[45].mxu1 }
 0x2c3   :  { %v2921_v41 = vadd.f32 %v2920_v32, %v6166_v7  ;;  %v3508_v6 = vpop.f32.mrb[46].mxu1 }
 0x2c4   :  { %v3192_v62 = vmul.f32 %v6357_v25, %v2929_v14  ;;  %v2932_v17 = vadd.f32 %v3508_v6, %v6208_v53  ;;  %v2923_v5 = vpop.f32.mrb[47].mxu1 }
 0x2c5   :  { %v3190_v38 = vmul.f32 %v6357_v25, %v2921_v41  ;;  %v2924_v4 = vadd.f32 %v2923_v5, %v6169_v24 }
 0x2c6   :  { %v3271_v19 = vadd.f32 %v6367_v49, %v3192_v62  ;;  %v3193_v39 = vmul.f32 %v6357_v25, %v2932_v17 }
 0x2c7   :  { %v3269_v47 = vadd.f32 %v6367_v49, %v3190_v38  ;;  %v3191_v1 = vmul.f32 %v6357_v25, %v2924_v4 }
 0x2c8   :  { %3344 = vst.msk [vmem:[%s6856_s6 + $0x50] sm:$0xff] %vm3333_vm0, %v3271_v19  ;;  %v3272_v7 = vadd.f32 %v6367_v49, %v3193_v39  ;;  %v2647_v53 = vpop.f32.mrb[40].mxu0 }
 0x2c9   :  { %3342 = vst.msk [vmem:[%s6856_s6 + $0x40] sm:$0xff] %vm3333_vm0, %v3269_v47  ;;  %v3270_v24 = vadd.f32 %v6367_v49, %v3191_v1  ;;  %v2649_v30 = vpop.f32.mrb[41].mxu0 }
 0x2ca   :  { %3345 = vst.msk [vmem:[%s6856_s6 + $0x58] sm:$0xff] %vm3333_vm0, %v3272_v7  ;;  %v2650_v50 = vpop.f32.mrb[42].mxu0 }
 0x2cb   :  { %3343 = vst.msk [vmem:[%s6856_s6 + $0x48] sm:$0xff] %vm3333_vm0, %v3270_v24  ;;  %v2652_v43 = vpop.f32.mrb[43].mxu0 }
 0x2cd   :  { %v3511_v21 = vpop.f32.mrb[48].mxu1 }
 0x2ce   :  { %v2945_v2 = vadd.f32 %v3511_v21, %v6274_v54  ;;  %v2936_v45 = vpop.f32.mrb[49].mxu1 }
 0x2cf   :  { %v2937_v61 = vadd.f32 %v2936_v45, %v6226_v46  ;;  %v3512_v9 = vpop.f32.mrb[50].mxu1 }
 0x2d0   :  { %v3196_v59 = vmul.f32 %v6357_v25, %v2945_v2  ;;  %v2948_v35 = vadd.f32 %v3512_v9, %v6281_v26  ;;  %v2939_v31 = vpop.f32.mrb[51].mxu1 }
 0x2d1   :  { %v3194_v11 = vmul.f32 %v6357_v25, %v2937_v61  ;;  %v2940_v42 = vadd.f32 %v2939_v31, %v6232_v60 }
 0x2d2   :  { %v3275_v15 = vadd.f32 %v6367_v49, %v3196_v59  ;;  %v3197_v40 = vmul.f32 %v6357_v25, %v2948_v35 }
 0x2d3   :  { %v3273_v3 = vadd.f32 %v6367_v49, %v3194_v11  ;;  %v3195_v54 = vmul.f32 %v6357_v25, %v2940_v42 }
 0x2d4   :  { %3348 = vst.msk [vmem:[%s6856_s6 + $0x70] sm:$0xff] %vm3333_vm0, %v3275_v15  ;;  %v3276_v46 = vadd.f32 %v6367_v49, %v3197_v40  ;;  %v2655_v26 = vpop.f32.mrb[44].mxu0 }
 0x2d5   :  { %3346 = vst.msk [vmem:[%s6856_s6 + $0x60] sm:$0xff] %vm3333_vm0, %v3273_v3  ;;  %v3274_v60 = vadd.f32 %v6367_v49, %v3195_v54  ;;  %v2657_v48 = vpop.f32.mrb[45].mxu0 }
 0x2d6   :  { %3349 = vst.msk [vmem:[%s6856_s6 + $0x78] sm:$0xff] %vm3333_vm0, %v3276_v46  ;;  %v3515_v22 = vpop.f32.mrb[52].mxu1  ;;  %v2658_v8 = vpop.f32.mrb[46].mxu0 }
 0x2d7   :  { %3347 = vst.msk [vmem:[%s6856_s6 + $0x68] sm:$0xff] %vm3333_vm0, %v3274_v60  ;;  %v2961_v13 = vadd.f32 %v3515_v22, %v6403_v63  ;;  %v2952_v10 = vpop.f32.mrb[53].mxu1  ;;  %v2660_v32 = vpop.f32.mrb[47].mxu0 }
 0x2d8   :  { %v2953_v16 = vadd.f32 %v2952_v10, %v6338_v29  ;;  %v3516_v14 = vpop.f32.mrb[54].mxu1 }
 0x2d9   :  { %v3200_v41 = vmul.f32 %v6357_v25, %v2961_v13  ;;  %v2964_v6 = vadd.f32 %v3516_v14, %v6406_v18  ;;  %v2955_v62 = vpop.f32.mrb[55].mxu1 }
 0x2da   :  { %v3198_v17 = vmul.f32 %v6357_v25, %v2953_v16  ;;  %v2956_v5 = vadd.f32 %v2955_v62, %v6346_v51 }
 0x2db   :  { %v3279_v38 = vadd.f32 %v6367_v49, %v3200_v41  ;;  %v3201_v4 = vmul.f32 %v6357_v25, %v2964_v6 }
 0x2dc   :  { %v3277_v63 = vadd.f32 %v6367_v49, %v3198_v17  ;;  %v3199_v19 = vmul.f32 %v6357_v25, %v2956_v5  ;;  %v2663_v18 = vpop.f32.mrb[48].mxu0 }
 0x2dd   :  { %3352 = vst.msk [vmem:[%s6856_s6 + $0x90] sm:$0xff] %vm3333_vm0, %v3279_v38  ;;  %v3280_v29 = vadd.f32 %v6367_v49, %v3201_v4  ;;  %v2665_v47 = vpop.f32.mrb[49].mxu0 }
 0x2de   :  { %3350 = vst.msk [vmem:[%s6856_s6 + $0x80] sm:$0xff] %vm3333_vm0, %v3277_v63  ;;  %v3278_v51 = vadd.f32 %v6367_v49, %v3199_v19  ;;  %v3519_v39 = vpop.f32.mrb[56].mxu1  ;;  %v2666_v24 = vpop.f32.mrb[50].mxu0 }
 0x2df   :  { %3353 = vst.msk [vmem:[%s6856_s6 + $0x98] sm:$0xff] %vm3333_vm0, %v3280_v29  ;;  %v2977_v1 = vadd.f32 %v3519_v39, %v2655_v26  ;;  %v2968_v7 = vpop.f32.mrb[57].mxu1  ;;  %v2668_v21 = vpop.f32.mrb[51].mxu0 }
 0x2e0   :  { %3351 = vst.msk [vmem:[%s6856_s6 + $0x88] sm:$0xff] %vm3333_vm0, %v3278_v51  ;;  %v2969_v30 = vadd.f32 %v2968_v7, %v2647_v53  ;;  %v3520_v43 = vpop.f32.mrb[58].mxu1 }
 0x2e1   :  { %v3204_v2 = vmul.f32 %v6357_v25, %v2977_v1  ;;  %v2980_v45 = vadd.f32 %v3520_v43, %v2658_v8  ;;  %v2971_v61 = vpop.f32.mrb[59].mxu1 }
 0x2e2   :  { %v3202_v9 = vmul.f32 %v6357_v25, %v2969_v30  ;;  %v2972_v59 = vadd.f32 %v2971_v61, %v2650_v50 }
 0x2e3   :  { %v3283_v35 = vadd.f32 %v6367_v49, %v3204_v2  ;;  %v3205_v31 = vmul.f32 %v6357_v25, %v2980_v45 }
 0x2e4   :  { %v3281_v11 = vadd.f32 %v6367_v49, %v3202_v9  ;;  %v3203_v42 = vmul.f32 %v6357_v25, %v2972_v59  ;;  %v2671_v15 = vpop.f32.mrb[52].mxu0 }
 0x2e5   :  { %3356 = vst.msk [vmem:[%s6856_s6 + $0xb0] sm:$0xff] %vm3333_vm0, %v3283_v35  ;;  %v3284_v53 = vadd.f32 %v6367_v49, %v3205_v31  ;;  %v2673_v3 = vpop.f32.mrb[53].mxu0 }
 0x2e6   :  { %3354 = vst.msk [vmem:[%s6856_s6 + $0xa0] sm:$0xff] %vm3333_vm0, %v3281_v11  ;;  %v3282_v50 = vadd.f32 %v6367_v49, %v3203_v42  ;;  %v3523_v40 = vpop.f32.mrb[60].mxu1  ;;  %v2674_v60 = vpop.f32.mrb[54].mxu0 }
 0x2e7   :  { %3357 = vst.msk [vmem:[%s6856_s6 + $0xb8] sm:$0xff] %vm3333_vm0, %v3284_v53  ;;  %v2993_v54 = vadd.f32 %v3523_v40, %v2671_v15  ;;  %v2984_v46 = vpop.f32.mrb[61].mxu1  ;;  %v2676_v48 = vpop.f32.mrb[55].mxu0 }
 0x2e8   :  { %3355 = vst.msk [vmem:[%s6856_s6 + $0xa8] sm:$0xff] %vm3333_vm0, %v3282_v50  ;;  %v2985_v26 = vadd.f32 %v2984_v46, %v2663_v18  ;;  %v3524_v22 = vpop.f32.mrb[62].mxu1 }
 0x2e9   :  { %v3208_v13 = vmul.f32 %v6357_v25, %v2993_v54  ;;  %v2996_v10 = vadd.f32 %v3524_v22, %v2674_v60  ;;  %v2987_v8 = vpop.f32.mrb[63].mxu1 }
 0x2ea   :  { %v3206_v16 = vmul.f32 %v6357_v25, %v2985_v26  ;;  %v2988_v14 = vadd.f32 %v2987_v8, %v2666_v24 }
 0x2eb   :  { %v3287_v32 = vadd.f32 %v6367_v49, %v3208_v13  ;;  %v3209_v41 = vmul.f32 %v6357_v25, %v2996_v10 }
 0x2ec   :  { %v3285_v6 = vadd.f32 %v6367_v49, %v3206_v16  ;;  %v3207_v62 = vmul.f32 %v6357_v25, %v2988_v14  ;;  %v2679_v5 = vpop.f32.mrb[56].mxu0 }
 0x2ed   :  { %3360 = vst.msk [vmem:[%s6856_s6 + $0xd0] sm:$0xff] %vm3333_vm0, %v3287_v32  ;;  %v3288_v17 = vadd.f32 %v6367_v49, %v3209_v41  ;;  %v2681_v63 = vpop.f32.mrb[57].mxu0 }
 0x2ee   :  { %3358 = vst.msk [vmem:[%s6856_s6 + $0xc0] sm:$0xff] %vm3333_vm0, %v3285_v6  ;;  %v3286_v38 = vadd.f32 %v6367_v49, %v3207_v62  ;;  %v3527_v4 = vpop.f32.mrb[64].mxu1  ;;  %v2682_v29 = vpop.f32.mrb[58].mxu0 }
 0x2ef   :  { %3361 = vst.msk [vmem:[%s6856_s6 + $0xd8] sm:$0xff] %vm3333_vm0, %v3288_v17  ;;  %v3000_v19 = vpop.f32.mrb[65].mxu1  ;;  %v2684_v39 = vpop.f32.mrb[59].mxu0 }
 0x2f0   :  { %3359 = vst.msk [vmem:[%s6856_s6 + $0xc8] sm:$0xff] %vm3333_vm0, %v3286_v38  ;;  %v3001_v18 = vadd.f32 %v3000_v19, %v2679_v5  ;;  %v3528_v51 = vpop.f32.mrb[66].mxu1 }
 0x2f1   :  { %v3003_v47 = vpop.f32.mrb[67].mxu1 }
 0x2f2   :  { %v3210_v1 = vmul.f32 %v6357_v25, %v3001_v18  ;;  %v3004_v7 = vadd.f32 %v3003_v47, %v2682_v29 }
 0x2f4   :  { %v3289_v24 = vadd.f32 %v6367_v49, %v3210_v1  ;;  %v3211_v30 = vmul.f32 %v6357_v25, %v3004_v7  ;;  %v2687_v43 = vpop.f32.mrb[60].mxu0 }
 0x2f5   :  { %v3009_v2 = vadd.f32 %v3527_v4, %v2687_v43  ;;  %v2689_v61 = vpop.f32.mrb[61].mxu0 }
 0x2f6   :  { %3362 = vst.msk [vmem:[%s6856_s6 + $0xe0] sm:$0xff] %vm3333_vm0, %v3289_v24  ;;  %v3290_v21 = vadd.f32 %v6367_v49, %v3211_v30  ;;  %v3531_v45 = vpop.f32.mrb[68].mxu1  ;;  %v2690_v59 = vpop.f32.mrb[62].mxu0 }
 0x2f7   :  { %v3016_v9 = vpop.f32.mrb[69].mxu1  ;;  %v3212_v35 = vmul.f32 %v6357_v25, %v3009_v2  ;;  %v3012_v31 = vadd.f32 %v3528_v51, %v2690_v59  ;;  %v2692_v42 = vpop.f32.mrb[63].mxu0 }
 0x2f8   :  { %3363 = vst.msk [vmem:[%s6856_s6 + $0xe8] sm:$0xff] %vm3333_vm0, %v3290_v21  ;;  %v3532_v11 = vpop.f32.mrb[70].mxu1 }
 0x2f9   :  { %v3019_v53 = vpop.f32.mrb[71].mxu1  ;;  %v3291_v15 = vadd.f32 %v6367_v49, %v3212_v35  ;;  %v3213_v50 = vmul.f32 %v6357_v25, %v3012_v31 }
 0x2fb   :  { %3364 = vst.msk [vmem:[%s6856_s6 + $0xf0] sm:$0xff] %vm3333_vm0, %v3291_v15  ;;  %v3292_v40 = vadd.f32 %v6367_v49, %v3213_v50 }
 0x2fc   :  { %v2695_v3 = vpop.f32.mrb[64].mxu0 }
 0x2fd   :  { %3365 = vst.msk [vmem:[%s6856_s6 + $0xf8] sm:$0xff] %vm3333_vm0, %v3292_v40  ;;  %v3017_v54 = vadd.f32 %v3016_v9, %v2695_v3  ;;  %v2697_v46 = vpop.f32.mrb[65].mxu0 }
 0x2fe   :  { %v2698_v60 = vpop.f32.mrb[66].mxu0 }
 0x2ff   :  { %v3214_v26 = vmul.f32 %v6357_v25, %v3017_v54  ;;  %v3020_v22 = vadd.f32 %v3019_v53, %v2698_v60  ;;  %v2700_v48 = vpop.f32.mrb[67].mxu0 }
 0x301   :  { %v3293_v13 = vadd.f32 %v6367_v49, %v3214_v26  ;;  %v3215_v10 = vmul.f32 %v6357_v25, %v3020_v22 }
 0x303   :  { %3366 = vst.msk [vmem:[%s6856_s6 + $0x100] sm:$0xff] %vm3333_vm0, %v3293_v13  ;;  %v3294_v8 = vadd.f32 %v6367_v49, %v3215_v10 }
 0x304   :  { %v2703_v16 = vpop.f32.mrb[68].mxu0 }
 0x305   :  { %3367 = vst.msk [vmem:[%s6856_s6 + $0x108] sm:$0xff] %vm3333_vm0, %v3294_v8  ;;  %v3025_v14 = vadd.f32 %v3531_v45, %v2703_v16  ;;  %v2705_v32 = vpop.f32.mrb[69].mxu0 }
 0x306   :  { %v2706_v41 = vpop.f32.mrb[70].mxu0 }
 0x307   :  { %v3216_v6 = vmul.f32 %v6357_v25, %v3025_v14  ;;  %v3028_v62 = vadd.f32 %v3532_v11, %v2706_v41  ;;  %v2708_v17 = vpop.f32.mrb[71].mxu0 }
 0x309   :  { %v3295_v5 = vadd.f32 %v6367_v49, %v3216_v6  ;;  %v3217_v38 = vmul.f32 %v6357_v25, %v3028_v62 }
 0x30b   :  { %3368 = vst.msk [vmem:[%s6856_s6 + $0x110] sm:$0xff] %vm3333_vm0, %v3295_v5  ;;  %v3296_v4 = vadd.f32 %v6367_v49, %v3217_v38 }
 0x30d   :  { %3369 = vst.msk [vmem:[%s6856_s6 + $0x118] sm:$0xff] %vm3333_vm0, %v3296_v4 }
 0x31c   :  { %v2711_v63 = vpop.f32.mrb[72].mxu0 }
 0x31d   :  { %v2713_v19 = vpop.f32.mrb[73].mxu0 }
 0x31e   :  { %v2714_v29 = vpop.f32.mrb[74].mxu0 }
 0x31f   :  { %v2716_v18 = vpop.f32.mrb[75].mxu0 }
 0x322   :  { %v3535_v51 = vpop.f32.mrb[72].mxu1 }
 0x323   :  { %v3032_v39 = vpop.f32.mrb[73].mxu1 }
 0x324   :  { %v3033_v47 = vadd.f32 %v3032_v39, %v2711_v63  ;;  %v3536_v1 = vpop.f32.mrb[74].mxu1  ;;  %v2719_v7 = vpop.f32.mrb[76].mxu0 }
 0x325   :  { %v3035_v24 = vpop.f32.mrb[75].mxu1  ;;  %v3041_v30 = vadd.f32 %v3535_v51, %v2719_v7  ;;  %v2721_v43 = vpop.f32.mrb[77].mxu0 }
 0x326   :  { %v3218_v21 = vmul.f32 %v6357_v25, %v3033_v47  ;;  %v3036_v2 = vadd.f32 %v3035_v24, %v2714_v29  ;;  %v2722_v45 = vpop.f32.mrb[78].mxu0 }
 0x327   :  { %v3220_v61 = vmul.f32 %v6357_v25, %v3041_v30  ;;  %v3044_v9 = vadd.f32 %v3536_v1, %v2722_v45  ;;  %v2724_v59 = vpop.f32.mrb[79].mxu0 }
 0x328   :  { %v3297_v35 = vadd.f32 %v6367_v49, %v3218_v21  ;;  %v3219_v31 = vmul.f32 %v6357_v25, %v3036_v2 }
 0x329   :  { %v3299_v11 = vadd.f32 %v6367_v49, %v3220_v61  ;;  %v3221_v42 = vmul.f32 %v6357_v25, %v3044_v9 }
 0x32a   :  { %3370 = vst.msk [vmem:[%s6856_s6 + $0x120] sm:$0xff] %vm3333_vm0, %v3297_v35  ;;  %v3298_v53 = vadd.f32 %v6367_v49, %v3219_v31 }
 0x32b   :  { %3372 = vst.msk [vmem:[%s6856_s6 + $0x130] sm:$0xff] %vm3333_vm0, %v3299_v11  ;;  %v3300_v15 = vadd.f32 %v6367_v49, %v3221_v42 }
 0x32c   :  { %3371 = vst.msk [vmem:[%s6856_s6 + $0x128] sm:$0xff] %vm3333_vm0, %v3298_v53 }
 0x32d   :  { %3373 = vst.msk [vmem:[%s6856_s6 + $0x138] sm:$0xff] %vm3333_vm0, %v3300_v15 }
 0x335   :  { %v2727_v50 = vpop.f32.mrb[80].mxu0 }
 0x336   :  { %v2729_v40 = vpop.f32.mrb[81].mxu0 }
 0x337   :  { %v2730_v3 = vpop.f32.mrb[82].mxu0 }
 0x338   :  { %v2732_v54 = vpop.f32.mrb[83].mxu0 }
 0x339   :  { %v3539_v46 = vpop.f32.mrb[76].mxu1 }
 0x33a   :  { %v3048_v60 = vpop.f32.mrb[77].mxu1 }
 0x33b   :  { %v3049_v26 = vadd.f32 %v3048_v60, %v2727_v50  ;;  %v3540_v22 = vpop.f32.mrb[78].mxu1 }
 0x33c   :  { %v3051_v48 = vpop.f32.mrb[79].mxu1 }
 0x33d   :  { %v3222_v13 = vmul.f32 %v6357_v25, %v3049_v26  ;;  %v3052_v10 = vadd.f32 %v3051_v48, %v2730_v3  ;;  %v2735_v8 = vpop.f32.mrb[84].mxu0 }
 0x33e   :  { %v3057_v16 = vadd.f32 %v3539_v46, %v2735_v8  ;;  %v2737_v14 = vpop.f32.mrb[85].mxu0 }
 0x33f   :  { %v3301_v32 = vadd.f32 %v6367_v49, %v3222_v13  ;;  %v3223_v41 = vmul.f32 %v6357_v25, %v3052_v10  ;;  %v2738_v6 = vpop.f32.mrb[86].mxu0 }
 0x340   :  { %v3224_v62 = vmul.f32 %v6357_v25, %v3057_v16  ;;  %v3060_v17 = vadd.f32 %v3540_v22, %v2738_v6  ;;  %v2740_v5 = vpop.f32.mrb[87].mxu0 }
 0x341   :  { %3374 = vst.msk [vmem:[%s6856_s6 + $0x140] sm:$0xff] %vm3333_vm0, %v3301_v32  ;;  %v3302_v38 = vadd.f32 %v6367_v49, %v3223_v41 }
 0x342   :  { %v3303_v4 = vadd.f32 %v6367_v49, %v3224_v62  ;;  %v3225_v63 = vmul.f32 %v6357_v25, %v3060_v17 }
 0x343   :  { %3375 = vst.msk [vmem:[%s6856_s6 + $0x148] sm:$0xff] %vm3333_vm0, %v3302_v38 }
 0x344   :  { %3376 = vst.msk [vmem:[%s6856_s6 + $0x150] sm:$0xff] %vm3333_vm0, %v3303_v4  ;;  %v3304_v19 = vadd.f32 %v6367_v49, %v3225_v63 }
 0x346   :  { %3377 = vst.msk [vmem:[%s6856_s6 + $0x158] sm:$0xff] %vm3333_vm0, %v3304_v19 }
 0x348   :  { %v2743_v29 = vpop.f32.mrb[88].mxu0 }
 0x349   :  { %v2745_v18 = vpop.f32.mrb[89].mxu0 }
 0x34a   :  { %v2746_v51 = vpop.f32.mrb[90].mxu0 }
 0x34b   :  { %v2748_v39 = vpop.f32.mrb[91].mxu0 }
 0x34e   :  { %v3543_v47 = vpop.f32.mrb[80].mxu1 }
 0x34f   :  { %v3064_v1 = vpop.f32.mrb[81].mxu1 }
 0x350   :  { %v3065_v7 = vadd.f32 %v3064_v1, %v2743_v29  ;;  %v3544_v24 = vpop.f32.mrb[82].mxu1  ;;  %v2751_v43 = vpop.f32.mrb[92].mxu0 }
 0x351   :  { %v3067_v30 = vpop.f32.mrb[83].mxu1  ;;  %v3073_v45 = vadd.f32 %v3543_v47, %v2751_v43  ;;  %v2753_v61 = vpop.f32.mrb[93].mxu0 }
 0x352   :  { %v3226_v21 = vmul.f32 %v6357_v25, %v3065_v7  ;;  %v3068_v2 = vadd.f32 %v3067_v30, %v2746_v51  ;;  %v2754_v9 = vpop.f32.mrb[94].mxu0 }
 0x353   :  { %v3228_v31 = vmul.f32 %v6357_v25, %v3073_v45  ;;  %v3076_v11 = vadd.f32 %v3544_v24, %v2754_v9  ;;  %v2756_v42 = vpop.f32.mrb[95].mxu0 }
 0x354   :  { %v3305_v59 = vadd.f32 %v6367_v49, %v3226_v21  ;;  %v3227_v35 = vmul.f32 %v6357_v25, %v3068_v2 }
 0x355   :  { %v3307_v15 = vadd.f32 %v6367_v49, %v3228_v31  ;;  %v3229_v50 = vmul.f32 %v6357_v25, %v3076_v11 }
 0x356   :  { %3378 = vst.msk [vmem:[%s6856_s6 + $0x160] sm:$0xff] %vm3333_vm0, %v3305_v59  ;;  %v3306_v53 = vadd.f32 %v6367_v49, %v3227_v35 }
 0x357   :  { %3380 = vst.msk [vmem:[%s6856_s6 + $0x170] sm:$0xff] %vm3333_vm0, %v3307_v15  ;;  %v3308_v40 = vadd.f32 %v6367_v49, %v3229_v50 }
 0x358   :  { %3379 = vst.msk [vmem:[%s6856_s6 + $0x168] sm:$0xff] %vm3333_vm0, %v3306_v53 }
 0x359   :  { %3381 = vst.msk [vmem:[%s6856_s6 + $0x178] sm:$0xff] %vm3333_vm0, %v3308_v40 }
 0x35d   :  { %v2759_v3 = vpop.f32.mrb[96].mxu0 }
 0x35e   :  { %v2761_v54 = vpop.f32.mrb[97].mxu0 }
 0x35f   :  { %v2762_v46 = vpop.f32.mrb[98].mxu0 }
 0x360   :  { %v3547_v60 = vpop.f32.mrb[84].mxu1  ;;  %v2764_v26 = vpop.f32.mrb[99].mxu0 }
 0x361   :  { %v3080_v22 = vpop.f32.mrb[85].mxu1 }
 0x362   :  { %v3548_v48 = vpop.f32.mrb[86].mxu1  ;;  %v3081_v13 = vadd.f32 %v3080_v22, %v2759_v3 }
 0x363   :  { %v3083_v10 = vpop.f32.mrb[87].mxu1 }
 0x364   :  { %v3230_v8 = vmul.f32 %v6357_v25, %v3081_v13  ;;  %v3084_v16 = vadd.f32 %v3083_v10, %v2762_v46 }
 0x365   :  { %v2767_v14 = vpop.f32.mrb[100].mxu0 }
 0x366   :  { %v3309_v32 = vadd.f32 %v6367_v49, %v3230_v8  ;;  %v3231_v41 = vmul.f32 %v6357_v25, %v3084_v16  ;;  %v3089_v6 = vadd.f32 %v3547_v60, %v2767_v14  ;;  %v2769_v62 = vpop.f32.mrb[101].mxu0 }
 0x367   :  { %v2770_v17 = vpop.f32.mrb[102].mxu0 }
 0x368   :  { %3382 = vst.msk [vmem:[%s6856_s6 + $0x180] sm:$0xff] %vm3333_vm0, %v3309_v32  ;;  %v3310_v5 = vadd.f32 %v6367_v49, %v3231_v41  ;;  %v3232_v38 = vmul.f32 %v6357_v25, %v3089_v6  ;;  %v3092_v4 = vadd.f32 %v3548_v48, %v2770_v17  ;;  %v2772_v63 = vpop.f32.mrb[103].mxu0 }
 0x36a   :  { %3383 = vst.msk [vmem:[%s6856_s6 + $0x188] sm:$0xff] %vm3333_vm0, %v3310_v5  ;;  %v3311_v19 = vadd.f32 %v6367_v49, %v3232_v38  ;;  %v3233_v29 = vmul.f32 %v6357_v25, %v3092_v4 }
 0x36c   :  { %v3551_v18 = vpop.f32.mrb[88].mxu1  ;;  %3384 = vst.msk [vmem:[%s6856_s6 + $0x190] sm:$0xff] %vm3333_vm0, %v3311_v19  ;;  %v3312_v47 = vadd.f32 %v6367_v49, %v3233_v29 }
 0x36d   :  { %v3105_v51 = vadd.f32 %v3551_v18, %v6060_v56  ;;  %v3096_v39 = vpop.f32.mrb[89].mxu1  ;;  %v2775_v7 = vpop.f32.mrb[104].mxu0 }
 0x36e   :  { %v3552_v1 = vpop.f32.mrb[90].mxu1  ;;  %3385 = vst.msk [vmem:[%s6856_s6 + $0x198] sm:$0xff] %vm3333_vm0, %v3312_v47  ;;  %v3097_v56 = vadd.f32 %v3096_v39, %v2775_v7  ;;  %v2777_v21 = vpop.f32.mrb[105].mxu0  ;;  %v7510_v47 = vld [vmem:[#allocation90_spill] sm:$0xff] }
 0x36f   :  { %v3236_v24 = vmul.f32 %v6357_v25, %v3105_v51  ;;  %v3108_v30 = vadd.f32 %v3552_v1, %v6062_v37  ;;  %v3099_v43 = vpop.f32.mrb[91].mxu1  ;;  %v2778_v2 = vpop.f32.mrb[106].mxu0 }
 0x370   :  { %v3234_v9 = vmul.f32 %v6357_v25, %v3097_v56  ;;  %v3100_v59 = vadd.f32 %v3099_v43, %v2778_v2  ;;  %v2780_v35 = vpop.f32.mrb[107].mxu0 }
 0x371   :  { %v3315_v45 = vadd.f32 %v6367_v49, %v3236_v24  ;;  %v3237_v61 = vmul.f32 %v6357_v25, %v3108_v30  ;;  %v7511_v30 = vld [vmem:[#allocation7_spill] sm:$0xff] }
 0x372   :  { %v3313_v31 = vadd.f32 %v6367_v49, %v3234_v9  ;;  %v3235_v11 = vmul.f32 %v6357_v25, %v3100_v59 }
 0x373   :  { %3388 = vst.msk [vmem:[%s6856_s6 + $0x1b0] sm:$0xff] %vm3333_vm0, %v3315_v45  ;;  %v3316_v37 = vadd.f32 %v6367_v49, %v3237_v61 }
 0x374   :  { %v3555_v42 = vpop.f32.mrb[92].mxu1  ;;  %3386 = vst.msk [vmem:[%s6856_s6 + $0x1a0] sm:$0xff] %vm3333_vm0, %v3313_v31  ;;  %v3314_v50 = vadd.f32 %v6367_v49, %v3235_v11 }
 0x375   :  { %3389 = vst.msk [vmem:[%s6856_s6 + $0x1b8] sm:$0xff] %vm3333_vm0, %v3316_v37  ;;  %v3121_v53 = vadd.f32 %v3555_v42, %v6102_v33  ;;  %v3112_v15 = vpop.f32.mrb[93].mxu1 }
 0x376   :  { %v3113_v40 = vadd.f32 %v3112_v15, %v6071_v0  ;;  %v3556_v3 = vpop.f32.mrb[94].mxu1  ;;  %3387 = vst.msk [vmem:[%s6856_s6 + $0x1a8] sm:$0xff] %vm3333_vm0, %v3314_v50 }
 0x377   :  { %v3240_v54 = vmul.f32 %v6357_v25, %v3121_v53  ;;  %v3124_v46 = vadd.f32 %v3556_v3, %v6107_v27  ;;  %v3115_v60 = vpop.f32.mrb[95].mxu1 }
 0x378   :  { %v3238_v33 = vmul.f32 %v6357_v25, %v3113_v40  ;;  %v3116_v26 = vadd.f32 %v3115_v60, %v6073_v55 }
 0x379   :  { %v3319_v22 = vadd.f32 %v6367_v49, %v3240_v54  ;;  %v3241_v48 = vmul.f32 %v6357_v25, %v3124_v46 }
 0x37a   :  { %v3317_v0 = vadd.f32 %v6367_v49, %v3238_v33  ;;  %v3239_v13 = vmul.f32 %v6357_v25, %v3116_v26 }
 0x37b   :  { %3392 = vst.msk [vmem:[%s6856_s6 + $0x1d0] sm:$0xff] %vm3333_vm0, %v3319_v22  ;;  %v3320_v27 = vadd.f32 %v6367_v49, %v3241_v48 }
 0x37c   :  { %3390 = vst.msk [vmem:[%s6856_s6 + $0x1c0] sm:$0xff] %vm3333_vm0, %v3317_v0  ;;  %v3318_v55 = vadd.f32 %v6367_v49, %v3239_v13  ;;  %v3559_v10 = vpop.f32.mrb[96].mxu1 }
 0x37d   :  { %3393 = vst.msk [vmem:[%s6856_s6 + $0x1d8] sm:$0xff] %vm3333_vm0, %v3320_v27  ;;  %v3137_v8 = vadd.f32 %v3559_v10, %v6148_v52  ;;  %v3128_v16 = vpop.f32.mrb[97].mxu1 }
 0x37e   :  { %3391 = vst.msk [vmem:[%s6856_s6 + $0x1c8] sm:$0xff] %vm3333_vm0, %v3318_v55  ;;  %v3129_v14 = vadd.f32 %v3128_v16, %v6123_v58  ;;  %v3560_v32 = vpop.f32.mrb[98].mxu1 }
 0x37f   :  { %v3244_v41 = vmul.f32 %v6357_v25, %v3137_v8  ;;  %v3140_v6 = vadd.f32 %v3560_v32, %v6156_v36  ;;  %v3131_v62 = vpop.f32.mrb[99].mxu1 }
 0x380   :  { %v3242_v17 = vmul.f32 %v6357_v25, %v3129_v14  ;;  %v3132_v5 = vadd.f32 %v3131_v62, %v6125_v20 }
 0x381   :  { %v3323_v52 = vadd.f32 %v6367_v49, %v3244_v41  ;;  %v3245_v38 = vmul.f32 %v6357_v25, %v3140_v6 }
 0x382   :  { %v3321_v4 = vadd.f32 %v6367_v49, %v3242_v17  ;;  %v3243_v63 = vmul.f32 %v6357_v25, %v3132_v5 }
 0x383   :  { %3396 = vst.msk [vmem:[%s6856_s6 + $0x1f0] sm:$0xff] %vm3333_vm0, %v3323_v52  ;;  %v3324_v58 = vadd.f32 %v6367_v49, %v3245_v38 }
 0x384   :  { %3394 = vst.msk [vmem:[%s6856_s6 + $0x1e0] sm:$0xff] %vm3333_vm0, %v3321_v4  ;;  %v3322_v20 = vadd.f32 %v6367_v49, %v3243_v63  ;;  %v3563_v36 = vpop.f32.mrb[100].mxu1 }
 0x385   :  { %3397 = vst.msk [vmem:[%s6856_s6 + $0x1f8] sm:$0xff] %vm3333_vm0, %v3324_v58  ;;  %v3153_v19 = vadd.f32 %v3563_v36, %v6215_v23  ;;  %v3144_v29 = vpop.f32.mrb[101].mxu1 }
 0x386   :  { %3395 = vst.msk [vmem:[%s6856_s6 + $0x1e8] sm:$0xff] %vm3333_vm0, %v3322_v20  ;;  %v3145_v18 = vadd.f32 %v3144_v29, %v6175_v44  ;;  %v3564_v51 = vpop.f32.mrb[102].mxu1 }
 0x387   :  { %v3248_v39 = vmul.f32 %v6357_v25, %v3153_v19  ;;  %v3156_v1 = vadd.f32 %v3564_v51, %v7510_v47  ;;  %v3147_v7 = vpop.f32.mrb[103].mxu1 }
 0x388   :  { %v3246_v24 = vmul.f32 %v6357_v25, %v3145_v18  ;;  %v3148_v43 = vadd.f32 %v3147_v7, %v7511_v30 }
 0x389   :  { %v3327_v23 = vadd.f32 %v6367_v49, %v3248_v39  ;;  %v3249_v56 = vmul.f32 %v6357_v25, %v3156_v1 }
 0x38a   :  { %v3325_v21 = vadd.f32 %v6367_v49, %v3246_v24  ;;  %v3247_v2 = vmul.f32 %v6357_v25, %v3148_v43 }
 0x38b   :  { %3400 = vst.msk [vmem:[%s6856_s6 + $0x210] sm:$0xff] %vm3333_vm0, %v3327_v23  ;;  %v3328_v44 = vadd.f32 %v6367_v49, %v3249_v56 }
 0x38c   :  { %3398 = vst.msk [vmem:[%s6856_s6 + $0x200] sm:$0xff] %vm3333_vm0, %v3325_v21  ;;  %v3326_v45 = vadd.f32 %v6367_v49, %v3247_v2  ;;  %v3567_v61 = vpop.f32.mrb[104].mxu1 }
 0x38d   :  { %3401 = vst.msk [vmem:[%s6856_s6 + $0x218] sm:$0xff] %vm3333_vm0, %v3328_v44  ;;  %v3169_v9 = vadd.f32 %v3567_v61, %v6315_v12  ;;  %v3160_v59 = vpop.f32.mrb[105].mxu1 }
 0x38e   :  { %3399 = vst.msk [vmem:[%s6856_s6 + $0x208] sm:$0xff] %vm3333_vm0, %v3326_v45  ;;  %v3161_v35 = vadd.f32 %v3160_v59, %v6251_v28  ;;  %v3568_v37 = vpop.f32.mrb[106].mxu1 }
 0x38f   :  { %v3252_v31 = vmul.f32 %v6357_v25, %v3169_v9  ;;  %v3172_v11 = vadd.f32 %v3568_v37, %v6325_v34  ;;  %v3163_v42 = vpop.f32.mrb[107].mxu1 }
 0x390   :  { %v3250_v53 = vmul.f32 %v6357_v25, %v3161_v35  ;;  %v3164_v15 = vadd.f32 %v3163_v42, %v6259_v57 }
 0x391   :  { %v3331_v12 = vadd.f32 %v6367_v49, %v3252_v31  ;;  %v3253_v50 = vmul.f32 %v6357_v25, %v3172_v11 }
 0x392   :  { %v3329_v40 = vadd.f32 %v6367_v49, %v3250_v53  ;;  %v3251_v3 = vmul.f32 %v6357_v25, %v3164_v15 }
 0x393   :  { %3404 = vst.msk [vmem:[%s6856_s6 + $0x230] sm:$0xff] %vm3333_vm0, %v3331_v12  ;;  %v3332_v28 = vadd.f32 %v6367_v49, %v3253_v50 }
 0x394   :  { %3402 = vst.msk [vmem:[%s6856_s6 + $0x220] sm:$0xff] %vm3333_vm0, %v3329_v40  ;;  %v3330_v57 = vadd.f32 %v6367_v49, %v3251_v3 }
 0x395   :  { %3405 = vst.msk [vmem:[%s6856_s6 + $0x238] sm:$0xff] %vm3333_vm0, %v3332_v28 }
 0x396   :  { %3403 = vst.msk [vmem:[%s6856_s6 + $0x228] sm:$0xff] %vm3333_vm0, %v3330_v57 }
 0x397   :  { %3410 = vsyncpa [#allocation3], 1 }

</bundles_post_ra>
